<compile_context>
chip_gen: v7x
topology: tpu7x:2x2x1
jax: 0.10.0
libtpu: 0.0.40
codegen_flags: <defaults>
</compile_context>

<pallas_src>
import functools
import math

import jax
import jax.numpy as jnp
from jax.experimental import pallas as pl
from jax.experimental.pallas import tpu as pltpu  # noqa: F401  (TPU backend)

# ----------------------------- model config ---------------------------------
B, S, D = 2, 8, 32           # batch, seq, d_model
N_HEADS, D_HEAD = 4, 8       # n_heads * d_head == d_model
D_MLP = 4 * D
VOCAB = 64
N_LAYERS = 2
HOOK_LAYER = 0               # hook_point = "blocks.0.hook_resid_post"
LN_EPS = 1e-5


# ------------------------- in-kernel math helpers ---------------------------
def _layernorm(x, w, b):
    mu = jnp.mean(x, axis=-1, keepdims=True)
    xc = x - mu
    var = jnp.mean(xc * xc, axis=-1, keepdims=True)
    return xc * jax.lax.rsqrt(var + LN_EPS) * w + b


def _gelu_new(x):
    # tanh approximation ("gelu_new", TransformerLens / GPT-2 default)
    c = jnp.float32(math.sqrt(2.0 / math.pi))
    return 0.5 * x * (1.0 + jnp.tanh(c * (x + 0.044715 * x * x * x)))


# ------------------------------ fused kernel ---------------------------------
def fused_forward_kernel(tok_ref, we_ref, wpos_ref,
                         wqkv_ref, bqkv_ref, wo_ref,
                         win_ref, bin_ref, wout_ref, vec_ref,
                         lnf_ref, wu_ref, bu_ref,
                         logits_ref, resid_out_ref, act_ref):
    """Whole forward (embed -> blocks -> final LN -> unembed) in one program."""
    # ---- token embedding via one-hot matmul (MXU gather) + positional ------
    vocab_iota = jax.lax.broadcasted_iota(jnp.int32, (B * S, VOCAB), 1)
    one_hot = (vocab_iota == tok_ref[...]).astype(jnp.float32)       # (B*S, V)
    x = jnp.dot(one_hot, we_ref[...],
                preferred_element_type=jnp.float32) + wpos_ref[...]  # (B*S, D)

    # causal additive mask computed once, reused by every layer & head
    row = jax.lax.broadcasted_iota(jnp.int32, (S, S), 0)
    col = jax.lax.broadcasted_iota(jnp.int32, (S, S), 1)
    mask_bias = jnp.where(row >= col, 0.0, -1e30)[None, :, :]        # (1, S, S)

    for layer in range(N_LAYERS):                            # static unroll (2)
        vecs = vec_ref[layer]                                # (6, D)
        ln1_w, ln1_b = vecs[0:1], vecs[1:2]
        b_o = vecs[2:3]
        ln2_w, ln2_b = vecs[3:4], vecs[4:5]
        b_out = vecs[5:6]

        # ------------------------ attention --------------------------------
        xn = _layernorm(x, ln1_w, ln1_b)                     # (B*S, D)
        attn_out = None
        for h in range(N_HEADS):                             # static unroll (4)
            # W_Q / b_Q already carry the 1/sqrt(d_head) scale (pack time)
            qh = jnp.dot(xn, wqkv_ref[layer, 0, h],
                         preferred_element_type=jnp.float32) + bqkv_ref[layer, 0, h]
            kh = jnp.dot(xn, wqkv_ref[layer, 1, h],
                         preferred_element_type=jnp.float32) + bqkv_ref[layer, 1, h]
            vh = jnp.dot(xn, wqkv_ref[layer, 2, h],
                         preferred_element_type=jnp.float32) + bqkv_ref[layer, 2, h]
            q3 = qh.reshape(B, S, D_HEAD)                    # sublane split only
            k3 = kh.reshape(B, S, D_HEAD)
            v3 = vh.reshape(B, S, D_HEAD)

            s = jnp.einsum('bqd,bkd->bqk', q3, k3,
                           preferred_element_type=jnp.float32) + mask_bias
            m = jnp.max(s, axis=-1, keepdims=True)
            e = jnp.exp(s - m)
            p = e * pl.reciprocal(jnp.sum(e, axis=-1, keepdims=True), approx=True)
            z3 = jnp.einsum('bqk,bkd->bqd', p, v3,
                            preferred_element_type=jnp.float32)

            head_out = jnp.dot(z3.reshape(B * S, D_HEAD), wo_ref[layer, h],
                               preferred_element_type=jnp.float32)
            attn_out = head_out if attn_out is None else attn_out + head_out

        resid_mid = x + attn_out + b_o

        # --------------------------- MLP ------------------------------------
        xn2 = _layernorm(resid_mid, ln2_w, ln2_b)
        h_pre = jnp.dot(xn2, win_ref[layer],
                        preferred_element_type=jnp.float32) + bin_ref[layer]
        mlp_out = jnp.dot(_gelu_new(h_pre), wout_ref[layer],
                          preferred_element_type=jnp.float32) + b_out
        x = resid_mid + mlp_out                              # resid_post

        if layer == HOOK_LAYER:                              # hook_fn_store_act
            act_ref[...] = x.reshape(B, S, D)

    resid_out_ref[...] = x.reshape(B, S, D)                  # final resid_post

    # ----------------------- final LN + unembed -----------------------------
    lnf = lnf_ref[...]
    xnf = _layernorm(x, lnf[0:1], lnf[1:2])
    logits = jnp.dot(xnf, wu_ref[...],
                     preferred_element_type=jnp.float32) + bu_ref[...]
    logits_ref[...] = logits.reshape(B, S, VOCAB)


# --------------------------- parameter packing -------------------------------
def pack_params(params):
    """One-time packing of per-layer weights into a few VMEM-friendly slabs.

    Run ONCE outside the per-call forward (it is a pure function of params);
    the jitted forward then contains only the fused pallas_call.
    """
    wqkv, bqkv, wo, win, bin_, wout, vecs = [], [], [], [], [], [], []
    att_scale = jnp.float32(1.0 / math.sqrt(D_HEAD))

    def per_head_cols(w):   # (D, D) -> (H, D, DH); head h = cols h*DH:(h+1)*DH
        return w.reshape(D, N_HEADS, D_HEAD).transpose(1, 0, 2)

    def per_head_bias(b):   # (1, D) -> (H, 1, DH)
        return b.reshape(1, N_HEADS, D_HEAD).transpose(1, 0, 2)

    for blk in params["blocks"]:
        wqkv.append(jnp.stack([per_head_cols(blk["W_Q"]) * att_scale,
                               per_head_cols(blk["W_K"]),
                               per_head_cols(blk["W_V"])]))           # (3,H,D,DH)
        bqkv.append(jnp.stack([per_head_bias(blk["b_Q"]) * att_scale,
                               per_head_bias(blk["b_K"]),
                               per_head_bias(blk["b_V"])]))           # (3,H,1,DH)
        wo.append(blk["W_O"].reshape(N_HEADS, D_HEAD, D))             # (H,DH,D)
        win.append(blk["W_in"])                                       # (D,D_MLP)
        bin_.append(blk["b_in"])                                      # (1,D_MLP)
        wout.append(blk["W_out"])                                     # (D_MLP,D)
        vecs.append(jnp.concatenate([blk["ln1_w"], blk["ln1_b"], blk["b_O"],
                                     blk["ln2_w"], blk["ln2_b"], blk["b_out"]],
                                    axis=0))                          # (6,D)

    lnf = jnp.concatenate([params["lnf_w"], params["lnf_b"]], axis=0)  # (2,D)
    wpos_tiled = jnp.tile(params["W_pos"], (B, 1))                     # (B*S,D)

    return (params["W_E"], wpos_tiled,
            jnp.stack(wqkv), jnp.stack(bqkv), jnp.stack(wo),
            jnp.stack(win), jnp.stack(bin_), jnp.stack(wout), jnp.stack(vecs),
            lnf, params["W_U"], params["b_U"])


# -------------------- TransformerLensWrapper.forward -------------------------
def transformer_lens_wrapper_forward(tokens, packed, return_logits=True):
    """Mirror of TransformerLensWrapper.forward.

    tokens: int32 [batch, seq];  packed: output of pack_params (one-time).
    returns (logits, residual, activation) if return_logits else (residual, activation)
    """
    tok_col = tokens.reshape(B * S, 1).astype(jnp.int32)   # sublane-folded ids

    logits, residual, activation = pl.pallas_call(
        fused_forward_kernel,
        out_shape=(
            jax.ShapeDtypeStruct((B, S, VOCAB), jnp.float32),
            jax.ShapeDtypeStruct((B, S, D), jnp.float32),
            jax.ShapeDtypeStruct((B, S, D), jnp.float32),
        ),
    )(tok_col, *packed)

    if return_logits:
        return logits, residual, activation
    return residual, activation


# --------------------------- pure-JAX reference ------------------------------
def _reference_forward(tokens, params):
    resid = params["W_E"][tokens] + params["W_pos"][None, :, :]

    def ln(x, w, b):
        mu = x.mean(-1, keepdims=True)
        xc = x - mu
        return xc * jax.lax.rsqrt((xc * xc).mean(-1, keepdims=True) + LN_EPS) * w + b

    mask = jnp.tril(jnp.ones((S, S), bool))
    activation = None
    for layer, blk in enumerate(params["blocks"]):
        xn = ln(resid, blk["ln1_w"], blk["ln1_b"])
        q = (xn @ blk["W_Q"] + blk["b_Q"]).reshape(B, S, N_HEADS, D_HEAD)
        k = (xn @ blk["W_K"] + blk["b_K"]).reshape(B, S, N_HEADS, D_HEAD)
        v = (xn @ blk["W_V"] + blk["b_V"]).reshape(B, S, N_HEADS, D_HEAD)
        s = jnp.einsum('bqhd,bkhd->bhqk', q, k) / math.sqrt(D_HEAD)
        s = jnp.where(mask[None, None], s, -1e30)
        p = jax.nn.softmax(s, axis=-1)
        z = jnp.einsum('bhqk,bkhd->bqhd', p, v).reshape(B, S, D)
        resid = resid + z @ blk["W_O"] + blk["b_O"]
        xn2 = ln(resid, blk["ln2_w"], blk["ln2_b"])
        h = xn2 @ blk["W_in"] + blk["b_in"]
        h = 0.5 * h * (1.0 + jnp.tanh(math.sqrt(2.0 / math.pi) * (h + 0.044715 * h ** 3)))
        resid = resid + h @ blk["W_out"] + blk["b_out"]
        if layer == HOOK_LAYER:
            activation = resid
    xnf = ln(resid, params["lnf_w"], params["lnf_b"])
    logits = xnf @ params["W_U"] + params["b_U"]
    return logits, resid, activation


# ------------------------------ params init ---------------------------------
def init_params(key):
    keys = iter(jax.random.split(key, 8 * N_LAYERS + 8))

    def nrm(shape, scale=0.02):
        return (scale * jax.random.normal(next(keys), shape)).astype(jnp.float32)

    ones = lambda s: jnp.ones(s, jnp.float32)
    zeros = lambda s: jnp.zeros(s, jnp.float32)

    params = {
        "W_E": nrm((VOCAB, D)),
        "W_pos": nrm((S, D)),
        "lnf_w": ones((1, D)), "lnf_b": zeros((1, D)),
        "W_U": nrm((D, VOCAB)), "b_U": zeros((1, VOCAB)),
        "blocks": [],
    }
    for _ in range(N_LAYERS):
        params["blocks"].append(dict(
            ln1_w=ones((1, D)), ln1_b=zeros((1, D)),
            W_Q=nrm((D, D)), b_Q=zeros((1, D)),
            W_K=nrm((D, D)), b_K=zeros((1, D)),
            W_V=nrm((D, D)), b_V=zeros((1, D)),
            W_O=nrm((D, D)), b_O=zeros((1, D)),
            ln2_w=ones((1, D)), ln2_b=zeros((1, D)),
            W_in=nrm((D, D_MLP)), b_in=zeros((1, D_MLP)),
            W_out=nrm((D_MLP, D)), b_out=zeros((1, D)),
        ))
    return params


# --------------------------------- main --------------------------------------
if __name__ == "__main__":
    key = jax.random.PRNGKey(0)
    k_tok, k_par = jax.random.split(key)
    params = init_params(k_par)
    tokens = jax.random.randint(k_tok, (B, S), 0, VOCAB, dtype=jnp.int32)

    # One-time weight packing (outside the per-call forward).
    packed = jax.tree_util.tree_map(jnp.asarray, pack_params(params))

    fwd = jax.jit(functools.partial(transformer_lens_wrapper_forward),
                  static_argnames=("return_logits",))
    logits, residual, activation = fwd(tokens, packed, return_logits=True)
    jax.block_until_ready((logits, residual, activation))

    assert logits.shape == (B, S, VOCAB)
    assert residual.shape == (B, S, D)
    assert activation.shape == (B, S, D)
    assert bool(jnp.all(jnp.isfinite(logits)))

    # return_logits=False path (wrapper semantics)
    residual2, activation2 = fwd(tokens, packed, return_logits=False)
    jax.block_until_ready((residual2, activation2))
    assert jnp.allclose(residual2, residual) and jnp.allclose(activation2, activation)

    ref_logits, ref_resid, ref_act = _reference_forward(tokens, params)
    assert jnp.allclose(logits, ref_logits, atol=1e-2, rtol=1e-2)
    assert jnp.allclose(residual, ref_resid, atol=1e-2, rtol=1e-2)
    assert jnp.allclose(activation, ref_act, atol=1e-2, rtol=1e-2)

    print("KERNEL_OK")
</pallas_src>

<mosaic_0001>
module attributes {stable_mosaic.version = 11 : i64} {
  func.func @fused_forward_kernel(%arg0: memref<16x1xi32, #tpu.memory_space<vmem>>, %arg1: memref<64x32xf32, #tpu.memory_space<vmem>>, %arg2: memref<16x32xf32, #tpu.memory_space<vmem>>, %arg3: memref<2x3x4x32x8xf32, #tpu.memory_space<vmem>>, %arg4: memref<2x3x4x1x8xf32, #tpu.memory_space<vmem>>, %arg5: memref<2x4x8x32xf32, #tpu.memory_space<vmem>>, %arg6: memref<2x32x128xf32, #tpu.memory_space<vmem>>, %arg7: memref<2x1x128xf32, #tpu.memory_space<vmem>>, %arg8: memref<2x128x32xf32, #tpu.memory_space<vmem>>, %arg9: memref<2x6x32xf32, #tpu.memory_space<vmem>>, %arg10: memref<2x32xf32, #tpu.memory_space<vmem>>, %arg11: memref<32x64xf32, #tpu.memory_space<vmem>>, %arg12: memref<1x64xf32, #tpu.memory_space<vmem>>, %arg13: memref<2x8x64xf32, #tpu.memory_space<vmem>>, %arg14: memref<2x8x32xf32, #tpu.memory_space<vmem>>, %arg15: memref<2x8x32xf32, #tpu.memory_space<vmem>>) attributes {dimension_semantics = [], scalar_prefetch = 0 : i64, scratch_operands = 0 : i64, tpu.core_type = #tpu.core_type<tc>} {
    %0 = tpu.iota {dimensions = array<i32: 1>} : vector<16x64xi32>
    %c0 = arith.constant 0 : index
    %c0_0 = arith.constant 0 : index
    %1 = vector.load %arg0[%c0, %c0_0] : memref<16x1xi32, #tpu.memory_space<vmem>>, vector<16x1xi32>
    %2 = vector.broadcast %1 : vector<16x1xi32> to vector<16x64xi32>
    %3 = arith.cmpi eq, %0, %2 : vector<16x64xi32>
    %4 = arith.extui %3 : vector<16x64xi1> to vector<16x64xi32>
    %5 = arith.sitofp %4 : vector<16x64xi32> to vector<16x64xf32>
    %c0_1 = arith.constant 0 : index
    %c0_2 = arith.constant 0 : index
    %6 = vector.load %arg1[%c0_1, %c0_2] : memref<64x32xf32, #tpu.memory_space<vmem>>, vector<64x32xf32>
    %cst = arith.constant dense<0.000000e+00> : vector<16x32xf32>
    %7 = tpu.matmul %5, %6, %cst {dimension_numbers = #tpu.dot_dimension_numbers<[1], [0], [0], [1], [0, 0, 1, 1], [], []>} : vector<16x64xf32>, vector<64x32xf32>, vector<16x32xf32> -> vector<16x32xf32>
    %c0_3 = arith.constant 0 : index
    %c0_4 = arith.constant 0 : index
    %8 = vector.load %arg2[%c0_3, %c0_4] : memref<16x32xf32, #tpu.memory_space<vmem>>, vector<16x32xf32>
    %9 = arith.addf %7, %8 : vector<16x32xf32>
    %10 = tpu.iota {dimensions = array<i32: 0>} : vector<8x8xi32>
    %11 = tpu.iota {dimensions = array<i32: 1>} : vector<8x8xi32>
    %12 = arith.cmpi sge, %10, %11 : vector<8x8xi32>
    %cst_5 = arith.constant 0.000000e+00 : f32
    %cst_6 = arith.constant -1.000000e+30 : f32
    %13 = vector.broadcast %cst_5 : f32 to vector<8x8xf32>
    %14 = vector.broadcast %cst_6 : f32 to vector<8x8xf32>
    %15 = arith.select %12, %13, %14 : vector<8x8xi1>, vector<8x8xf32>
    %16 = vector.shape_cast %15 : vector<8x8xf32> to vector<1x8x8xf32>
    %c0_7 = arith.constant 0 : index
    %c0_8 = arith.constant 0 : index
    %c0_9 = arith.constant 0 : index
    %17 = vector.load %arg9[%c0_7, %c0_8, %c0_9] : memref<2x6x32xf32, #tpu.memory_space<vmem>>, vector<1x6x32xf32>
    %18 = vector.shape_cast %17 : vector<1x6x32xf32> to vector<6x32xf32>
    %19 = vector.extract_strided_slice %18 {offsets = [0, 0], sizes = [1, 32], strides = [1, 1]} : vector<6x32xf32> to vector<1x32xf32>
    %20 = vector.extract_strided_slice %18 {offsets = [1, 0], sizes = [1, 32], strides = [1, 1]} : vector<6x32xf32> to vector<1x32xf32>
    %21 = vector.extract_strided_slice %18 {offsets = [2, 0], sizes = [1, 32], strides = [1, 1]} : vector<6x32xf32> to vector<1x32xf32>
    %22 = vector.extract_strided_slice %18 {offsets = [3, 0], sizes = [1, 32], strides = [1, 1]} : vector<6x32xf32> to vector<1x32xf32>
    %23 = vector.extract_strided_slice %18 {offsets = [4, 0], sizes = [1, 32], strides = [1, 1]} : vector<6x32xf32> to vector<1x32xf32>
    %24 = vector.extract_strided_slice %18 {offsets = [5, 0], sizes = [1, 32], strides = [1, 1]} : vector<6x32xf32> to vector<1x32xf32>
    %cst_10 = arith.constant dense<0.000000e+00> : vector<16xf32>
    %25 = vector.multi_reduction <add>, %9, %cst_10 [1] : vector<16x32xf32> to vector<16xf32>
    %26 = vector.shape_cast %25 : vector<16xf32> to vector<16x1xf32>
    %cst_11 = arith.constant 3.200000e+01 : f32
    %27 = vector.broadcast %cst_11 : f32 to vector<16x1xf32>
    %28 = arith.divf %26, %27 : vector<16x1xf32>
    %29 = vector.broadcast %28 : vector<16x1xf32> to vector<16x32xf32>
    %30 = arith.subf %9, %29 : vector<16x32xf32>
    %31 = arith.mulf %30, %30 : vector<16x32xf32>
    %cst_12 = arith.constant dense<0.000000e+00> : vector<16xf32>
    %32 = vector.multi_reduction <add>, %31, %cst_12 [1] : vector<16x32xf32> to vector<16xf32>
    %33 = vector.shape_cast %32 : vector<16xf32> to vector<16x1xf32>
    %cst_13 = arith.constant 3.200000e+01 : f32
    %34 = vector.broadcast %cst_13 : f32 to vector<16x1xf32>
    %35 = arith.divf %33, %34 : vector<16x1xf32>
    %cst_14 = arith.constant 9.99999974E-6 : f32
    %36 = vector.broadcast %cst_14 : f32 to vector<16x1xf32>
    %37 = arith.addf %35, %36 : vector<16x1xf32>
    %38 = math.rsqrt %37 : vector<16x1xf32>
    %39 = vector.broadcast %38 : vector<16x1xf32> to vector<16x32xf32>
    %40 = arith.mulf %30, %39 : vector<16x32xf32>
    %41 = vector.broadcast %19 : vector<1x32xf32> to vector<16x32xf32>
    %42 = arith.mulf %40, %41 : vector<16x32xf32>
    %43 = vector.broadcast %20 : vector<1x32xf32> to vector<16x32xf32>
    %44 = arith.addf %42, %43 : vector<16x32xf32>
    %c0_15 = arith.constant 0 : index
    %c0_16 = arith.constant 0 : index
    %c0_17 = arith.constant 0 : index
    %c0_18 = arith.constant 0 : index
    %c0_19 = arith.constant 0 : index
    %45 = vector.load %arg3[%c0_15, %c0_16, %c0_17, %c0_18, %c0_19] : memref<2x3x4x32x8xf32, #tpu.memory_space<vmem>>, vector<1x1x1x32x8xf32>
    %46 = vector.shape_cast %45 : vector<1x1x1x32x8xf32> to vector<32x8xf32>
    %cst_20 = arith.constant dense<0.000000e+00> : vector<16x8xf32>
    %47 = tpu.matmul %44, %46, %cst_20 {dimension_numbers = #tpu.dot_dimension_numbers<[1], [0], [0], [1], [0, 0, 1, 1], [], []>} : vector<16x32xf32>, vector<32x8xf32>, vector<16x8xf32> -> vector<16x8xf32>
    %c0_21 = arith.constant 0 : index
    %c0_22 = arith.constant 0 : index
    %c0_23 = arith.constant 0 : index
    %c0_24 = arith.constant 0 : index
    %c0_25 = arith.constant 0 : index
    %48 = vector.load %arg4[%c0_21, %c0_22, %c0_23, %c0_24, %c0_25] : memref<2x3x4x1x8xf32, #tpu.memory_space<vmem>>, vector<1x1x1x1x8xf32>
    %49 = vector.shape_cast %48 : vector<1x1x1x1x8xf32> to vector<1x8xf32>
    %50 = vector.broadcast %49 : vector<1x8xf32> to vector<16x8xf32>
    %51 = arith.addf %47, %50 : vector<16x8xf32>
    %c0_26 = arith.constant 0 : index
    %c1 = arith.constant 1 : index
    %c0_27 = arith.constant 0 : index
    %c0_28 = arith.constant 0 : index
    %c0_29 = arith.constant 0 : index
    %52 = vector.load %arg3[%c0_26, %c1, %c0_27, %c0_28, %c0_29] : memref<2x3x4x32x8xf32, #tpu.memory_space<vmem>>, vector<1x1x1x32x8xf32>
    %53 = vector.shape_cast %52 : vector<1x1x1x32x8xf32> to vector<32x8xf32>
    %cst_30 = arith.constant dense<0.000000e+00> : vector<16x8xf32>
    %54 = tpu.matmul %44, %53, %cst_30 {dimension_numbers = #tpu.dot_dimension_numbers<[1], [0], [0], [1], [0, 0, 1, 1], [], []>} : vector<16x32xf32>, vector<32x8xf32>, vector<16x8xf32> -> vector<16x8xf32>
    %c0_31 = arith.constant 0 : index
    %c1_32 = arith.constant 1 : index
    %c0_33 = arith.constant 0 : index
    %c0_34 = arith.constant 0 : index
    %c0_35 = arith.constant 0 : index
    %55 = vector.load %arg4[%c0_31, %c1_32, %c0_33, %c0_34, %c0_35] : memref<2x3x4x1x8xf32, #tpu.memory_space<vmem>>, vector<1x1x1x1x8xf32>
    %56 = vector.shape_cast %55 : vector<1x1x1x1x8xf32> to vector<1x8xf32>
    %57 = vector.broadcast %56 : vector<1x8xf32> to vector<16x8xf32>
    %58 = arith.addf %54, %57 : vector<16x8xf32>
    %c0_36 = arith.constant 0 : index
    %c2 = arith.constant 2 : index
    %c0_37 = arith.constant 0 : index
    %c0_38 = arith.constant 0 : index
    %c0_39 = arith.constant 0 : index
    %59 = vector.load %arg3[%c0_36, %c2, %c0_37, %c0_38, %c0_39] : memref<2x3x4x32x8xf32, #tpu.memory_space<vmem>>, vector<1x1x1x32x8xf32>
    %60 = vector.shape_cast %59 : vector<1x1x1x32x8xf32> to vector<32x8xf32>
    %cst_40 = arith.constant dense<0.000000e+00> : vector<16x8xf32>
    %61 = tpu.matmul %44, %60, %cst_40 {dimension_numbers = #tpu.dot_dimension_numbers<[1], [0], [0], [1], [0, 0, 1, 1], [], []>} : vector<16x32xf32>, vector<32x8xf32>, vector<16x8xf32> -> vector<16x8xf32>
    %c0_41 = arith.constant 0 : index
    %c2_42 = arith.constant 2 : index
    %c0_43 = arith.constant 0 : index
    %c0_44 = arith.constant 0 : index
    %c0_45 = arith.constant 0 : index
    %62 = vector.load %arg4[%c0_41, %c2_42, %c0_43, %c0_44, %c0_45] : memref<2x3x4x1x8xf32, #tpu.memory_space<vmem>>, vector<1x1x1x1x8xf32>
    %63 = vector.shape_cast %62 : vector<1x1x1x1x8xf32> to vector<1x8xf32>
    %64 = vector.broadcast %63 : vector<1x8xf32> to vector<16x8xf32>
    %65 = arith.addf %61, %64 : vector<16x8xf32>
    %66 = vector.shape_cast %51 : vector<16x8xf32> to vector<2x8x8xf32>
    %67 = vector.shape_cast %58 : vector<16x8xf32> to vector<2x8x8xf32>
    %68 = vector.shape_cast %65 : vector<16x8xf32> to vector<2x8x8xf32>
    "tpu.trace_start"() <{level = 10 : i32, message = "bqd,bkd->bqk"}> : () -> ()
    %cst_46 = arith.constant dense<0.000000e+00> : vector<2x8x8xf32>
    %69 = tpu.matmul %66, %67, %cst_46 {dimension_numbers = #tpu.dot_dimension_numbers<[2], [2], [1], [1], [0, 0, 0, 1, 1, 1], [0], [0]>} : vector<2x8x8xf32>, vector<2x8x8xf32>, vector<2x8x8xf32> -> vector<2x8x8xf32>
    "tpu.trace_stop"() : () -> ()
    %70 = vector.broadcast %16 : vector<1x8x8xf32> to vector<2x8x8xf32>
    %71 = arith.addf %69, %70 : vector<2x8x8xf32>
    %cst_47 = arith.constant dense<0xFF800000> : vector<2x8xf32>
    %72 = vector.multi_reduction <maximumf>, %71, %cst_47 [2] : vector<2x8x8xf32> to vector<2x8xf32>
    %73 = vector.shape_cast %72 : vector<2x8xf32> to vector<2x8x1xf32>
    %74 = vector.broadcast %73 : vector<2x8x1xf32> to vector<2x8x8xf32>
    %75 = arith.subf %71, %74 : vector<2x8x8xf32>
    %76 = math.exp %75 : vector<2x8x8xf32>
    %cst_48 = arith.constant dense<0.000000e+00> : vector<2x8xf32>
    %77 = vector.multi_reduction <add>, %76, %cst_48 [2] : vector<2x8x8xf32> to vector<2x8xf32>
    %78 = vector.shape_cast %77 : vector<2x8xf32> to vector<2x8x1xf32>
    %79 = tpu.reciprocal %78 {approx = true} : vector<2x8x1xf32> -> vector<2x8x1xf32>
    %80 = vector.broadcast %79 : vector<2x8x1xf32> to vector<2x8x8xf32>
    %81 = arith.mulf %76, %80 : vector<2x8x8xf32>
    "tpu.trace_start"() <{level = 10 : i32, message = "bqk,bkd->bqd"}> : () -> ()
    %cst_49 = arith.constant dense<0.000000e+00> : vector<2x8x8xf32>
    %82 = tpu.matmul %81, %68, %cst_49 {dimension_numbers = #tpu.dot_dimension_numbers<[2], [1], [1], [2], [0, 0, 0, 1, 1, 2], [0], [0]>} : vector<2x8x8xf32>, vector<2x8x8xf32>, vector<2x8x8xf32> -> vector<2x8x8xf32>
    "tpu.trace_stop"() : () -> ()
    %83 = vector.shape_cast %82 : vector<2x8x8xf32> to vector<16x8xf32>
    %c0_50 = arith.constant 0 : index
    %c0_51 = arith.constant 0 : index
    %c0_52 = arith.constant 0 : index
    %c0_53 = arith.constant 0 : index
    %84 = vector.load %arg5[%c0_50, %c0_51, %c0_52, %c0_53] : memref<2x4x8x32xf32, #tpu.memory_space<vmem>>, vector<1x1x8x32xf32>
    %85 = vector.shape_cast %84 : vector<1x1x8x32xf32> to vector<8x32xf32>
    %cst_54 = arith.constant dense<0.000000e+00> : vector<16x32xf32>
    %86 = tpu.matmul %83, %85, %cst_54 {dimension_numbers = #tpu.dot_dimension_numbers<[1], [0], [0], [1], [0, 0, 1, 1], [], []>} : vector<16x8xf32>, vector<8x32xf32>, vector<16x32xf32> -> vector<16x32xf32>
    %c0_55 = arith.constant 0 : index
    %c0_56 = arith.constant 0 : index
    %c1_57 = arith.constant 1 : index
    %c0_58 = arith.constant 0 : index
    %c0_59 = arith.constant 0 : index
    %87 = vector.load %arg3[%c0_55, %c0_56, %c1_57, %c0_58, %c0_59] : memref<2x3x4x32x8xf32, #tpu.memory_space<vmem>>, vector<1x1x1x32x8xf32>
    %88 = vector.shape_cast %87 : vector<1x1x1x32x8xf32> to vector<32x8xf32>
    %cst_60 = arith.constant dense<0.000000e+00> : vector<16x8xf32>
    %89 = tpu.matmul %44, %88, %cst_60 {dimension_numbers = #tpu.dot_dimension_numbers<[1], [0], [0], [1], [0, 0, 1, 1], [], []>} : vector<16x32xf32>, vector<32x8xf32>, vector<16x8xf32> -> vector<16x8xf32>
    %c0_61 = arith.constant 0 : index
    %c0_62 = arith.constant 0 : index
    %c1_63 = arith.constant 1 : index
    %c0_64 = arith.constant 0 : index
    %c0_65 = arith.constant 0 : index
    %90 = vector.load %arg4[%c0_61, %c0_62, %c1_63, %c0_64, %c0_65] : memref<2x3x4x1x8xf32, #tpu.memory_space<vmem>>, vector<1x1x1x1x8xf32>
    %91 = vector.shape_cast %90 : vector<1x1x1x1x8xf32> to vector<1x8xf32>
    %92 = vector.broadcast %91 : vector<1x8xf32> to vector<16x8xf32>
    %93 = arith.addf %89, %92 : vector<16x8xf32>
    %c0_66 = arith.constant 0 : index
    %c1_67 = arith.constant 1 : index
    %c1_68 = arith.constant 1 : index
    %c0_69 = arith.constant 0 : index
    %c0_70 = arith.constant 0 : index
    %94 = vector.load %arg3[%c0_66, %c1_67, %c1_68, %c0_69, %c0_70] : memref<2x3x4x32x8xf32, #tpu.memory_space<vmem>>, vector<1x1x1x32x8xf32>
    %95 = vector.shape_cast %94 : vector<1x1x1x32x8xf32> to vector<32x8xf32>
    %cst_71 = arith.constant dense<0.000000e+00> : vector<16x8xf32>
    %96 = tpu.matmul %44, %95, %cst_71 {dimension_numbers = #tpu.dot_dimension_numbers<[1], [0], [0], [1], [0, 0, 1, 1], [], []>} : vector<16x32xf32>, vector<32x8xf32>, vector<16x8xf32> -> vector<16x8xf32>
    %c0_72 = arith.constant 0 : index
    %c1_73 = arith.constant 1 : index
    %c1_74 = arith.constant 1 : index
    %c0_75 = arith.constant 0 : index
    %c0_76 = arith.constant 0 : index
    %97 = vector.load %arg4[%c0_72, %c1_73, %c1_74, %c0_75, %c0_76] : memref<2x3x4x1x8xf32, #tpu.memory_space<vmem>>, vector<1x1x1x1x8xf32>
    %98 = vector.shape_cast %97 : vector<1x1x1x1x8xf32> to vector<1x8xf32>
    %99 = vector.broadcast %98 : vector<1x8xf32> to vector<16x8xf32>
    %100 = arith.addf %96, %99 : vector<16x8xf32>
    %c0_77 = arith.constant 0 : index
    %c2_78 = arith.constant 2 : index
    %c1_79 = arith.constant 1 : index
    %c0_80 = arith.constant 0 : index
    %c0_81 = arith.constant 0 : index
    %101 = vector.load %arg3[%c0_77, %c2_78, %c1_79, %c0_80, %c0_81] : memref<2x3x4x32x8xf32, #tpu.memory_space<vmem>>, vector<1x1x1x32x8xf32>
    %102 = vector.shape_cast %101 : vector<1x1x1x32x8xf32> to vector<32x8xf32>
    %cst_82 = arith.constant dense<0.000000e+00> : vector<16x8xf32>
    %103 = tpu.matmul %44, %102, %cst_82 {dimension_numbers = #tpu.dot_dimension_numbers<[1], [0], [0], [1], [0, 0, 1, 1], [], []>} : vector<16x32xf32>, vector<32x8xf32>, vector<16x8xf32> -> vector<16x8xf32>
    %c0_83 = arith.constant 0 : index
    %c2_84 = arith.constant 2 : index
    %c1_85 = arith.constant 1 : index
    %c0_86 = arith.constant 0 : index
    %c0_87 = arith.constant 0 : index
    %104 = vector.load %arg4[%c0_83, %c2_84, %c1_85, %c0_86, %c0_87] : memref<2x3x4x1x8xf32, #tpu.memory_space<vmem>>, vector<1x1x1x1x8xf32>
    %105 = vector.shape_cast %104 : vector<1x1x1x1x8xf32> to vector<1x8xf32>
    %106 = vector.broadcast %105 : vector<1x8xf32> to vector<16x8xf32>
    %107 = arith.addf %103, %106 : vector<16x8xf32>
    %108 = vector.shape_cast %93 : vector<16x8xf32> to vector<2x8x8xf32>
    %109 = vector.shape_cast %100 : vector<16x8xf32> to vector<2x8x8xf32>
    %110 = vector.shape_cast %107 : vector<16x8xf32> to vector<2x8x8xf32>
    "tpu.trace_start"() <{level = 10 : i32, message = "bqd,bkd->bqk"}> : () -> ()
    %cst_88 = arith.constant dense<0.000000e+00> : vector<2x8x8xf32>
    %111 = tpu.matmul %108, %109, %cst_88 {dimension_numbers = #tpu.dot_dimension_numbers<[2], [2], [1], [1], [0, 0, 0, 1, 1, 1], [0], [0]>} : vector<2x8x8xf32>, vector<2x8x8xf32>, vector<2x8x8xf32> -> vector<2x8x8xf32>
    "tpu.trace_stop"() : () -> ()
    %112 = vector.broadcast %16 : vector<1x8x8xf32> to vector<2x8x8xf32>
    %113 = arith.addf %111, %112 : vector<2x8x8xf32>
    %cst_89 = arith.constant dense<0xFF800000> : vector<2x8xf32>
    %114 = vector.multi_reduction <maximumf>, %113, %cst_89 [2] : vector<2x8x8xf32> to vector<2x8xf32>
    %115 = vector.shape_cast %114 : vector<2x8xf32> to vector<2x8x1xf32>
    %116 = vector.broadcast %115 : vector<2x8x1xf32> to vector<2x8x8xf32>
    %117 = arith.subf %113, %116 : vector<2x8x8xf32>
    %118 = math.exp %117 : vector<2x8x8xf32>
    %cst_90 = arith.constant dense<0.000000e+00> : vector<2x8xf32>
    %119 = vector.multi_reduction <add>, %118, %cst_90 [2] : vector<2x8x8xf32> to vector<2x8xf32>
    %120 = vector.shape_cast %119 : vector<2x8xf32> to vector<2x8x1xf32>
    %121 = tpu.reciprocal %120 {approx = true} : vector<2x8x1xf32> -> vector<2x8x1xf32>
    %122 = vector.broadcast %121 : vector<2x8x1xf32> to vector<2x8x8xf32>
    %123 = arith.mulf %118, %122 : vector<2x8x8xf32>
    "tpu.trace_start"() <{level = 10 : i32, message = "bqk,bkd->bqd"}> : () -> ()
    %cst_91 = arith.constant dense<0.000000e+00> : vector<2x8x8xf32>
    %124 = tpu.matmul %123, %110, %cst_91 {dimension_numbers = #tpu.dot_dimension_numbers<[2], [1], [1], [2], [0, 0, 0, 1, 1, 2], [0], [0]>} : vector<2x8x8xf32>, vector<2x8x8xf32>, vector<2x8x8xf32> -> vector<2x8x8xf32>
    "tpu.trace_stop"() : () -> ()
    %125 = vector.shape_cast %124 : vector<2x8x8xf32> to vector<16x8xf32>
    %c0_92 = arith.constant 0 : index
    %c1_93 = arith.constant 1 : index
    %c0_94 = arith.constant 0 : index
    %c0_95 = arith.constant 0 : index
    %126 = vector.load %arg5[%c0_92, %c1_93, %c0_94, %c0_95] : memref<2x4x8x32xf32, #tpu.memory_space<vmem>>, vector<1x1x8x32xf32>
    %127 = vector.shape_cast %126 : vector<1x1x8x32xf32> to vector<8x32xf32>
    %cst_96 = arith.constant dense<0.000000e+00> : vector<16x32xf32>
    %128 = tpu.matmul %125, %127, %cst_96 {dimension_numbers = #tpu.dot_dimension_numbers<[1], [0], [0], [1], [0, 0, 1, 1], [], []>} : vector<16x8xf32>, vector<8x32xf32>, vector<16x32xf32> -> vector<16x32xf32>
    %129 = arith.addf %86, %128 : vector<16x32xf32>
    %c0_97 = arith.constant 0 : index
    %c0_98 = arith.constant 0 : index
    %c2_99 = arith.constant 2 : index
    %c0_100 = arith.constant 0 : index
    %c0_101 = arith.constant 0 : index
    %130 = vector.load %arg3[%c0_97, %c0_98, %c2_99, %c0_100, %c0_101] : memref<2x3x4x32x8xf32, #tpu.memory_space<vmem>>, vector<1x1x1x32x8xf32>
    %131 = vector.shape_cast %130 : vector<1x1x1x32x8xf32> to vector<32x8xf32>
    %cst_102 = arith.constant dense<0.000000e+00> : vector<16x8xf32>
    %132 = tpu.matmul %44, %131, %cst_102 {dimension_numbers = #tpu.dot_dimension_numbers<[1], [0], [0], [1], [0, 0, 1, 1], [], []>} : vector<16x32xf32>, vector<32x8xf32>, vector<16x8xf32> -> vector<16x8xf32>
    %c0_103 = arith.constant 0 : index
    %c0_104 = arith.constant 0 : index
    %c2_105 = arith.constant 2 : index
    %c0_106 = arith.constant 0 : index
    %c0_107 = arith.constant 0 : index
    %133 = vector.load %arg4[%c0_103, %c0_104, %c2_105, %c0_106, %c0_107] : memref<2x3x4x1x8xf32, #tpu.memory_space<vmem>>, vector<1x1x1x1x8xf32>
    %134 = vector.shape_cast %133 : vector<1x1x1x1x8xf32> to vector<1x8xf32>
    %135 = vector.broadcast %134 : vector<1x8xf32> to vector<16x8xf32>
    %136 = arith.addf %132, %135 : vector<16x8xf32>
    %c0_108 = arith.constant 0 : index
    %c1_109 = arith.constant 1 : index
    %c2_110 = arith.constant 2 : index
    %c0_111 = arith.constant 0 : index
    %c0_112 = arith.constant 0 : index
    %137 = vector.load %arg3[%c0_108, %c1_109, %c2_110, %c0_111, %c0_112] : memref<2x3x4x32x8xf32, #tpu.memory_space<vmem>>, vector<1x1x1x32x8xf32>
    %138 = vector.shape_cast %137 : vector<1x1x1x32x8xf32> to vector<32x8xf32>
    %cst_113 = arith.constant dense<0.000000e+00> : vector<16x8xf32>
    %139 = tpu.matmul %44, %138, %cst_113 {dimension_numbers = #tpu.dot_dimension_numbers<[1], [0], [0], [1], [0, 0, 1, 1], [], []>} : vector<16x32xf32>, vector<32x8xf32>, vector<16x8xf32> -> vector<16x8xf32>
    %c0_114 = arith.constant 0 : index
    %c1_115 = arith.constant 1 : index
    %c2_116 = arith.constant 2 : index
    %c0_117 = arith.constant 0 : index
    %c0_118 = arith.constant 0 : index
    %140 = vector.load %arg4[%c0_114, %c1_115, %c2_116, %c0_117, %c0_118] : memref<2x3x4x1x8xf32, #tpu.memory_space<vmem>>, vector<1x1x1x1x8xf32>
    %141 = vector.shape_cast %140 : vector<1x1x1x1x8xf32> to vector<1x8xf32>
    %142 = vector.broadcast %141 : vector<1x8xf32> to vector<16x8xf32>
    %143 = arith.addf %139, %142 : vector<16x8xf32>
    %c0_119 = arith.constant 0 : index
    %c2_120 = arith.constant 2 : index
    %c2_121 = arith.constant 2 : index
    %c0_122 = arith.constant 0 : index
    %c0_123 = arith.constant 0 : index
    %144 = vector.load %arg3[%c0_119, %c2_120, %c2_121, %c0_122, %c0_123] : memref<2x3x4x32x8xf32, #tpu.memory_space<vmem>>, vector<1x1x1x32x8xf32>
    %145 = vector.shape_cast %144 : vector<1x1x1x32x8xf32> to vector<32x8xf32>
    %cst_124 = arith.constant dense<0.000000e+00> : vector<16x8xf32>
    %146 = tpu.matmul %44, %145, %cst_124 {dimension_numbers = #tpu.dot_dimension_numbers<[1], [0], [0], [1], [0, 0, 1, 1], [], []>} : vector<16x32xf32>, vector<32x8xf32>, vector<16x8xf32> -> vector<16x8xf32>
    %c0_125 = arith.constant 0 : index
    %c2_126 = arith.constant 2 : index
    %c2_127 = arith.constant 2 : index
    %c0_128 = arith.constant 0 : index
    %c0_129 = arith.constant 0 : index
    %147 = vector.load %arg4[%c0_125, %c2_126, %c2_127, %c0_128, %c0_129] : memref<2x3x4x1x8xf32, #tpu.memory_space<vmem>>, vector<1x1x1x1x8xf32>
    %148 = vector.shape_cast %147 : vector<1x1x1x1x8xf32> to vector<1x8xf32>
    %149 = vector.broadcast %148 : vector<1x8xf32> to vector<16x8xf32>
    %150 = arith.addf %146, %149 : vector<16x8xf32>
    %151 = vector.shape_cast %136 : vector<16x8xf32> to vector<2x8x8xf32>
    %152 = vector.shape_cast %143 : vector<16x8xf32> to vector<2x8x8xf32>
    %153 = vector.shape_cast %150 : vector<16x8xf32> to vector<2x8x8xf32>
    "tpu.trace_start"() <{level = 10 : i32, message = "bqd,bkd->bqk"}> : () -> ()
    %cst_130 = arith.constant dense<0.000000e+00> : vector<2x8x8xf32>
    %154 = tpu.matmul %151, %152, %cst_130 {dimension_numbers = #tpu.dot_dimension_numbers<[2], [2], [1], [1], [0, 0, 0, 1, 1, 1], [0], [0]>} : vector<2x8x8xf32>, vector<2x8x8xf32>, vector<2x8x8xf32> -> vector<2x8x8xf32>
    "tpu.trace_stop"() : () -> ()
    %155 = vector.broadcast %16 : vector<1x8x8xf32> to vector<2x8x8xf32>
    %156 = arith.addf %154, %155 : vector<2x8x8xf32>
    %cst_131 = arith.constant dense<0xFF800000> : vector<2x8xf32>
    %157 = vector.multi_reduction <maximumf>, %156, %cst_131 [2] : vector<2x8x8xf32> to vector<2x8xf32>
    %158 = vector.shape_cast %157 : vector<2x8xf32> to vector<2x8x1xf32>
    %159 = vector.broadcast %158 : vector<2x8x1xf32> to vector<2x8x8xf32>
    %160 = arith.subf %156, %159 : vector<2x8x8xf32>
    %161 = math.exp %160 : vector<2x8x8xf32>
    %cst_132 = arith.constant dense<0.000000e+00> : vector<2x8xf32>
    %162 = vector.multi_reduction <add>, %161, %cst_132 [2] : vector<2x8x8xf32> to vector<2x8xf32>
    %163 = vector.shape_cast %162 : vector<2x8xf32> to vector<2x8x1xf32>
    %164 = tpu.reciprocal %163 {approx = true} : vector<2x8x1xf32> -> vector<2x8x1xf32>
    %165 = vector.broadcast %164 : vector<2x8x1xf32> to vector<2x8x8xf32>
    %166 = arith.mulf %161, %165 : vector<2x8x8xf32>
    "tpu.trace_start"() <{level = 10 : i32, message = "bqk,bkd->bqd"}> : () -> ()
    %cst_133 = arith.constant dense<0.000000e+00> : vector<2x8x8xf32>
    %167 = tpu.matmul %166, %153, %cst_133 {dimension_numbers = #tpu.dot_dimension_numbers<[2], [1], [1], [2], [0, 0, 0, 1, 1, 2], [0], [0]>} : vector<2x8x8xf32>, vector<2x8x8xf32>, vector<2x8x8xf32> -> vector<2x8x8xf32>
    "tpu.trace_stop"() : () -> ()
    %168 = vector.shape_cast %167 : vector<2x8x8xf32> to vector<16x8xf32>
    %c0_134 = arith.constant 0 : index
    %c2_135 = arith.constant 2 : index
    %c0_136 = arith.constant 0 : index
    %c0_137 = arith.constant 0 : index
    %169 = vector.load %arg5[%c0_134, %c2_135, %c0_136, %c0_137] : memref<2x4x8x32xf32, #tpu.memory_space<vmem>>, vector<1x1x8x32xf32>
    %170 = vector.shape_cast %169 : vector<1x1x8x32xf32> to vector<8x32xf32>
    %cst_138 = arith.constant dense<0.000000e+00> : vector<16x32xf32>
    %171 = tpu.matmul %168, %170, %cst_138 {dimension_numbers = #tpu.dot_dimension_numbers<[1], [0], [0], [1], [0, 0, 1, 1], [], []>} : vector<16x8xf32>, vector<8x32xf32>, vector<16x32xf32> -> vector<16x32xf32>
    %172 = arith.addf %129, %171 : vector<16x32xf32>
    %c0_139 = arith.constant 0 : index
    %c0_140 = arith.constant 0 : index
    %c3 = arith.constant 3 : index
    %c0_141 = arith.constant 0 : index
    %c0_142 = arith.constant 0 : index
    %173 = vector.load %arg3[%c0_139, %c0_140, %c3, %c0_141, %c0_142] : memref<2x3x4x32x8xf32, #tpu.memory_space<vmem>>, vector<1x1x1x32x8xf32>
    %174 = vector.shape_cast %173 : vector<1x1x1x32x8xf32> to vector<32x8xf32>
    %cst_143 = arith.constant dense<0.000000e+00> : vector<16x8xf32>
    %175 = tpu.matmul %44, %174, %cst_143 {dimension_numbers = #tpu.dot_dimension_numbers<[1], [0], [0], [1], [0, 0, 1, 1], [], []>} : vector<16x32xf32>, vector<32x8xf32>, vector<16x8xf32> -> vector<16x8xf32>
    %c0_144 = arith.constant 0 : index
    %c0_145 = arith.constant 0 : index
    %c3_146 = arith.constant 3 : index
    %c0_147 = arith.constant 0 : index
    %c0_148 = arith.constant 0 : index
    %176 = vector.load %arg4[%c0_144, %c0_145, %c3_146, %c0_147, %c0_148] : memref<2x3x4x1x8xf32, #tpu.memory_space<vmem>>, vector<1x1x1x1x8xf32>
    %177 = vector.shape_cast %176 : vector<1x1x1x1x8xf32> to vector<1x8xf32>
    %178 = vector.broadcast %177 : vector<1x8xf32> to vector<16x8xf32>
    %179 = arith.addf %175, %178 : vector<16x8xf32>
    %c0_149 = arith.constant 0 : index
    %c1_150 = arith.constant 1 : index
    %c3_151 = arith.constant 3 : index
    %c0_152 = arith.constant 0 : index
    %c0_153 = arith.constant 0 : index
    %180 = vector.load %arg3[%c0_149, %c1_150, %c3_151, %c0_152, %c0_153] : memref<2x3x4x32x8xf32, #tpu.memory_space<vmem>>, vector<1x1x1x32x8xf32>
    %181 = vector.shape_cast %180 : vector<1x1x1x32x8xf32> to vector<32x8xf32>
    %cst_154 = arith.constant dense<0.000000e+00> : vector<16x8xf32>
    %182 = tpu.matmul %44, %181, %cst_154 {dimension_numbers = #tpu.dot_dimension_numbers<[1], [0], [0], [1], [0, 0, 1, 1], [], []>} : vector<16x32xf32>, vector<32x8xf32>, vector<16x8xf32> -> vector<16x8xf32>
    %c0_155 = arith.constant 0 : index
    %c1_156 = arith.constant 1 : index
    %c3_157 = arith.constant 3 : index
    %c0_158 = arith.constant 0 : index
    %c0_159 = arith.constant 0 : index
    %183 = vector.load %arg4[%c0_155, %c1_156, %c3_157, %c0_158, %c0_159] : memref<2x3x4x1x8xf32, #tpu.memory_space<vmem>>, vector<1x1x1x1x8xf32>
    %184 = vector.shape_cast %183 : vector<1x1x1x1x8xf32> to vector<1x8xf32>
    %185 = vector.broadcast %184 : vector<1x8xf32> to vector<16x8xf32>
    %186 = arith.addf %182, %185 : vector<16x8xf32>
    %c0_160 = arith.constant 0 : index
    %c2_161 = arith.constant 2 : index
    %c3_162 = arith.constant 3 : index
    %c0_163 = arith.constant 0 : index
    %c0_164 = arith.constant 0 : index
    %187 = vector.load %arg3[%c0_160, %c2_161, %c3_162, %c0_163, %c0_164] : memref<2x3x4x32x8xf32, #tpu.memory_space<vmem>>, vector<1x1x1x32x8xf32>
    %188 = vector.shape_cast %187 : vector<1x1x1x32x8xf32> to vector<32x8xf32>
    %cst_165 = arith.constant dense<0.000000e+00> : vector<16x8xf32>
    %189 = tpu.matmul %44, %188, %cst_165 {dimension_numbers = #tpu.dot_dimension_numbers<[1], [0], [0], [1], [0, 0, 1, 1], [], []>} : vector<16x32xf32>, vector<32x8xf32>, vector<16x8xf32> -> vector<16x8xf32>
    %c0_166 = arith.constant 0 : index
    %c2_167 = arith.constant 2 : index
    %c3_168 = arith.constant 3 : index
    %c0_169 = arith.constant 0 : index
    %c0_170 = arith.constant 0 : index
    %190 = vector.load %arg4[%c0_166, %c2_167, %c3_168, %c0_169, %c0_170] : memref<2x3x4x1x8xf32, #tpu.memory_space<vmem>>, vector<1x1x1x1x8xf32>
    %191 = vector.shape_cast %190 : vector<1x1x1x1x8xf32> to vector<1x8xf32>
    %192 = vector.broadcast %191 : vector<1x8xf32> to vector<16x8xf32>
    %193 = arith.addf %189, %192 : vector<16x8xf32>
    %194 = vector.shape_cast %179 : vector<16x8xf32> to vector<2x8x8xf32>
    %195 = vector.shape_cast %186 : vector<16x8xf32> to vector<2x8x8xf32>
    %196 = vector.shape_cast %193 : vector<16x8xf32> to vector<2x8x8xf32>
    "tpu.trace_start"() <{level = 10 : i32, message = "bqd,bkd->bqk"}> : () -> ()
    %cst_171 = arith.constant dense<0.000000e+00> : vector<2x8x8xf32>
    %197 = tpu.matmul %194, %195, %cst_171 {dimension_numbers = #tpu.dot_dimension_numbers<[2], [2], [1], [1], [0, 0, 0, 1, 1, 1], [0], [0]>} : vector<2x8x8xf32>, vector<2x8x8xf32>, vector<2x8x8xf32> -> vector<2x8x8xf32>
    "tpu.trace_stop"() : () -> ()
    %198 = vector.broadcast %16 : vector<1x8x8xf32> to vector<2x8x8xf32>
    %199 = arith.addf %197, %198 : vector<2x8x8xf32>
    %cst_172 = arith.constant dense<0xFF800000> : vector<2x8xf32>
    %200 = vector.multi_reduction <maximumf>, %199, %cst_172 [2] : vector<2x8x8xf32> to vector<2x8xf32>
    %201 = vector.shape_cast %200 : vector<2x8xf32> to vector<2x8x1xf32>
    %202 = vector.broadcast %201 : vector<2x8x1xf32> to vector<2x8x8xf32>
    %203 = arith.subf %199, %202 : vector<2x8x8xf32>
    %204 = math.exp %203 : vector<2x8x8xf32>
    %cst_173 = arith.constant dense<0.000000e+00> : vector<2x8xf32>
    %205 = vector.multi_reduction <add>, %204, %cst_173 [2] : vector<2x8x8xf32> to vector<2x8xf32>
    %206 = vector.shape_cast %205 : vector<2x8xf32> to vector<2x8x1xf32>
    %207 = tpu.reciprocal %206 {approx = true} : vector<2x8x1xf32> -> vector<2x8x1xf32>
    %208 = vector.broadcast %207 : vector<2x8x1xf32> to vector<2x8x8xf32>
    %209 = arith.mulf %204, %208 : vector<2x8x8xf32>
    "tpu.trace_start"() <{level = 10 : i32, message = "bqk,bkd->bqd"}> : () -> ()
    %cst_174 = arith.constant dense<0.000000e+00> : vector<2x8x8xf32>
    %210 = tpu.matmul %209, %196, %cst_174 {dimension_numbers = #tpu.dot_dimension_numbers<[2], [1], [1], [2], [0, 0, 0, 1, 1, 2], [0], [0]>} : vector<2x8x8xf32>, vector<2x8x8xf32>, vector<2x8x8xf32> -> vector<2x8x8xf32>
    "tpu.trace_stop"() : () -> ()
    %211 = vector.shape_cast %210 : vector<2x8x8xf32> to vector<16x8xf32>
    %c0_175 = arith.constant 0 : index
    %c3_176 = arith.constant 3 : index
    %c0_177 = arith.constant 0 : index
    %c0_178 = arith.constant 0 : index
    %212 = vector.load %arg5[%c0_175, %c3_176, %c0_177, %c0_178] : memref<2x4x8x32xf32, #tpu.memory_space<vmem>>, vector<1x1x8x32xf32>
    %213 = vector.shape_cast %212 : vector<1x1x8x32xf32> to vector<8x32xf32>
    %cst_179 = arith.constant dense<0.000000e+00> : vector<16x32xf32>
    %214 = tpu.matmul %211, %213, %cst_179 {dimension_numbers = #tpu.dot_dimension_numbers<[1], [0], [0], [1], [0, 0, 1, 1], [], []>} : vector<16x8xf32>, vector<8x32xf32>, vector<16x32xf32> -> vector<16x32xf32>
    %215 = arith.addf %172, %214 : vector<16x32xf32>
    %216 = arith.addf %9, %215 : vector<16x32xf32>
    %217 = vector.broadcast %21 : vector<1x32xf32> to vector<16x32xf32>
    %218 = arith.addf %216, %217 : vector<16x32xf32>
    %cst_180 = arith.constant dense<0.000000e+00> : vector<16xf32>
    %219 = vector.multi_reduction <add>, %218, %cst_180 [1] : vector<16x32xf32> to vector<16xf32>
    %220 = vector.shape_cast %219 : vector<16xf32> to vector<16x1xf32>
    %cst_181 = arith.constant 3.200000e+01 : f32
    %221 = vector.broadcast %cst_181 : f32 to vector<16x1xf32>
    %222 = arith.divf %220, %221 : vector<16x1xf32>
    %223 = vector.broadcast %222 : vector<16x1xf32> to vector<16x32xf32>
    %224 = arith.subf %218, %223 : vector<16x32xf32>
    %225 = arith.mulf %224, %224 : vector<16x32xf32>
    %cst_182 = arith.constant dense<0.000000e+00> : vector<16xf32>
    %226 = vector.multi_reduction <add>, %225, %cst_182 [1] : vector<16x32xf32> to vector<16xf32>
    %227 = vector.shape_cast %226 : vector<16xf32> to vector<16x1xf32>
    %cst_183 = arith.constant 3.200000e+01 : f32
    %228 = vector.broadcast %cst_183 : f32 to vector<16x1xf32>
    %229 = arith.divf %227, %228 : vector<16x1xf32>
    %cst_184 = arith.constant 9.99999974E-6 : f32
    %230 = vector.broadcast %cst_184 : f32 to vector<16x1xf32>
    %231 = arith.addf %229, %230 : vector<16x1xf32>
    %232 = math.rsqrt %231 : vector<16x1xf32>
    %233 = vector.broadcast %232 : vector<16x1xf32> to vector<16x32xf32>
    %234 = arith.mulf %224, %233 : vector<16x32xf32>
    %235 = vector.broadcast %22 : vector<1x32xf32> to vector<16x32xf32>
    %236 = arith.mulf %234, %235 : vector<16x32xf32>
    %237 = vector.broadcast %23 : vector<1x32xf32> to vector<16x32xf32>
    %238 = arith.addf %236, %237 : vector<16x32xf32>
    %c0_185 = arith.constant 0 : index
    %c0_186 = arith.constant 0 : index
    %c0_187 = arith.constant 0 : index
    %239 = vector.load %arg6[%c0_185, %c0_186, %c0_187] : memref<2x32x128xf32, #tpu.memory_space<vmem>>, vector<1x32x128xf32>
    %240 = vector.shape_cast %239 : vector<1x32x128xf32> to vector<32x128xf32>
    %cst_188 = arith.constant dense<0.000000e+00> : vector<16x128xf32>
    %241 = tpu.matmul %238, %240, %cst_188 {dimension_numbers = #tpu.dot_dimension_numbers<[1], [0], [0], [1], [0, 0, 1, 1], [], []>} : vector<16x32xf32>, vector<32x128xf32>, vector<16x128xf32> -> vector<16x128xf32>
    %c0_189 = arith.constant 0 : index
    %c0_190 = arith.constant 0 : index
    %c0_191 = arith.constant 0 : index
    %242 = vector.load %arg7[%c0_189, %c0_190, %c0_191] : memref<2x1x128xf32, #tpu.memory_space<vmem>>, vector<1x1x128xf32>
    %243 = vector.shape_cast %242 : vector<1x1x128xf32> to vector<1x128xf32>
    %244 = vector.broadcast %243 : vector<1x128xf32> to vector<16x128xf32>
    %245 = arith.addf %241, %244 : vector<16x128xf32>
    %cst_192 = arith.constant 5.000000e-01 : f32
    %246 = vector.broadcast %cst_192 : f32 to vector<16x128xf32>
    %247 = arith.mulf %246, %245 : vector<16x128xf32>
    %cst_193 = arith.constant 4.471500e-02 : f32
    %248 = vector.broadcast %cst_193 : f32 to vector<16x128xf32>
    %249 = arith.mulf %248, %245 : vector<16x128xf32>
    %250 = arith.mulf %249, %245 : vector<16x128xf32>
    %251 = arith.mulf %250, %245 : vector<16x128xf32>
    %252 = arith.addf %245, %251 : vector<16x128xf32>
    %cst_194 = arith.constant 0.797884583 : f32
    %253 = vector.broadcast %cst_194 : f32 to vector<16x128xf32>
    %254 = arith.mulf %253, %252 : vector<16x128xf32>
    %255 = math.tanh %254 : vector<16x128xf32>
    %cst_195 = arith.constant 1.000000e+00 : f32
    %256 = vector.broadcast %cst_195 : f32 to vector<16x128xf32>
    %257 = arith.addf %256, %255 : vector<16x128xf32>
    %258 = arith.mulf %247, %257 : vector<16x128xf32>
    %c0_196 = arith.constant 0 : index
    %c0_197 = arith.constant 0 : index
    %c0_198 = arith.constant 0 : index
    %259 = vector.load %arg8[%c0_196, %c0_197, %c0_198] : memref<2x128x32xf32, #tpu.memory_space<vmem>>, vector<1x128x32xf32>
    %260 = vector.shape_cast %259 : vector<1x128x32xf32> to vector<128x32xf32>
    %cst_199 = arith.constant dense<0.000000e+00> : vector<16x32xf32>
    %261 = tpu.matmul %258, %260, %cst_199 {dimension_numbers = #tpu.dot_dimension_numbers<[1], [0], [0], [1], [0, 0, 1, 1], [], []>} : vector<16x128xf32>, vector<128x32xf32>, vector<16x32xf32> -> vector<16x32xf32>
    %262 = vector.broadcast %24 : vector<1x32xf32> to vector<16x32xf32>
    %263 = arith.addf %261, %262 : vector<16x32xf32>
    %264 = arith.addf %218, %263 : vector<16x32xf32>
    %265 = vector.shape_cast %264 : vector<16x32xf32> to vector<2x8x32xf32>
    %c0_200 = arith.constant 0 : index
    %c0_201 = arith.constant 0 : index
    %c0_202 = arith.constant 0 : index
    %266 = vector.load %arg15[%c0_200, %c0_201, %c0_202] : memref<2x8x32xf32, #tpu.memory_space<vmem>>, vector<2x8x32xf32>
    tpu.vector_store %arg15[%c0_200, %c0_201, %c0_202], %265 {strides = array<i32>} : memref<2x8x32xf32, #tpu.memory_space<vmem>>, vector<2x8x32xf32>,
    %c1_203 = arith.constant 1 : index
    %c0_204 = arith.constant 0 : index
    %c0_205 = arith.constant 0 : index
    %267 = vector.load %arg9[%c1_203, %c0_204, %c0_205] : memref<2x6x32xf32, #tpu.memory_space<vmem>>, vector<1x6x32xf32>
    %268 = vector.shape_cast %267 : vector<1x6x32xf32> to vector<6x32xf32>
    %269 = vector.extract_strided_slice %268 {offsets = [0, 0], sizes = [1, 32], strides = [1, 1]} : vector<6x32xf32> to vector<1x32xf32>
    %270 = vector.extract_strided_slice %268 {offsets = [1, 0], sizes = [1, 32], strides = [1, 1]} : vector<6x32xf32> to vector<1x32xf32>
    %271 = vector.extract_strided_slice %268 {offsets = [2, 0], sizes = [1, 32], strides = [1, 1]} : vector<6x32xf32> to vector<1x32xf32>
    %272 = vector.extract_strided_slice %268 {offsets = [3, 0], sizes = [1, 32], strides = [1, 1]} : vector<6x32xf32> to vector<1x32xf32>
    %273 = vector.extract_strided_slice %268 {offsets = [4, 0], sizes = [1, 32], strides = [1, 1]} : vector<6x32xf32> to vector<1x32xf32>
    %274 = vector.extract_strided_slice %268 {offsets = [5, 0], sizes = [1, 32], strides = [1, 1]} : vector<6x32xf32> to vector<1x32xf32>
    %cst_206 = arith.constant dense<0.000000e+00> : vector<16xf32>
    %275 = vector.multi_reduction <add>, %264, %cst_206 [1] : vector<16x32xf32> to vector<16xf32>
    %276 = vector.shape_cast %275 : vector<16xf32> to vector<16x1xf32>
    %cst_207 = arith.constant 3.200000e+01 : f32
    %277 = vector.broadcast %cst_207 : f32 to vector<16x1xf32>
    %278 = arith.divf %276, %277 : vector<16x1xf32>
    %279 = vector.broadcast %278 : vector<16x1xf32> to vector<16x32xf32>
    %280 = arith.subf %264, %279 : vector<16x32xf32>
    %281 = arith.mulf %280, %280 : vector<16x32xf32>
    %cst_208 = arith.constant dense<0.000000e+00> : vector<16xf32>
    %282 = vector.multi_reduction <add>, %281, %cst_208 [1] : vector<16x32xf32> to vector<16xf32>
    %283 = vector.shape_cast %282 : vector<16xf32> to vector<16x1xf32>
    %cst_209 = arith.constant 3.200000e+01 : f32
    %284 = vector.broadcast %cst_209 : f32 to vector<16x1xf32>
    %285 = arith.divf %283, %284 : vector<16x1xf32>
    %cst_210 = arith.constant 9.99999974E-6 : f32
    %286 = vector.broadcast %cst_210 : f32 to vector<16x1xf32>
    %287 = arith.addf %285, %286 : vector<16x1xf32>
    %288 = math.rsqrt %287 : vector<16x1xf32>
    %289 = vector.broadcast %288 : vector<16x1xf32> to vector<16x32xf32>
    %290 = arith.mulf %280, %289 : vector<16x32xf32>
    %291 = vector.broadcast %269 : vector<1x32xf32> to vector<16x32xf32>
    %292 = arith.mulf %290, %291 : vector<16x32xf32>
    %293 = vector.broadcast %270 : vector<1x32xf32> to vector<16x32xf32>
    %294 = arith.addf %292, %293 : vector<16x32xf32>
    %c1_211 = arith.constant 1 : index
    %c0_212 = arith.constant 0 : index
    %c0_213 = arith.constant 0 : index
    %c0_214 = arith.constant 0 : index
    %c0_215 = arith.constant 0 : index
    %295 = vector.load %arg3[%c1_211, %c0_212, %c0_213, %c0_214, %c0_215] : memref<2x3x4x32x8xf32, #tpu.memory_space<vmem>>, vector<1x1x1x32x8xf32>
    %296 = vector.shape_cast %295 : vector<1x1x1x32x8xf32> to vector<32x8xf32>
    %cst_216 = arith.constant dense<0.000000e+00> : vector<16x8xf32>
    %297 = tpu.matmul %294, %296, %cst_216 {dimension_numbers = #tpu.dot_dimension_numbers<[1], [0], [0], [1], [0, 0, 1, 1], [], []>} : vector<16x32xf32>, vector<32x8xf32>, vector<16x8xf32> -> vector<16x8xf32>
    %c1_217 = arith.constant 1 : index
    %c0_218 = arith.constant 0 : index
    %c0_219 = arith.constant 0 : index
    %c0_220 = arith.constant 0 : index
    %c0_221 = arith.constant 0 : index
    %298 = vector.load %arg4[%c1_217, %c0_218, %c0_219, %c0_220, %c0_221] : memref<2x3x4x1x8xf32, #tpu.memory_space<vmem>>, vector<1x1x1x1x8xf32>
    %299 = vector.shape_cast %298 : vector<1x1x1x1x8xf32> to vector<1x8xf32>
    %300 = vector.broadcast %299 : vector<1x8xf32> to vector<16x8xf32>
    %301 = arith.addf %297, %300 : vector<16x8xf32>
    %c1_222 = arith.constant 1 : index
    %c1_223 = arith.constant 1 : index
    %c0_224 = arith.constant 0 : index
    %c0_225 = arith.constant 0 : index
    %c0_226 = arith.constant 0 : index
    %302 = vector.load %arg3[%c1_222, %c1_223, %c0_224, %c0_225, %c0_226] : memref<2x3x4x32x8xf32, #tpu.memory_space<vmem>>, vector<1x1x1x32x8xf32>
    %303 = vector.shape_cast %302 : vector<1x1x1x32x8xf32> to vector<32x8xf32>
    %cst_227 = arith.constant dense<0.000000e+00> : vector<16x8xf32>
    %304 = tpu.matmul %294, %303, %cst_227 {dimension_numbers = #tpu.dot_dimension_numbers<[1], [0], [0], [1], [0, 0, 1, 1], [], []>} : vector<16x32xf32>, vector<32x8xf32>, vector<16x8xf32> -> vector<16x8xf32>
    %c1_228 = arith.constant 1 : index
    %c1_229 = arith.constant 1 : index
    %c0_230 = arith.constant 0 : index
    %c0_231 = arith.constant 0 : index
    %c0_232 = arith.constant 0 : index
    %305 = vector.load %arg4[%c1_228, %c1_229, %c0_230, %c0_231, %c0_232] : memref<2x3x4x1x8xf32, #tpu.memory_space<vmem>>, vector<1x1x1x1x8xf32>
    %306 = vector.shape_cast %305 : vector<1x1x1x1x8xf32> to vector<1x8xf32>
    %307 = vector.broadcast %306 : vector<1x8xf32> to vector<16x8xf32>
    %308 = arith.addf %304, %307 : vector<16x8xf32>
    %c1_233 = arith.constant 1 : index
    %c2_234 = arith.constant 2 : index
    %c0_235 = arith.constant 0 : index
    %c0_236 = arith.constant 0 : index
    %c0_237 = arith.constant 0 : index
    %309 = vector.load %arg3[%c1_233, %c2_234, %c0_235, %c0_236, %c0_237] : memref<2x3x4x32x8xf32, #tpu.memory_space<vmem>>, vector<1x1x1x32x8xf32>
    %310 = vector.shape_cast %309 : vector<1x1x1x32x8xf32> to vector<32x8xf32>
    %cst_238 = arith.constant dense<0.000000e+00> : vector<16x8xf32>
    %311 = tpu.matmul %294, %310, %cst_238 {dimension_numbers = #tpu.dot_dimension_numbers<[1], [0], [0], [1], [0, 0, 1, 1], [], []>} : vector<16x32xf32>, vector<32x8xf32>, vector<16x8xf32> -> vector<16x8xf32>
    %c1_239 = arith.constant 1 : index
    %c2_240 = arith.constant 2 : index
    %c0_241 = arith.constant 0 : index
    %c0_242 = arith.constant 0 : index
    %c0_243 = arith.constant 0 : index
    %312 = vector.load %arg4[%c1_239, %c2_240, %c0_241, %c0_242, %c0_243] : memref<2x3x4x1x8xf32, #tpu.memory_space<vmem>>, vector<1x1x1x1x8xf32>
    %313 = vector.shape_cast %312 : vector<1x1x1x1x8xf32> to vector<1x8xf32>
    %314 = vector.broadcast %313 : vector<1x8xf32> to vector<16x8xf32>
    %315 = arith.addf %311, %314 : vector<16x8xf32>
    %316 = vector.shape_cast %301 : vector<16x8xf32> to vector<2x8x8xf32>
    %317 = vector.shape_cast %308 : vector<16x8xf32> to vector<2x8x8xf32>
    %318 = vector.shape_cast %315 : vector<16x8xf32> to vector<2x8x8xf32>
    "tpu.trace_start"() <{level = 10 : i32, message = "bqd,bkd->bqk"}> : () -> ()
    %cst_244 = arith.constant dense<0.000000e+00> : vector<2x8x8xf32>
    %319 = tpu.matmul %316, %317, %cst_244 {dimension_numbers = #tpu.dot_dimension_numbers<[2], [2], [1], [1], [0, 0, 0, 1, 1, 1], [0], [0]>} : vector<2x8x8xf32>, vector<2x8x8xf32>, vector<2x8x8xf32> -> vector<2x8x8xf32>
    "tpu.trace_stop"() : () -> ()
    %320 = vector.broadcast %16 : vector<1x8x8xf32> to vector<2x8x8xf32>
    %321 = arith.addf %319, %320 : vector<2x8x8xf32>
    %cst_245 = arith.constant dense<0xFF800000> : vector<2x8xf32>
    %322 = vector.multi_reduction <maximumf>, %321, %cst_245 [2] : vector<2x8x8xf32> to vector<2x8xf32>
    %323 = vector.shape_cast %322 : vector<2x8xf32> to vector<2x8x1xf32>
    %324 = vector.broadcast %323 : vector<2x8x1xf32> to vector<2x8x8xf32>
    %325 = arith.subf %321, %324 : vector<2x8x8xf32>
    %326 = math.exp %325 : vector<2x8x8xf32>
    %cst_246 = arith.constant dense<0.000000e+00> : vector<2x8xf32>
    %327 = vector.multi_reduction <add>, %326, %cst_246 [2] : vector<2x8x8xf32> to vector<2x8xf32>
    %328 = vector.shape_cast %327 : vector<2x8xf32> to vector<2x8x1xf32>
    %329 = tpu.reciprocal %328 {approx = true} : vector<2x8x1xf32> -> vector<2x8x1xf32>
    %330 = vector.broadcast %329 : vector<2x8x1xf32> to vector<2x8x8xf32>
    %331 = arith.mulf %326, %330 : vector<2x8x8xf32>
    "tpu.trace_start"() <{level = 10 : i32, message = "bqk,bkd->bqd"}> : () -> ()
    %cst_247 = arith.constant dense<0.000000e+00> : vector<2x8x8xf32>
    %332 = tpu.matmul %331, %318, %cst_247 {dimension_numbers = #tpu.dot_dimension_numbers<[2], [1], [1], [2], [0, 0, 0, 1, 1, 2], [0], [0]>} : vector<2x8x8xf32>, vector<2x8x8xf32>, vector<2x8x8xf32> -> vector<2x8x8xf32>
    "tpu.trace_stop"() : () -> ()
    %333 = vector.shape_cast %332 : vector<2x8x8xf32> to vector<16x8xf32>
    %c1_248 = arith.constant 1 : index
    %c0_249 = arith.constant 0 : index
    %c0_250 = arith.constant 0 : index
    %c0_251 = arith.constant 0 : index
    %334 = vector.load %arg5[%c1_248, %c0_249, %c0_250, %c0_251] : memref<2x4x8x32xf32, #tpu.memory_space<vmem>>, vector<1x1x8x32xf32>
    %335 = vector.shape_cast %334 : vector<1x1x8x32xf32> to vector<8x32xf32>
    %cst_252 = arith.constant dense<0.000000e+00> : vector<16x32xf32>
    %336 = tpu.matmul %333, %335, %cst_252 {dimension_numbers = #tpu.dot_dimension_numbers<[1], [0], [0], [1], [0, 0, 1, 1], [], []>} : vector<16x8xf32>, vector<8x32xf32>, vector<16x32xf32> -> vector<16x32xf32>
    %c1_253 = arith.constant 1 : index
    %c0_254 = arith.constant 0 : index
    %c1_255 = arith.constant 1 : index
    %c0_256 = arith.constant 0 : index
    %c0_257 = arith.constant 0 : index
    %337 = vector.load %arg3[%c1_253, %c0_254, %c1_255, %c0_256, %c0_257] : memref<2x3x4x32x8xf32, #tpu.memory_space<vmem>>, vector<1x1x1x32x8xf32>
    %338 = vector.shape_cast %337 : vector<1x1x1x32x8xf32> to vector<32x8xf32>
    %cst_258 = arith.constant dense<0.000000e+00> : vector<16x8xf32>
    %339 = tpu.matmul %294, %338, %cst_258 {dimension_numbers = #tpu.dot_dimension_numbers<[1], [0], [0], [1], [0, 0, 1, 1], [], []>} : vector<16x32xf32>, vector<32x8xf32>, vector<16x8xf32> -> vector<16x8xf32>
    %c1_259 = arith.constant 1 : index
    %c0_260 = arith.constant 0 : index
    %c1_261 = arith.constant 1 : index
    %c0_262 = arith.constant 0 : index
    %c0_263 = arith.constant 0 : index
    %340 = vector.load %arg4[%c1_259, %c0_260, %c1_261, %c0_262, %c0_263] : memref<2x3x4x1x8xf32, #tpu.memory_space<vmem>>, vector<1x1x1x1x8xf32>
    %341 = vector.shape_cast %340 : vector<1x1x1x1x8xf32> to vector<1x8xf32>
    %342 = vector.broadcast %341 : vector<1x8xf32> to vector<16x8xf32>
    %343 = arith.addf %339, %342 : vector<16x8xf32>
    %c1_264 = arith.constant 1 : index
    %c1_265 = arith.constant 1 : index
    %c1_266 = arith.constant 1 : index
    %c0_267 = arith.constant 0 : index
    %c0_268 = arith.constant 0 : index
    %344 = vector.load %arg3[%c1_264, %c1_265, %c1_266, %c0_267, %c0_268] : memref<2x3x4x32x8xf32, #tpu.memory_space<vmem>>, vector<1x1x1x32x8xf32>
    %345 = vector.shape_cast %344 : vector<1x1x1x32x8xf32> to vector<32x8xf32>
    %cst_269 = arith.constant dense<0.000000e+00> : vector<16x8xf32>
    %346 = tpu.matmul %294, %345, %cst_269 {dimension_numbers = #tpu.dot_dimension_numbers<[1], [0], [0], [1], [0, 0, 1, 1], [], []>} : vector<16x32xf32>, vector<32x8xf32>, vector<16x8xf32> -> vector<16x8xf32>
    %c1_270 = arith.constant 1 : index
    %c1_271 = arith.constant 1 : index
    %c1_272 = arith.constant 1 : index
    %c0_273 = arith.constant 0 : index
    %c0_274 = arith.constant 0 : index
    %347 = vector.load %arg4[%c1_270, %c1_271, %c1_272, %c0_273, %c0_274] : memref<2x3x4x1x8xf32, #tpu.memory_space<vmem>>, vector<1x1x1x1x8xf32>
    %348 = vector.shape_cast %347 : vector<1x1x1x1x8xf32> to vector<1x8xf32>
    %349 = vector.broadcast %348 : vector<1x8xf32> to vector<16x8xf32>
    %350 = arith.addf %346, %349 : vector<16x8xf32>
    %c1_275 = arith.constant 1 : index
    %c2_276 = arith.constant 2 : index
    %c1_277 = arith.constant 1 : index
    %c0_278 = arith.constant 0 : index
    %c0_279 = arith.constant 0 : index
    %351 = vector.load %arg3[%c1_275, %c2_276, %c1_277, %c0_278, %c0_279] : memref<2x3x4x32x8xf32, #tpu.memory_space<vmem>>, vector<1x1x1x32x8xf32>
    %352 = vector.shape_cast %351 : vector<1x1x1x32x8xf32> to vector<32x8xf32>
    %cst_280 = arith.constant dense<0.000000e+00> : vector<16x8xf32>
    %353 = tpu.matmul %294, %352, %cst_280 {dimension_numbers = #tpu.dot_dimension_numbers<[1], [0], [0], [1], [0, 0, 1, 1], [], []>} : vector<16x32xf32>, vector<32x8xf32>, vector<16x8xf32> -> vector<16x8xf32>
    %c1_281 = arith.constant 1 : index
    %c2_282 = arith.constant 2 : index
    %c1_283 = arith.constant 1 : index
    %c0_284 = arith.constant 0 : index
    %c0_285 = arith.constant 0 : index
    %354 = vector.load %arg4[%c1_281, %c2_282, %c1_283, %c0_284, %c0_285] : memref<2x3x4x1x8xf32, #tpu.memory_space<vmem>>, vector<1x1x1x1x8xf32>
    %355 = vector.shape_cast %354 : vector<1x1x1x1x8xf32> to vector<1x8xf32>
    %356 = vector.broadcast %355 : vector<1x8xf32> to vector<16x8xf32>
    %357 = arith.addf %353, %356 : vector<16x8xf32>
    %358 = vector.shape_cast %343 : vector<16x8xf32> to vector<2x8x8xf32>
    %359 = vector.shape_cast %350 : vector<16x8xf32> to vector<2x8x8xf32>
    %360 = vector.shape_cast %357 : vector<16x8xf32> to vector<2x8x8xf32>
    "tpu.trace_start"() <{level = 10 : i32, message = "bqd,bkd->bqk"}> : () -> ()
    %cst_286 = arith.constant dense<0.000000e+00> : vector<2x8x8xf32>
    %361 = tpu.matmul %358, %359, %cst_286 {dimension_numbers = #tpu.dot_dimension_numbers<[2], [2], [1], [1], [0, 0, 0, 1, 1, 1], [0], [0]>} : vector<2x8x8xf32>, vector<2x8x8xf32>, vector<2x8x8xf32> -> vector<2x8x8xf32>
    "tpu.trace_stop"() : () -> ()
    %362 = vector.broadcast %16 : vector<1x8x8xf32> to vector<2x8x8xf32>
    %363 = arith.addf %361, %362 : vector<2x8x8xf32>
    %cst_287 = arith.constant dense<0xFF800000> : vector<2x8xf32>
    %364 = vector.multi_reduction <maximumf>, %363, %cst_287 [2] : vector<2x8x8xf32> to vector<2x8xf32>
    %365 = vector.shape_cast %364 : vector<2x8xf32> to vector<2x8x1xf32>
    %366 = vector.broadcast %365 : vector<2x8x1xf32> to vector<2x8x8xf32>
    %367 = arith.subf %363, %366 : vector<2x8x8xf32>
    %368 = math.exp %367 : vector<2x8x8xf32>
    %cst_288 = arith.constant dense<0.000000e+00> : vector<2x8xf32>
    %369 = vector.multi_reduction <add>, %368, %cst_288 [2] : vector<2x8x8xf32> to vector<2x8xf32>
    %370 = vector.shape_cast %369 : vector<2x8xf32> to vector<2x8x1xf32>
    %371 = tpu.reciprocal %370 {approx = true} : vector<2x8x1xf32> -> vector<2x8x1xf32>
    %372 = vector.broadcast %371 : vector<2x8x1xf32> to vector<2x8x8xf32>
    %373 = arith.mulf %368, %372 : vector<2x8x8xf32>
    "tpu.trace_start"() <{level = 10 : i32, message = "bqk,bkd->bqd"}> : () -> ()
    %cst_289 = arith.constant dense<0.000000e+00> : vector<2x8x8xf32>
    %374 = tpu.matmul %373, %360, %cst_289 {dimension_numbers = #tpu.dot_dimension_numbers<[2], [1], [1], [2], [0, 0, 0, 1, 1, 2], [0], [0]>} : vector<2x8x8xf32>, vector<2x8x8xf32>, vector<2x8x8xf32> -> vector<2x8x8xf32>
    "tpu.trace_stop"() : () -> ()
    %375 = vector.shape_cast %374 : vector<2x8x8xf32> to vector<16x8xf32>
    %c1_290 = arith.constant 1 : index
    %c1_291 = arith.constant 1 : index
    %c0_292 = arith.constant 0 : index
    %c0_293 = arith.constant 0 : index
    %376 = vector.load %arg5[%c1_290, %c1_291, %c0_292, %c0_293] : memref<2x4x8x32xf32, #tpu.memory_space<vmem>>, vector<1x1x8x32xf32>
    %377 = vector.shape_cast %376 : vector<1x1x8x32xf32> to vector<8x32xf32>
    %cst_294 = arith.constant dense<0.000000e+00> : vector<16x32xf32>
    %378 = tpu.matmul %375, %377, %cst_294 {dimension_numbers = #tpu.dot_dimension_numbers<[1], [0], [0], [1], [0, 0, 1, 1], [], []>} : vector<16x8xf32>, vector<8x32xf32>, vector<16x32xf32> -> vector<16x32xf32>
    %379 = arith.addf %336, %378 : vector<16x32xf32>
    %c1_295 = arith.constant 1 : index
    %c0_296 = arith.constant 0 : index
    %c2_297 = arith.constant 2 : index
    %c0_298 = arith.constant 0 : index
    %c0_299 = arith.constant 0 : index
    %380 = vector.load %arg3[%c1_295, %c0_296, %c2_297, %c0_298, %c0_299] : memref<2x3x4x32x8xf32, #tpu.memory_space<vmem>>, vector<1x1x1x32x8xf32>
    %381 = vector.shape_cast %380 : vector<1x1x1x32x8xf32> to vector<32x8xf32>
    %cst_300 = arith.constant dense<0.000000e+00> : vector<16x8xf32>
    %382 = tpu.matmul %294, %381, %cst_300 {dimension_numbers = #tpu.dot_dimension_numbers<[1], [0], [0], [1], [0, 0, 1, 1], [], []>} : vector<16x32xf32>, vector<32x8xf32>, vector<16x8xf32> -> vector<16x8xf32>
    %c1_301 = arith.constant 1 : index
    %c0_302 = arith.constant 0 : index
    %c2_303 = arith.constant 2 : index
    %c0_304 = arith.constant 0 : index
    %c0_305 = arith.constant 0 : index
    %383 = vector.load %arg4[%c1_301, %c0_302, %c2_303, %c0_304, %c0_305] : memref<2x3x4x1x8xf32, #tpu.memory_space<vmem>>, vector<1x1x1x1x8xf32>
    %384 = vector.shape_cast %383 : vector<1x1x1x1x8xf32> to vector<1x8xf32>
    %385 = vector.broadcast %384 : vector<1x8xf32> to vector<16x8xf32>
    %386 = arith.addf %382, %385 : vector<16x8xf32>
    %c1_306 = arith.constant 1 : index
    %c1_307 = arith.constant 1 : index
    %c2_308 = arith.constant 2 : index
    %c0_309 = arith.constant 0 : index
    %c0_310 = arith.constant 0 : index
    %387 = vector.load %arg3[%c1_306, %c1_307, %c2_308, %c0_309, %c0_310] : memref<2x3x4x32x8xf32, #tpu.memory_space<vmem>>, vector<1x1x1x32x8xf32>
    %388 = vector.shape_cast %387 : vector<1x1x1x32x8xf32> to vector<32x8xf32>
    %cst_311 = arith.constant dense<0.000000e+00> : vector<16x8xf32>
    %389 = tpu.matmul %294, %388, %cst_311 {dimension_numbers = #tpu.dot_dimension_numbers<[1], [0], [0], [1], [0, 0, 1, 1], [], []>} : vector<16x32xf32>, vector<32x8xf32>, vector<16x8xf32> -> vector<16x8xf32>
    %c1_312 = arith.constant 1 : index
    %c1_313 = arith.constant 1 : index
    %c2_314 = arith.constant 2 : index
    %c0_315 = arith.constant 0 : index
    %c0_316 = arith.constant 0 : index
    %390 = vector.load %arg4[%c1_312, %c1_313, %c2_314, %c0_315, %c0_316] : memref<2x3x4x1x8xf32, #tpu.memory_space<vmem>>, vector<1x1x1x1x8xf32>
    %391 = vector.shape_cast %390 : vector<1x1x1x1x8xf32> to vector<1x8xf32>
    %392 = vector.broadcast %391 : vector<1x8xf32> to vector<16x8xf32>
    %393 = arith.addf %389, %392 : vector<16x8xf32>
    %c1_317 = arith.constant 1 : index
    %c2_318 = arith.constant 2 : index
    %c2_319 = arith.constant 2 : index
    %c0_320 = arith.constant 0 : index
    %c0_321 = arith.constant 0 : index
    %394 = vector.load %arg3[%c1_317, %c2_318, %c2_319, %c0_320, %c0_321] : memref<2x3x4x32x8xf32, #tpu.memory_space<vmem>>, vector<1x1x1x32x8xf32>
    %395 = vector.shape_cast %394 : vector<1x1x1x32x8xf32> to vector<32x8xf32>
    %cst_322 = arith.constant dense<0.000000e+00> : vector<16x8xf32>
    %396 = tpu.matmul %294, %395, %cst_322 {dimension_numbers = #tpu.dot_dimension_numbers<[1], [0], [0], [1], [0, 0, 1, 1], [], []>} : vector<16x32xf32>, vector<32x8xf32>, vector<16x8xf32> -> vector<16x8xf32>
    %c1_323 = arith.constant 1 : index
    %c2_324 = arith.constant 2 : index
    %c2_325 = arith.constant 2 : index
    %c0_326 = arith.constant 0 : index
    %c0_327 = arith.constant 0 : index
    %397 = vector.load %arg4[%c1_323, %c2_324, %c2_325, %c0_326, %c0_327] : memref<2x3x4x1x8xf32, #tpu.memory_space<vmem>>, vector<1x1x1x1x8xf32>
    %398 = vector.shape_cast %397 : vector<1x1x1x1x8xf32> to vector<1x8xf32>
    %399 = vector.broadcast %398 : vector<1x8xf32> to vector<16x8xf32>
    %400 = arith.addf %396, %399 : vector<16x8xf32>
    %401 = vector.shape_cast %386 : vector<16x8xf32> to vector<2x8x8xf32>
    %402 = vector.shape_cast %393 : vector<16x8xf32> to vector<2x8x8xf32>
    %403 = vector.shape_cast %400 : vector<16x8xf32> to vector<2x8x8xf32>
    "tpu.trace_start"() <{level = 10 : i32, message = "bqd,bkd->bqk"}> : () -> ()
    %cst_328 = arith.constant dense<0.000000e+00> : vector<2x8x8xf32>
    %404 = tpu.matmul %401, %402, %cst_328 {dimension_numbers = #tpu.dot_dimension_numbers<[2], [2], [1], [1], [0, 0, 0, 1, 1, 1], [0], [0]>} : vector<2x8x8xf32>, vector<2x8x8xf32>, vector<2x8x8xf32> -> vector<2x8x8xf32>
    "tpu.trace_stop"() : () -> ()
    %405 = vector.broadcast %16 : vector<1x8x8xf32> to vector<2x8x8xf32>
    %406 = arith.addf %404, %405 : vector<2x8x8xf32>
    %cst_329 = arith.constant dense<0xFF800000> : vector<2x8xf32>
    %407 = vector.multi_reduction <maximumf>, %406, %cst_329 [2] : vector<2x8x8xf32> to vector<2x8xf32>
    %408 = vector.shape_cast %407 : vector<2x8xf32> to vector<2x8x1xf32>
    %409 = vector.broadcast %408 : vector<2x8x1xf32> to vector<2x8x8xf32>
    %410 = arith.subf %406, %409 : vector<2x8x8xf32>
    %411 = math.exp %410 : vector<2x8x8xf32>
    %cst_330 = arith.constant dense<0.000000e+00> : vector<2x8xf32>
    %412 = vector.multi_reduction <add>, %411, %cst_330 [2] : vector<2x8x8xf32> to vector<2x8xf32>
    %413 = vector.shape_cast %412 : vector<2x8xf32> to vector<2x8x1xf32>
    %414 = tpu.reciprocal %413 {approx = true} : vector<2x8x1xf32> -> vector<2x8x1xf32>
    %415 = vector.broadcast %414 : vector<2x8x1xf32> to vector<2x8x8xf32>
    %416 = arith.mulf %411, %415 : vector<2x8x8xf32>
    "tpu.trace_start"() <{level = 10 : i32, message = "bqk,bkd->bqd"}> : () -> ()
    %cst_331 = arith.constant dense<0.000000e+00> : vector<2x8x8xf32>
    %417 = tpu.matmul %416, %403, %cst_331 {dimension_numbers = #tpu.dot_dimension_numbers<[2], [1], [1], [2], [0, 0, 0, 1, 1, 2], [0], [0]>} : vector<2x8x8xf32>, vector<2x8x8xf32>, vector<2x8x8xf32> -> vector<2x8x8xf32>
    "tpu.trace_stop"() : () -> ()
    %418 = vector.shape_cast %417 : vector<2x8x8xf32> to vector<16x8xf32>
    %c1_332 = arith.constant 1 : index
    %c2_333 = arith.constant 2 : index
    %c0_334 = arith.constant 0 : index
    %c0_335 = arith.constant 0 : index
    %419 = vector.load %arg5[%c1_332, %c2_333, %c0_334, %c0_335] : memref<2x4x8x32xf32, #tpu.memory_space<vmem>>, vector<1x1x8x32xf32>
    %420 = vector.shape_cast %419 : vector<1x1x8x32xf32> to vector<8x32xf32>
    %cst_336 = arith.constant dense<0.000000e+00> : vector<16x32xf32>
    %421 = tpu.matmul %418, %420, %cst_336 {dimension_numbers = #tpu.dot_dimension_numbers<[1], [0], [0], [1], [0, 0, 1, 1], [], []>} : vector<16x8xf32>, vector<8x32xf32>, vector<16x32xf32> -> vector<16x32xf32>
    %422 = arith.addf %379, %421 : vector<16x32xf32>
    %c1_337 = arith.constant 1 : index
    %c0_338 = arith.constant 0 : index
    %c3_339 = arith.constant 3 : index
    %c0_340 = arith.constant 0 : index
    %c0_341 = arith.constant 0 : index
    %423 = vector.load %arg3[%c1_337, %c0_338, %c3_339, %c0_340, %c0_341] : memref<2x3x4x32x8xf32, #tpu.memory_space<vmem>>, vector<1x1x1x32x8xf32>
    %424 = vector.shape_cast %423 : vector<1x1x1x32x8xf32> to vector<32x8xf32>
    %cst_342 = arith.constant dense<0.000000e+00> : vector<16x8xf32>
    %425 = tpu.matmul %294, %424, %cst_342 {dimension_numbers = #tpu.dot_dimension_numbers<[1], [0], [0], [1], [0, 0, 1, 1], [], []>} : vector<16x32xf32>, vector<32x8xf32>, vector<16x8xf32> -> vector<16x8xf32>
    %c1_343 = arith.constant 1 : index
    %c0_344 = arith.constant 0 : index
    %c3_345 = arith.constant 3 : index
    %c0_346 = arith.constant 0 : index
    %c0_347 = arith.constant 0 : index
    %426 = vector.load %arg4[%c1_343, %c0_344, %c3_345, %c0_346, %c0_347] : memref<2x3x4x1x8xf32, #tpu.memory_space<vmem>>, vector<1x1x1x1x8xf32>
    %427 = vector.shape_cast %426 : vector<1x1x1x1x8xf32> to vector<1x8xf32>
    %428 = vector.broadcast %427 : vector<1x8xf32> to vector<16x8xf32>
    %429 = arith.addf %425, %428 : vector<16x8xf32>
    %c1_348 = arith.constant 1 : index
    %c1_349 = arith.constant 1 : index
    %c3_350 = arith.constant 3 : index
    %c0_351 = arith.constant 0 : index
    %c0_352 = arith.constant 0 : index
    %430 = vector.load %arg3[%c1_348, %c1_349, %c3_350, %c0_351, %c0_352] : memref<2x3x4x32x8xf32, #tpu.memory_space<vmem>>, vector<1x1x1x32x8xf32>
    %431 = vector.shape_cast %430 : vector<1x1x1x32x8xf32> to vector<32x8xf32>
    %cst_353 = arith.constant dense<0.000000e+00> : vector<16x8xf32>
    %432 = tpu.matmul %294, %431, %cst_353 {dimension_numbers = #tpu.dot_dimension_numbers<[1], [0], [0], [1], [0, 0, 1, 1], [], []>} : vector<16x32xf32>, vector<32x8xf32>, vector<16x8xf32> -> vector<16x8xf32>
    %c1_354 = arith.constant 1 : index
    %c1_355 = arith.constant 1 : index
    %c3_356 = arith.constant 3 : index
    %c0_357 = arith.constant 0 : index
    %c0_358 = arith.constant 0 : index
    %433 = vector.load %arg4[%c1_354, %c1_355, %c3_356, %c0_357, %c0_358] : memref<2x3x4x1x8xf32, #tpu.memory_space<vmem>>, vector<1x1x1x1x8xf32>
    %434 = vector.shape_cast %433 : vector<1x1x1x1x8xf32> to vector<1x8xf32>
    %435 = vector.broadcast %434 : vector<1x8xf32> to vector<16x8xf32>
    %436 = arith.addf %432, %435 : vector<16x8xf32>
    %c1_359 = arith.constant 1 : index
    %c2_360 = arith.constant 2 : index
    %c3_361 = arith.constant 3 : index
    %c0_362 = arith.constant 0 : index
    %c0_363 = arith.constant 0 : index
    %437 = vector.load %arg3[%c1_359, %c2_360, %c3_361, %c0_362, %c0_363] : memref<2x3x4x32x8xf32, #tpu.memory_space<vmem>>, vector<1x1x1x32x8xf32>
    %438 = vector.shape_cast %437 : vector<1x1x1x32x8xf32> to vector<32x8xf32>
    %cst_364 = arith.constant dense<0.000000e+00> : vector<16x8xf32>
    %439 = tpu.matmul %294, %438, %cst_364 {dimension_numbers = #tpu.dot_dimension_numbers<[1], [0], [0], [1], [0, 0, 1, 1], [], []>} : vector<16x32xf32>, vector<32x8xf32>, vector<16x8xf32> -> vector<16x8xf32>
    %c1_365 = arith.constant 1 : index
    %c2_366 = arith.constant 2 : index
    %c3_367 = arith.constant 3 : index
    %c0_368 = arith.constant 0 : index
    %c0_369 = arith.constant 0 : index
    %440 = vector.load %arg4[%c1_365, %c2_366, %c3_367, %c0_368, %c0_369] : memref<2x3x4x1x8xf32, #tpu.memory_space<vmem>>, vector<1x1x1x1x8xf32>
    %441 = vector.shape_cast %440 : vector<1x1x1x1x8xf32> to vector<1x8xf32>
    %442 = vector.broadcast %441 : vector<1x8xf32> to vector<16x8xf32>
    %443 = arith.addf %439, %442 : vector<16x8xf32>
    %444 = vector.shape_cast %429 : vector<16x8xf32> to vector<2x8x8xf32>
    %445 = vector.shape_cast %436 : vector<16x8xf32> to vector<2x8x8xf32>
    %446 = vector.shape_cast %443 : vector<16x8xf32> to vector<2x8x8xf32>
    "tpu.trace_start"() <{level = 10 : i32, message = "bqd,bkd->bqk"}> : () -> ()
    %cst_370 = arith.constant dense<0.000000e+00> : vector<2x8x8xf32>
    %447 = tpu.matmul %444, %445, %cst_370 {dimension_numbers = #tpu.dot_dimension_numbers<[2], [2], [1], [1], [0, 0, 0, 1, 1, 1], [0], [0]>} : vector<2x8x8xf32>, vector<2x8x8xf32>, vector<2x8x8xf32> -> vector<2x8x8xf32>
    "tpu.trace_stop"() : () -> ()
    %448 = vector.broadcast %16 : vector<1x8x8xf32> to vector<2x8x8xf32>
    %449 = arith.addf %447, %448 : vector<2x8x8xf32>
    %cst_371 = arith.constant dense<0xFF800000> : vector<2x8xf32>
    %450 = vector.multi_reduction <maximumf>, %449, %cst_371 [2] : vector<2x8x8xf32> to vector<2x8xf32>
    %451 = vector.shape_cast %450 : vector<2x8xf32> to vector<2x8x1xf32>
    %452 = vector.broadcast %451 : vector<2x8x1xf32> to vector<2x8x8xf32>
    %453 = arith.subf %449, %452 : vector<2x8x8xf32>
    %454 = math.exp %453 : vector<2x8x8xf32>
    %cst_372 = arith.constant dense<0.000000e+00> : vector<2x8xf32>
    %455 = vector.multi_reduction <add>, %454, %cst_372 [2] : vector<2x8x8xf32> to vector<2x8xf32>
    %456 = vector.shape_cast %455 : vector<2x8xf32> to vector<2x8x1xf32>
    %457 = tpu.reciprocal %456 {approx = true} : vector<2x8x1xf32> -> vector<2x8x1xf32>
    %458 = vector.broadcast %457 : vector<2x8x1xf32> to vector<2x8x8xf32>
    %459 = arith.mulf %454, %458 : vector<2x8x8xf32>
    "tpu.trace_start"() <{level = 10 : i32, message = "bqk,bkd->bqd"}> : () -> ()
    %cst_373 = arith.constant dense<0.000000e+00> : vector<2x8x8xf32>
    %460 = tpu.matmul %459, %446, %cst_373 {dimension_numbers = #tpu.dot_dimension_numbers<[2], [1], [1], [2], [0, 0, 0, 1, 1, 2], [0], [0]>} : vector<2x8x8xf32>, vector<2x8x8xf32>, vector<2x8x8xf32> -> vector<2x8x8xf32>
    "tpu.trace_stop"() : () -> ()
    %461 = vector.shape_cast %460 : vector<2x8x8xf32> to vector<16x8xf32>
    %c1_374 = arith.constant 1 : index
    %c3_375 = arith.constant 3 : index
    %c0_376 = arith.constant 0 : index
    %c0_377 = arith.constant 0 : index
    %462 = vector.load %arg5[%c1_374, %c3_375, %c0_376, %c0_377] : memref<2x4x8x32xf32, #tpu.memory_space<vmem>>, vector<1x1x8x32xf32>
    %463 = vector.shape_cast %462 : vector<1x1x8x32xf32> to vector<8x32xf32>
    %cst_378 = arith.constant dense<0.000000e+00> : vector<16x32xf32>
    %464 = tpu.matmul %461, %463, %cst_378 {dimension_numbers = #tpu.dot_dimension_numbers<[1], [0], [0], [1], [0, 0, 1, 1], [], []>} : vector<16x8xf32>, vector<8x32xf32>, vector<16x32xf32> -> vector<16x32xf32>
    %465 = arith.addf %422, %464 : vector<16x32xf32>
    %466 = arith.addf %264, %465 : vector<16x32xf32>
    %467 = vector.broadcast %271 : vector<1x32xf32> to vector<16x32xf32>
    %468 = arith.addf %466, %467 : vector<16x32xf32>
    %cst_379 = arith.constant dense<0.000000e+00> : vector<16xf32>
    %469 = vector.multi_reduction <add>, %468, %cst_379 [1] : vector<16x32xf32> to vector<16xf32>
    %470 = vector.shape_cast %469 : vector<16xf32> to vector<16x1xf32>
    %cst_380 = arith.constant 3.200000e+01 : f32
    %471 = vector.broadcast %cst_380 : f32 to vector<16x1xf32>
    %472 = arith.divf %470, %471 : vector<16x1xf32>
    %473 = vector.broadcast %472 : vector<16x1xf32> to vector<16x32xf32>
    %474 = arith.subf %468, %473 : vector<16x32xf32>
    %475 = arith.mulf %474, %474 : vector<16x32xf32>
    %cst_381 = arith.constant dense<0.000000e+00> : vector<16xf32>
    %476 = vector.multi_reduction <add>, %475, %cst_381 [1] : vector<16x32xf32> to vector<16xf32>
    %477 = vector.shape_cast %476 : vector<16xf32> to vector<16x1xf32>
    %cst_382 = arith.constant 3.200000e+01 : f32
    %478 = vector.broadcast %cst_382 : f32 to vector<16x1xf32>
    %479 = arith.divf %477, %478 : vector<16x1xf32>
    %cst_383 = arith.constant 9.99999974E-6 : f32
    %480 = vector.broadcast %cst_383 : f32 to vector<16x1xf32>
    %481 = arith.addf %479, %480 : vector<16x1xf32>
    %482 = math.rsqrt %481 : vector<16x1xf32>
    %483 = vector.broadcast %482 : vector<16x1xf32> to vector<16x32xf32>
    %484 = arith.mulf %474, %483 : vector<16x32xf32>
    %485 = vector.broadcast %272 : vector<1x32xf32> to vector<16x32xf32>
    %486 = arith.mulf %484, %485 : vector<16x32xf32>
    %487 = vector.broadcast %273 : vector<1x32xf32> to vector<16x32xf32>
    %488 = arith.addf %486, %487 : vector<16x32xf32>
    %c1_384 = arith.constant 1 : index
    %c0_385 = arith.constant 0 : index
    %c0_386 = arith.constant 0 : index
    %489 = vector.load %arg6[%c1_384, %c0_385, %c0_386] : memref<2x32x128xf32, #tpu.memory_space<vmem>>, vector<1x32x128xf32>
    %490 = vector.shape_cast %489 : vector<1x32x128xf32> to vector<32x128xf32>
    %cst_387 = arith.constant dense<0.000000e+00> : vector<16x128xf32>
    %491 = tpu.matmul %488, %490, %cst_387 {dimension_numbers = #tpu.dot_dimension_numbers<[1], [0], [0], [1], [0, 0, 1, 1], [], []>} : vector<16x32xf32>, vector<32x128xf32>, vector<16x128xf32> -> vector<16x128xf32>
    %c1_388 = arith.constant 1 : index
    %c0_389 = arith.constant 0 : index
    %c0_390 = arith.constant 0 : index
    %492 = vector.load %arg7[%c1_388, %c0_389, %c0_390] : memref<2x1x128xf32, #tpu.memory_space<vmem>>, vector<1x1x128xf32>
    %493 = vector.shape_cast %492 : vector<1x1x128xf32> to vector<1x128xf32>
    %494 = vector.broadcast %493 : vector<1x128xf32> to vector<16x128xf32>
    %495 = arith.addf %491, %494 : vector<16x128xf32>
    %cst_391 = arith.constant 5.000000e-01 : f32
    %496 = vector.broadcast %cst_391 : f32 to vector<16x128xf32>
    %497 = arith.mulf %496, %495 : vector<16x128xf32>
    %cst_392 = arith.constant 4.471500e-02 : f32
    %498 = vector.broadcast %cst_392 : f32 to vector<16x128xf32>
    %499 = arith.mulf %498, %495 : vector<16x128xf32>
    %500 = arith.mulf %499, %495 : vector<16x128xf32>
    %501 = arith.mulf %500, %495 : vector<16x128xf32>
    %502 = arith.addf %495, %501 : vector<16x128xf32>
    %cst_393 = arith.constant 0.797884583 : f32
    %503 = vector.broadcast %cst_393 : f32 to vector<16x128xf32>
    %504 = arith.mulf %503, %502 : vector<16x128xf32>
    %505 = math.tanh %504 : vector<16x128xf32>
    %cst_394 = arith.constant 1.000000e+00 : f32
    %506 = vector.broadcast %cst_394 : f32 to vector<16x128xf32>
    %507 = arith.addf %506, %505 : vector<16x128xf32>
    %508 = arith.mulf %497, %507 : vector<16x128xf32>
    %c1_395 = arith.constant 1 : index
    %c0_396 = arith.constant 0 : index
    %c0_397 = arith.constant 0 : index
    %509 = vector.load %arg8[%c1_395, %c0_396, %c0_397] : memref<2x128x32xf32, #tpu.memory_space<vmem>>, vector<1x128x32xf32>
    %510 = vector.shape_cast %509 : vector<1x128x32xf32> to vector<128x32xf32>
    %cst_398 = arith.constant dense<0.000000e+00> : vector<16x32xf32>
    %511 = tpu.matmul %508, %510, %cst_398 {dimension_numbers = #tpu.dot_dimension_numbers<[1], [0], [0], [1], [0, 0, 1, 1], [], []>} : vector<16x128xf32>, vector<128x32xf32>, vector<16x32xf32> -> vector<16x32xf32>
    %512 = vector.broadcast %274 : vector<1x32xf32> to vector<16x32xf32>
    %513 = arith.addf %511, %512 : vector<16x32xf32>
    %514 = arith.addf %468, %513 : vector<16x32xf32>
    %515 = vector.shape_cast %514 : vector<16x32xf32> to vector<2x8x32xf32>
    %c0_399 = arith.constant 0 : index
    %c0_400 = arith.constant 0 : index
    %c0_401 = arith.constant 0 : index
    %516 = vector.load %arg14[%c0_399, %c0_400, %c0_401] : memref<2x8x32xf32, #tpu.memory_space<vmem>>, vector<2x8x32xf32>
    tpu.vector_store %arg14[%c0_399, %c0_400, %c0_401], %515 {strides = array<i32>} : memref<2x8x32xf32, #tpu.memory_space<vmem>>, vector<2x8x32xf32>,
    %c0_402 = arith.constant 0 : index
    %c0_403 = arith.constant 0 : index
    %517 = vector.load %arg10[%c0_402, %c0_403] : memref<2x32xf32, #tpu.memory_space<vmem>>, vector<2x32xf32>
    %518 = vector.extract_strided_slice %517 {offsets = [0, 0], sizes = [1, 32], strides = [1, 1]} : vector<2x32xf32> to vector<1x32xf32>
    %519 = vector.extract_strided_slice %517 {offsets = [1, 0], sizes = [1, 32], strides = [1, 1]} : vector<2x32xf32> to vector<1x32xf32>
    %cst_404 = arith.constant dense<0.000000e+00> : vector<16xf32>
    %520 = vector.multi_reduction <add>, %514, %cst_404 [1] : vector<16x32xf32> to vector<16xf32>
    %521 = vector.shape_cast %520 : vector<16xf32> to vector<16x1xf32>
    %cst_405 = arith.constant 3.200000e+01 : f32
    %522 = vector.broadcast %cst_405 : f32 to vector<16x1xf32>
    %523 = arith.divf %521, %522 : vector<16x1xf32>
    %524 = vector.broadcast %523 : vector<16x1xf32> to vector<16x32xf32>
    %525 = arith.subf %514, %524 : vector<16x32xf32>
    %526 = arith.mulf %525, %525 : vector<16x32xf32>
    %cst_406 = arith.constant dense<0.000000e+00> : vector<16xf32>
    %527 = vector.multi_reduction <add>, %526, %cst_406 [1] : vector<16x32xf32> to vector<16xf32>
    %528 = vector.shape_cast %527 : vector<16xf32> to vector<16x1xf32>
    %cst_407 = arith.constant 3.200000e+01 : f32
    %529 = vector.broadcast %cst_407 : f32 to vector<16x1xf32>
    %530 = arith.divf %528, %529 : vector<16x1xf32>
    %cst_408 = arith.constant 9.99999974E-6 : f32
    %531 = vector.broadcast %cst_408 : f32 to vector<16x1xf32>
    %532 = arith.addf %530, %531 : vector<16x1xf32>
    %533 = math.rsqrt %532 : vector<16x1xf32>
    %534 = vector.broadcast %533 : vector<16x1xf32> to vector<16x32xf32>
    %535 = arith.mulf %525, %534 : vector<16x32xf32>
    %536 = vector.broadcast %518 : vector<1x32xf32> to vector<16x32xf32>
    %537 = arith.mulf %535, %536 : vector<16x32xf32>
    %538 = vector.broadcast %519 : vector<1x32xf32> to vector<16x32xf32>
    %539 = arith.addf %537, %538 : vector<16x32xf32>
    %c0_409 = arith.constant 0 : index
    %c0_410 = arith.constant 0 : index
    %540 = vector.load %arg11[%c0_409, %c0_410] : memref<32x64xf32, #tpu.memory_space<vmem>>, vector<32x64xf32>
    %cst_411 = arith.constant dense<0.000000e+00> : vector<16x64xf32>
    %541 = tpu.matmul %539, %540, %cst_411 {dimension_numbers = #tpu.dot_dimension_numbers<[1], [0], [0], [1], [0, 0, 1, 1], [], []>} : vector<16x32xf32>, vector<32x64xf32>, vector<16x64xf32> -> vector<16x64xf32>
    %c0_412 = arith.constant 0 : index
    %c0_413 = arith.constant 0 : index
    %542 = vector.load %arg12[%c0_412, %c0_413] : memref<1x64xf32, #tpu.memory_space<vmem>>, vector<1x64xf32>
    %543 = vector.broadcast %542 : vector<1x64xf32> to vector<16x64xf32>
    %544 = arith.addf %541, %543 : vector<16x64xf32>
    %545 = vector.shape_cast %544 : vector<16x64xf32> to vector<2x8x64xf32>
    %c0_414 = arith.constant 0 : index
    %c0_415 = arith.constant 0 : index
    %c0_416 = arith.constant 0 : index
    %546 = vector.load %arg13[%c0_414, %c0_415, %c0_416] : memref<2x8x64xf32, #tpu.memory_space<vmem>>, vector<2x8x64xf32>
    tpu.vector_store %arg13[%c0_414, %c0_415, %c0_416], %545 {strides = array<i32>} : memref<2x8x64xf32, #tpu.memory_space<vmem>>, vector<2x8x64xf32>,
    return
  }
}

</mosaic_0001>

<bundles_post_ra>
// kernel: transformer_lens_wrapper_forward.1
= control target key start
LH: loop header
LB: loop body
LE: loop exit
PB: predicated region body
PF: predicated region fallthrough
CT: control target
= control target key end

     0   :  { %21 = vsyncpa [#allocation3], 0  ;;  %v7946_v2 = vmov 0   ;;  %s9116_s0 = inlined_call_operand.vmem [shape: s32[16,1], index: 0, kind: input, shape index: {}]   ;;  %s9117_s1 = inlined_call_operand.vmem [shape: f32[64,32], index: 1, kind: input, shape index: {}]   ;;  %s9118_s2 = inlined_call_operand.vmem [shape: f32[16,32], index: 2, kind: input, shape index: {}]   ;;  %s9119_s3 = inlined_call_operand.vmem [shape: f32[2,3,4,32,8], index: 3, kind: input, shape index: {}]   ;;  %s9120_s4 = inlined_call_operand.vmem [shape: f32[2,3,4,1,8], index: 4, kind: input, shape index: {}]   ;;  %s9121_s5 = inlined_call_operand.vmem [shape: f32[2,4,8,32], index: 5, kind: input, shape index: {}]   ;;  %s9122_s6 = inlined_call_operand.vmem [shape: f32[2,32,128], index: 6, kind: input, shape index: {}]   ;;  %s9123_s7 = inlined_call_operand.vmem [shape: f32[2,1,128], index: 7, kind: input, shape index: {}]   ;;  %s9124_s8 = inlined_call_operand.vmem [shape: f32[2,128,32], index: 8, kind: input, shape index: {}]   ;;  %s9125_s9 = inlined_call_operand.vmem [shape: f32[2,6,32], index: 9, kind: input, shape index: {}]   ;;  %s9126_s10 = inlined_call_operand.vmem [shape: f32[2,32], index: 10, kind: input, shape index: {}]   ;;  %s9127_s11 = inlined_call_operand.vmem [shape: f32[32,64], index: 11, kind: input, shape index: {}]   ;;  %s9128_s12 = inlined_call_operand.vmem [shape: f32[1,64], index: 12, kind: input, shape index: {}]   ;;  %s9129_s13 = inlined_call_operand.hbm [shape: f32[2,8,64], index: 13, kind: output, shape index: {0}]   ;;  %s9130_s14 = inlined_call_operand.hbm [shape: f32[2,8,32], index: 14, kind: output, shape index: {1}]   ;;  %s9131_s15 = inlined_call_operand.hbm [shape: f32[2,8,32], index: 15, kind: output, shape index: {2}]  }
   0x1   :  { %v51_v0 = vld [vmem:[%s9116_s0] sm:$0xff]  ;;  %7781 = vset.pattern.permute.xlu0 %v7946_v2  ;;  %v66_v3 = vld [vmem:[%s9117_s1 + $0x8] sm:$0xff]  ;;  %v67_v4 = vld [vmem:[%s9117_s1 + $0x10] sm:$0xff] }
   0x2   :  { %v65_v1 = vld [vmem:[%s9117_s1] sm:$0xff]  ;;  %v68_v5 = vld [vmem:[%s9117_s1 + $0x18] sm:$0xff]  ;;  %54 = vperm.xlu0 %7781, %v51_v0   ;;  %v52_v6 = vld [vmem:[%s9116_s0 + $0x8] sm:$0xff] }
   0x3   :  { %v7464_v7 = vpack.c.bf16 %v66_v3, %v65_v1  ;;  %v7468_v8 = vpack.c.bf16 %v68_v5, %v67_v4  ;;  %v69_v9 = vld [vmem:[%s9117_s1 + $0x20] sm:$0xff]  ;;  %v70_v10 = vld [vmem:[%s9117_s1 + $0x28] sm:$0xff] }
   0x4   :  { %22 = vsyncpa [#allocation5], 0  ;;  %v7472_v11 = vpack.c.bf16 %v70_v10, %v69_v9  ;;  %v71_v12 = vld [vmem:[%s9117_s1 + $0x30] sm:$0xff]  ;;  %v72_v13 = vld [vmem:[%s9117_s1 + $0x38] sm:$0xff]  ;;  %v49_v15 = vlaneseq  ;;  %vm75_vm0 = vcmask 523264   ;;  %v7947_v18 = vmov 0.0  }
   0x5   :  { %7465 = vmatprep.subr.bf16.mxu1 %v7464_v7  ;;  %v7476_v14 = vpack.c.bf16 %v72_v13, %v71_v12  ;;  %v73_v22 = vld [vmem:[%s9118_s2] sm:$0xff]  ;;  %v74_v24 = vld [vmem:[%s9118_s2 + $0x8] sm:$0xff]  ;;  %vm162_vm3 = vcmask 261120   ;;  %v204_v46 = vld [vmem:[%s9119_s3 + $0x10] sm:$0xff]  ;;  %vm7948_vm4 = vmmov 0   ;;  %vm470_vm5 = vcmask 64512  }
   0x6   :  { %7467 = vmatpush3.bf16.msra.mxu1 %v7464_v7  ;;  %57 = vperm.xlu0 %7781, %v52_v6   ;;  %v8066_v16 = vand.u32 127, %v49_v15  ;;  %v202_v40 = vld [vmem:[%s9119_s3] sm:$0xff]  ;;  %v203_v41 = vld [vmem:[%s9119_s3 + $0x8] sm:$0xff]  ;;  %v205_v47 = vld [vmem:[%s9119_s3 + $0x18] sm:$0xff]  ;;  %v8124_v60 = vshrl.u32 %v49_v15, 7 }
   0x7   :  { %7469 = vmatprep.subr.bf16.mxu1 %v7468_v8  ;;  %v7480_v42 = vpack.c.bf16 %v203_v41, %v202_v40  ;;  %v6304_v43 = vld [vmem:[%s9119_s3 + $0x100] sm:$0xff]  ;;  %v6305_v44 = vld [vmem:[%s9119_s3 + $0x108] sm:$0xff]  ;;  %v7484_v48 = vpack.c.bf16 %v205_v47, %v204_v46  ;;  %v6306_v49 = vld [vmem:[%s9119_s3 + $0x110] sm:$0xff] }
   0x8   :  { %v7496_v45 = vpack.c.bf16 %v6305_v44, %v6304_v43  ;;  %v6307_v50 = vld [vmem:[%s9119_s3 + $0x118] sm:$0xff]  ;;  %v6296_v52 = vld [vmem:[%s9119_s3 + $0x80] sm:$0xff]  ;;  %v6297_v53 = vld [vmem:[%s9119_s3 + $0x88] sm:$0xff]  ;;  %v8127_v62 = vsub.s32 0, %v8124_v60  ;;  %v8135_v0 = vsub.s32 1, %v8124_v60  ;;  %vm159_vm6 = vcmp.ge.s32.totalorder %v8124_v60, %v8066_v16 }
   0x9   :  { %v7500_v51 = vpack.c.bf16 %v6307_v50, %v6306_v49  ;;  %v7488_v54 = vpack.c.bf16 %v6297_v53, %v6296_v52  ;;  %v8132_v63 = vld [vmem:[%s9125_s9] sm:$0x3f]  ;;  %v6298_v9 = vld [vmem:[%s9119_s3 + $0x90] sm:$0xff]  ;;  %v6299_v10 = vld [vmem:[%s9119_s3 + $0x98] sm:$0xff] }
   0xa   :  { %7471 = vmatpush3.bf16.msra.mxu1 %v7468_v8  ;;  %7497 = vmatprep.subr.bf16.mxu0 %v7496_v45  ;;  %v193_v1 = vrot.slane %v8132_v63, %v8127_v62  ;;  %v199_v3 = vrot.slane %v8132_v63, %v8135_v0  ;;  %v7492_v13 = vpack.c.bf16 %v6299_v10, %v6298_v9  ;;  %v6326_v52 = vld [vmem:[%s9119_s3 + $0xa0] sm:$0xff]  ;;  %v6327_v53 = vld [vmem:[%s9119_s3 + $0xa8] sm:$0xff] }
   0xb   :  { %7473 = vmatprep.subr.bf16.mxu1 %v7472_v11  ;;  %7499 = vmatpush3.bf16.msra.mxu0 %v7496_v45 }
   0xc   :  { %7501 = vmatprep.subr.bf16.mxu0 %v7500_v51 }
   0xe   :  { %7475 = vmatpush3.bf16.msra.mxu1 %v7472_v11 }
   0xf   :  { %7477 = vmatprep.subr.bf16.mxu1 %v7476_v14  ;;  %7503 = vmatpush3.bf16.msra.mxu0 %v7500_v51 }
  0x10   :  { %6930 = vmatprep.subr.mxu0 %v7947_v18 }
  0x12   :  { %7479 = vmatpush3.bf16.msra.mxu1 %v7476_v14 }
  0x13   :  { %7481 = vmatprep.subr.bf16.mxu1 %v7480_v42 }
  0x81   :  { %v55_v17 = vpop.permute.xlu0 %54 }
  0x82   :  { %vm59_vm1 = vcmp.eq.s32.totalorder %v8066_v16, %v55_v17 }
  0x83   :  { %v6289_v19 = vsel %vm59_vm1, 1.0, %v7947_v18 }
  0x84   :  { %6894 = vmatprep.mubr.msk.f32.mxu1 %vm75_vm0, %v6289_v19 }
  0x85   :  { %v58_v20 = vpop.permute.xlu0 %57 }
  0x86   :  { %vm60_vm2 = vcmp.eq.s32.totalorder %v8066_v16, %v58_v20  ;;  %v6301_v20 = vld [vmem:[%s9120_s4 + $0x4] ss:$0 sm:$0xff] }
  0x87   :  { %v6290_v21 = vsel %vm60_vm2, 1.0, %v7947_v18 }
  0x88   :  { %6895 = vmatmul.mubr.msk.f32.vlgmr.msra.gmra.mrb[0].mxu1 %vm75_vm0, %v6290_v21 }
  0x89   :  { %7483 = vmatpush3.bf16.msra.mxu1 %v7480_v42 }
  0x8a   :  { %7485 = vmatprep.subr.bf16.mxu1 %v7484_v48 }
  0x8d   :  { %7487 = vmatpush3.bf16.msra.mxu1 %v7484_v48 }
  0x8e   :  { %7489 = vmatprep.subr.bf16.mxu1 %v7488_v54 }
 0x15b   :  { %v6896_v23 = vpop.f32.mrb[0].mxu1 }
 0x15c   :  { %v148_v25 = vpop.f32.mrb[1].mxu1  ;;  %v8082_v27 = vadd.f32 %v6896_v23, %v74_v24 }
 0x15d   :  { %v8080_v26 = vadd.f32 %v148_v25, %v73_v22  ;;  %v6293_v22 = vld [vmem:[%s9120_s4] ss:$0 sm:$0xff]  ;;  %v6309_v25 = vld [vmem:[%s9120_s4 + $0x8] ss:$0 sm:$0xff] }
 0x15e   :  { %v166_v29 = vsel %vm162_vm3, %v8082_v27, 0.0 }
 0x15f   :  { %v163_v28 = vsel %vm162_vm3, %v8080_v26, 0.0 }
 0x160   :  { %164 = vadd.xlane.f32.xlu1 %v163_v28 }
 0x164   :  { %167 = vadd.xlane.f32.xlu1 %v166_v29 }
 0x1ed   :  { %v165_v30 = vpop.xlane.xlu1 %164 }
 0x1ee   :  { %v170_v31 = vmul.f32 0.03125, %v165_v30 }
 0x1f0   :  { %v172_v32 = vsub.f32 %v8080_v26, %v170_v31 }
 0x1f1   :  { %v168_v33 = vpop.xlane.xlu1 %167 }
 0x1f2   :  { %v171_v34 = vmul.f32 0.03125, %v168_v33  ;;  %v174_v35 = vmul.f32 %v172_v32, %v172_v32  ;;  %v7949_v33 = vmov -1e+30  }
 0x1f4   :  { %v173_v36 = vsub.f32 %v8082_v27, %v171_v34  ;;  %v176_v37 = vsel %vm162_vm3, %v174_v35, 0.0  ;;  %v8189_v34 = vsel %vm159_vm6, 0.0, %v7949_v33 }
 0x1f5   :  { %177 = vadd.xlane.f32.xlu0 %v176_v37 }
 0x1f6   :  { %v175_v38 = vmul.f32 %v173_v36, %v173_v36 }
 0x1f8   :  { %v179_v39 = vsel %vm162_vm3, %v175_v38, 0.0 }
 0x1f9   :  { %180 = vadd.xlane.f32.xlu1 %v179_v39 }
 0x282   :  { %v178_v55 = vpop.xlane.xlu0 %177 }
 0x283   :  { %v182_v56 = vmul.f32 0.03125, %v178_v55  ;;  %v6318_v55 = vld [vmem:[%s9119_s3 + $0x20] sm:$0xff] }
 0x285   :  { %v184_v57 = vadd.f32 1e-05, %v182_v56  ;;  %v6319_v56 = vld [vmem:[%s9119_s3 + $0x28] sm:$0xff] }
 0x286   :  { %v181_v58 = vpop.xlane.xlu1 %180 }
 0x287   :  { %7782 = vrsqrt.f32 %v184_v57  ;;  %v183_v59 = vmul.f32 0.03125, %v181_v58  ;;  %v7504_v57 = vpack.c.bf16 %v6319_v56, %v6318_v55 }
 0x289   :  { %v185_v61 = vadd.f32 1e-05, %v183_v59 }
 0x28b   :  { %7784 = vrsqrt.f32 %v185_v61  ;;  %v6328_v61 = vld [vmem:[%s9119_s3 + $0xb0] sm:$0xff] }
 0x291   :  { %v7783_v2 = vpop.eup %7782 }
 0x292   :  { %v188_v4 = vmul.f32 %v7783_v2, %v172_v32 }
 0x294   :  { %v194_v5 = vmul.f32 %v193_v1, %v188_v4 }
 0x295   :  { %v7785_v6 = vpop.eup %7784 }
 0x296   :  { %v8141_v7 = vadd.f32 %v199_v3, %v194_v5  ;;  %v189_v8 = vmul.f32 %v7785_v6, %v173_v36  ;;  %v6320_v5 = vld [vmem:[%s9119_s3 + $0x30] sm:$0xff]  ;;  %v6321_v6 = vld [vmem:[%s9119_s3 + $0x38] sm:$0xff] }
 0x297   :  { %v7508_v10 = vpack.c.bf16 %v6321_v6, %v6320_v5  ;;  %v6355_v6 = vld [vmem:[%s9119_s3 + $0x50] sm:$0xff] }
 0x298   :  { %v195_v11 = vmul.f32 %v193_v1, %v189_v8  ;;  %6905 = vmatprep.mubr.msk.f32.mxu1 %vm162_vm3, %v8141_v7  ;;  %6927 = vmatprep.mubr.msk.f32.mxu0 %vm162_vm3, %v8141_v7  ;;  %v6329_v1 = vld [vmem:[%s9119_s3 + $0xb8] sm:$0xff] }
 0x299   :  { %v7516_v4 = vpack.c.bf16 %v6329_v1, %v6328_v61  ;;  %v6354_v61 = vld [vmem:[%s9119_s3 + $0x48] sm:$0xff] }
 0x29a   :  { %v8153_v12 = vadd.f32 %v199_v3, %v195_v11  ;;  %v6334_v11 = vld [vmem:[%s9119_s3 + $0x120] sm:$0xff] }
 0x29c   :  { %6906 = vmatmul.mubr.msk.f32.vlgmr.msra.gmra.mrb[2].mxu1 %vm162_vm3, %v8153_v12  ;;  %6928 = vmatmul.mubr.msk.f32.vlgmr.msra.gmra.mrb[0].mxu0 %vm162_vm3, %v8153_v12 }
 0x29d   :  { %7491 = vmatpush3.bf16.msra.mxu1 %v7488_v54  ;;  %6916 = vmatprep.mubr.msk.f32.mxu1 %vm162_vm3, %v8141_v7  ;;  %v7512_v54 = vpack.c.bf16 %v6327_v53, %v6326_v52 }
 0x29e   :  { %7493 = vmatprep.subr.bf16.mxu1 %v7492_v13  ;;  %6932 = vmatprep.mubr.msk.f32.mxu0 %vm7948_vm4, %v7947_v18 }
 0x2a1   :  { %7495 = vmatpush3.bf16.msra.mxu1 %v7492_v13  ;;  %v6335_v13 = vld [vmem:[%s9119_s3 + $0x128] sm:$0xff] }
 0x2a2   :  { %6935 = vmatprep.subr.mxu1 %v7947_v18 }
 0x2a4   :  { %6917 = vmatmul.mubr.msk.f32.vlgmr.msra.gmra.mrb[4].mxu1 %vm162_vm3, %v8153_v12 }
 0x2a5   :  { %6937 = vmatprep.mubr.msk.f32.mxu1 %vm7948_vm4, %v7947_v18 }
 0x36f   :  { %v6907_v14 = vpop.f32.mrb[2].mxu1  ;;  %v6929_v15 = vpop.f32.mrb[0].mxu0 }
 0x370   :  { %v285_v17 = vpop.f32.mrb[3].mxu1  ;;  %v461_v19 = vpop.f32.mrb[1].mxu0  ;;  %v291_v29 = vadd.f32 %v6907_v14, %v6293_v22  ;;  %v467_v30 = vadd.f32 %v6929_v15, %v6309_v25  ;;  %v7520_v14 = vpack.c.bf16 %v6335_v13, %v6334_v11  ;;  %v6336_v15 = vld [vmem:[%s9119_s3 + $0x130] sm:$0xff]  ;;  %v6369_v13 = vld [vmem:[%s9119_s3 + $0x140] sm:$0xff] }
 0x371   :  { %v286_v31 = vadd.f32 %v6293_v22, %v285_v17  ;;  %v462_v32 = vadd.f32 %v6309_v25, %v461_v19  ;;  %v6337_v17 = vld [vmem:[%s9119_s3 + $0x138] sm:$0xff] }
 0x372   :  { %v7524_v19 = vpack.c.bf16 %v6337_v17, %v6336_v15  ;;  %v6371_v17 = vld [vmem:[%s9119_s3 + $0x150] sm:$0xff] }
 0x377   :  { %v6918_v21 = vpop.f32.mrb[4].mxu1 }
 0x378   :  { %v379_v23 = vadd.f32 %v6918_v21, %v6301_v20  ;;  %v373_v24 = vpop.f32.mrb[5].mxu1 }
 0x379   :  { %v374_v28 = vadd.f32 %v6301_v20, %v373_v24  ;;  %v6331_v24 = vld [vmem:[%s9120_s4 + $0x5] ss:$0 sm:$0xff] }
 0x37a   :  { %6936 = vmatpush3.xpose.msk.msra.mxu1 %vm470_vm5, %v379_v23 }
 0x37b   :  { %6931 = vmatpush3.xpose.msk.msra.mxu0 %vm470_vm5, %v374_v28  ;;  %6945 = vmatprep.subr.mxu1 %v7947_v18 }
 0x37c   :  { %6940 = vmatprep.subr.mxu0 %v7947_v18 }
 0x37d   :  { %6938 = vmatmul.mubr.msk.f32.vlgmr.msra.gmra.mrb[6].mxu1 %vm470_vm5, %v291_v29 }
 0x37e   :  { %6933 = vmatmul.mubr.msk.f32.vlgmr.msra.gmra.mrb[2].mxu0 %vm470_vm5, %v286_v31  ;;  %6946 = vmatpush3.msra.mxu1 %v467_v30  ;;  %v6323_v30 = vld [vmem:[%s9120_s4 + $0x1] ss:$0 sm:$0xff] }
 0x37f   :  { %6941 = vmatpush3.msra.mxu0 %v462_v32  ;;  %6947 = vmatprep.mubr.msk.f32.mxu1 %vm7948_vm4, %v7947_v18 }
 0x380   :  { %6942 = vmatprep.mubr.msk.f32.mxu0 %vm7948_vm4, %v7947_v18  ;;  %7513 = vmatprep.subr.bf16.mxu1 %v7512_v54 }
 0x381   :  { %7505 = vmatprep.subr.bf16.mxu0 %v7504_v57 }
 0x450   :  { %v619_v35 = vpop.f32.mrb[6].mxu1 }
 0x451   :  { %v620_v36 = vadd.f32 %v619_v35, %v8189_v34  ;;  %v543_v37 = vpop.f32.mrb[2].mxu0  ;;  %v6939_v38 = vpop.f32.mrb[7].mxu1 }
 0x452   :  { %v6934_v39 = vpop.f32.mrb[3].mxu0  ;;  %v544_v40 = vadd.f32 %v543_v37, %v8189_v34  ;;  %v6339_v37 = vld [vmem:[%s9120_s4 + $0x9] ss:$0 sm:$0xff] }
 0x453   :  { %v626_v41 = vsel %vm470_vm5, %v620_v36, -inf }
 0x454   :  { %627 = vmax.xlane.f32.xlu1 %v626_v41  ;;  %v623_v42 = vsel %vm470_vm5, %v544_v40, -inf }
 0x458   :  { %624 = vmax.xlane.f32.xlu1 %v623_v42 }
 0x4e1   :  { %v628_v43 = vpop.xlane.xlu1 %627 }
 0x4e2   :  { %v630_v44 = vsub.f32 %v620_v36, %v628_v43 }
 0x4e4   :  { %v633_v16 = vmul.f32 1.442695, %v630_v44 }
 0x4e5   :  { %v625_v45 = vpop.xlane.xlu1 %624 }
 0x4e6   :  { %7786 = vpow2.f32 %v633_v16  ;;  %v629_v46 = vsub.f32 %v544_v40, %v625_v45 }
 0x4e8   :  { %v631_v47 = vmul.f32 1.442695, %v629_v46 }
 0x4ea   :  { %7788 = vpow2.f32 %v631_v47 }
 0x4f0   :  { %v7787_v48 = vpop.eup %7786 }
 0x4f1   :  { %v638_v49 = vsel %vm470_vm5, %v7787_v48, 0.0 }
 0x4f2   :  { %639 = vadd.xlane.f32.xlu1 %v638_v49 }
 0x4f4   :  { %v7789_v50 = vpop.eup %7788 }
 0x4f5   :  { %v635_v51 = vsel %vm470_vm5, %v7789_v50, 0.0 }
 0x4f6   :  { %636 = vadd.xlane.f32.xlu1 %v635_v51 }
 0x57f   :  { %v640_v58 = vpop.xlane.xlu1 %639 }
 0x580   :  { %7790 = vrcp.f32 %v640_v58 }
 0x583   :  { %v637_v59 = vpop.xlane.xlu1 %636 }
 0x584   :  { %7792 = vrcp.f32 %v637_v59  ;;  %v6353_v59 = vld [vmem:[%s9119_s3 + $0x40] sm:$0xff] }
 0x585   :  { %v7528_v1 = vpack.c.bf16 %v6354_v61, %v6353_v59 }
 0x58a   :  { %v7791_v2 = vpop.eup %7790 }
 0x58b   :  { %v644_v3 = vmul.f32 %v7791_v2, %v7787_v48 }
 0x58d   :  { %6948 = vmatmul.mubr.msk.f32.vlgmr.msra.gmra.mrb[8].mxu1 %vm470_vm5, %v644_v3 }
 0x58e   :  { %v7793_v8 = vpop.eup %7792  ;;  %7515 = vmatpush3.bf16.msra.mxu1 %v7512_v54  ;;  %6969 = vmatprep.mubr.msk.f32.mxu1 %vm162_vm3, %v8141_v7 }
 0x58f   :  { %v643_v9 = vmul.f32 %v7793_v8, %v7789_v50  ;;  %7517 = vmatprep.subr.bf16.mxu1 %v7516_v4  ;;  %v6356_v8 = vld [vmem:[%s9119_s3 + $0x58] sm:$0xff] }
 0x590   :  { %v7532_v11 = vpack.c.bf16 %v6356_v8, %v6355_v6 }
 0x591   :  { %6943 = vmatmul.mubr.msk.f32.vlgmr.msra.gmra.mrb[4].mxu0 %vm470_vm5, %v643_v9 }
 0x592   :  { %7507 = vmatpush3.bf16.msra.mxu0 %v7504_v57  ;;  %7519 = vmatpush3.bf16.msra.mxu1 %v7516_v4 }
 0x593   :  { %6958 = vmatprep.mubr.msk.f32.mxu0 %vm162_vm3, %v8141_v7  ;;  %7509 = vmatprep.subr.bf16.mxu0 %v7508_v10 }
 0x594   :  { %6983 = vmatprep.subr.mxu1 %v7947_v18 }
 0x595   :  { %6970 = vmatmul.mubr.msk.f32.vlgmr.msra.gmra.mrb[10].mxu1 %vm162_vm3, %v8153_v12 }
 0x596   :  { %7511 = vmatpush3.bf16.msra.mxu0 %v7508_v10  ;;  %6985 = vmatprep.mubr.msk.f32.mxu1 %vm7948_vm4, %v7947_v18 }
 0x597   :  { %7521 = vmatprep.subr.bf16.mxu0 %v7520_v14 }
 0x599   :  { %6959 = vmatmul.mubr.msk.f32.vlgmr.msra.gmra.mrb[6].mxu0 %vm162_vm3, %v8153_v12 }
 0x59a   :  { %7523 = vmatpush3.bf16.msra.mxu0 %v7520_v14  ;;  %6980 = vmatprep.mubr.msk.f32.mxu0 %vm162_vm3, %v8141_v7  ;;  %v6370_v14 = vld [vmem:[%s9119_s3 + $0x148] sm:$0xff] }
 0x59b   :  { %7525 = vmatprep.subr.bf16.mxu0 %v7524_v19  ;;  %v7544_v15 = vpack.c.bf16 %v6370_v14, %v6369_v13  ;;  %v6383_v13 = vld [vmem:[%s9121_s5 + $0x10] sm:$0xff] }
 0x59e   :  { %7527 = vmatpush3.bf16.msra.mxu0 %v7524_v19  ;;  %v6372_v19 = vld [vmem:[%s9119_s3 + $0x158] sm:$0xff] }
 0x59f   :  { %6993 = vmatprep.subr.mxu0 %v7947_v18 }
 0x5a1   :  { %6981 = vmatmul.mubr.msk.f32.vlgmr.msra.gmra.mrb[8].mxu0 %vm162_vm3, %v8153_v12 }
 0x5a2   :  { %6995 = vmatprep.mubr.msk.f32.mxu0 %vm7948_vm4, %v7947_v18 }
 0x660   :  { %v8253_v20 = vpop.f32.mrb[8].mxu1 }
 0x661   :  { %v6949_v21 = vpop.f32.mrb[9].mxu1 }
 0x662   :  { %v7548_v21 = vpack.c.bf16 %v6372_v19, %v6371_v17  ;;  %v6388_v17 = vld [vmem:[%s9119_s3 + $0x70] sm:$0xff]  ;;  %v6389_v19 = vld [vmem:[%s9119_s3 + $0x78] sm:$0xff] }
 0x664   :  { %v8255_v22 = vpop.f32.mrb[4].mxu0 }
 0x665   :  { %v6944_v23 = vpop.f32.mrb[5].mxu0 }
 0x666   :  { %v6348_v23 = vld [vmem:[%s9121_s5 + $0x8] sm:$0xff] }
 0x668   :  { %v6971_v25 = vpop.f32.mrb[10].mxu1 }
 0x669   :  { %v959_v28 = vpop.f32.mrb[11].mxu1  ;;  %v965_v35 = vadd.f32 %v6971_v25, %v6331_v24 }
 0x66a   :  { %v960_v29 = vadd.f32 %v6331_v24, %v959_v28  ;;  %v791_v24 = vld [vmem:[%s9121_s5] sm:$0xff] }
 0x66b   :  { %v6361_v28 = vld [vmem:[%s9119_s3 + $0xc0] sm:$0xff] }
 0x66c   :  { %v6960_v31 = vpop.f32.mrb[6].mxu0  ;;  %6984 = vmatpush3.xpose.msk.msra.mxu1 %vm470_vm5, %v960_v29  ;;  %v6362_v29 = vld [vmem:[%s9119_s3 + $0xc8] sm:$0xff] }
 0x66d   :  { %v871_v32 = vpop.f32.mrb[7].mxu0  ;;  %6988 = vmatprep.subr.mxu1 %v7947_v18  ;;  %v877_v36 = vadd.f32 %v6960_v31, %v6323_v30  ;;  %v7536_v31 = vpack.c.bf16 %v6362_v29, %v6361_v28  ;;  %v6402_v29 = vld [vmem:[%s9119_s3 + $0x160] sm:$0xff] }
 0x66e   :  { %v872_v33 = vadd.f32 %v6323_v30, %v871_v32 }
 0x670   :  { %6986 = vmatmul.mubr.msk.f32.vlgmr.msra.gmra.mrb[12].mxu1 %vm470_vm5, %v872_v33 }
 0x671   :  { %6989 = vmatpush3.xpose.msk.msra.mxu1 %vm470_vm5, %v965_v35  ;;  %6990 = vmatprep.mubr.msk.f32.mxu1 %vm7948_vm4, %v7947_v18  ;;  %v6363_v35 = vld [vmem:[%s9119_s3 + $0xd0] sm:$0xff] }
 0x672   :  { %6998 = vmatprep.subr.mxu1 %v7947_v18 }
 0x674   :  { %v6982_v38 = vpop.f32.mrb[8].mxu0  ;;  %6991 = vmatmul.mubr.msk.f32.vlgmr.msra.gmra.mrb[14].mxu1 %vm470_vm5, %v877_v36  ;;  %v6364_v36 = vld [vmem:[%s9119_s3 + $0xd8] sm:$0xff] }
 0x675   :  { %v1053_v39 = vadd.f32 %v6982_v38, %v6339_v37  ;;  %v1047_v40 = vpop.f32.mrb[9].mxu0  ;;  %7000 = vmatprep.mubr.msk.f32.mxu1 %vm7948_vm4, %v7947_v18 }
 0x676   :  { %v1048_v41 = vadd.f32 %v6339_v37, %v1047_v40  ;;  %v7540_v37 = vpack.c.bf16 %v6364_v36, %v6363_v35  ;;  %v6394_v36 = vld [vmem:[%s9119_s3 + $0xe0] sm:$0xff] }
 0x677   :  { %6999 = vmatpush3.msra.mxu1 %v1053_v39 }
 0x678   :  { %6994 = vmatpush3.msra.mxu0 %v1048_v41  ;;  %7529 = vmatprep.subr.bf16.mxu1 %v7528_v1 }
 0x679   :  { %7003 = vmatprep.subr.mxu0 %v6348_v23 }
 0x743   :  { %v1128_v42 = vpop.f32.mrb[12].mxu1 }
 0x744   :  { %v1129_v43 = vadd.f32 %v1128_v42, %v8189_v34  ;;  %v6987_v44 = vpop.f32.mrb[13].mxu1  ;;  %v6358_v42 = vld [vmem:[%s9120_s4 + $0x2] ss:$0 sm:$0xff] }
 0x746   :  { %v1208_v16 = vsel %vm470_vm5, %v1129_v43, -inf }
 0x747   :  { %1209 = vmax.xlane.f32.xlu1 %v1208_v16  ;;  %v1204_v45 = vpop.f32.mrb[14].mxu1  ;;  %v6374_v16 = vld [vmem:[%s9120_s4 + $0xa] ss:$0 sm:$0xff] }
 0x748   :  { %v1205_v46 = vadd.f32 %v1204_v45, %v8189_v34  ;;  %v6992_v47 = vpop.f32.mrb[15].mxu1 }
 0x74a   :  { %v1211_v48 = vsel %vm470_vm5, %v1205_v46, -inf }
 0x74b   :  { %1212 = vmax.xlane.f32.xlu1 %v1211_v48 }
 0x7d4   :  { %v1210_v49 = vpop.xlane.xlu1 %1209 }
 0x7d5   :  { %v1214_v50 = vsub.f32 %v1129_v43, %v1210_v49 }
 0x7d7   :  { %v1216_v51 = vmul.f32 1.442695, %v1214_v50 }
 0x7d8   :  { %v1213_v52 = vpop.xlane.xlu1 %1212 }
 0x7d9   :  { %7794 = vpow2.f32 %v1216_v51  ;;  %v1215_v53 = vsub.f32 %v1205_v46, %v1213_v52 }
 0x7db   :  { %v1218_v54 = vmul.f32 1.442695, %v1215_v53 }
 0x7dd   :  { %7796 = vpow2.f32 %v1218_v54 }
 0x7e3   :  { %v7795_v55 = vpop.eup %7794 }
 0x7e4   :  { %v1220_v56 = vsel %vm470_vm5, %v7795_v55, 0.0 }
 0x7e5   :  { %1221 = vadd.xlane.f32.xlu1 %v1220_v56 }
 0x7e7   :  { %v7797_v57 = vpop.eup %7796 }
 0x7e8   :  { %v1223_v58 = vsel %vm470_vm5, %v7797_v57, 0.0 }
 0x7e9   :  { %1224 = vadd.xlane.f32.xlu0 %v1223_v58 }
 0x872   :  { %v1222_v2 = vpop.xlane.xlu1 %1221 }
 0x873   :  { %7798 = vrcp.f32 %v1222_v2 }
 0x876   :  { %v1225_v3 = vpop.xlane.xlu0 %1224 }
 0x877   :  { %7800 = vrcp.f32 %v1225_v3 }
 0x87d   :  { %v7799_v4 = vpop.eup %7798 }
 0x87e   :  { %v1228_v5 = vmul.f32 %v7799_v4, %v7795_v55 }
 0x880   :  { %6996 = vmatmul.mubr.msk.f32.vlgmr.msra.gmra.mrb[10].mxu0 %vm470_vm5, %v1228_v5 }
 0x881   :  { %v7801_v9 = vpop.eup %7800  ;;  %7004 = vmatpush3.msra.mxu0 %v6348_v23 }
 0x882   :  { %v1229_v10 = vmul.f32 %v7801_v9, %v7797_v57  ;;  %7008 = vmatprep.subr.mxu0 %v791_v24  ;;  %v6386_v9 = vld [vmem:[%s9119_s3 + $0x60] sm:$0xff] }
 0x884   :  { %7001 = vmatmul.mubr.msk.f32.vlgmr.msra.gmra.mrb[16].mxu1 %vm470_vm5, %v1229_v10  ;;  %v6387_v10 = vld [vmem:[%s9119_s3 + $0x68] sm:$0xff] }
 0x885   :  { %7531 = vmatpush3.bf16.msra.mxu1 %v7528_v1  ;;  %7021 = vmatprep.mubr.msk.f32.mxu1 %vm162_vm3, %v8141_v7 }
 0x886   :  { %7533 = vmatprep.subr.bf16.mxu1 %v7532_v11 }
 0x889   :  { %7535 = vmatpush3.bf16.msra.mxu1 %v7532_v11  ;;  %v7552_v11 = vpack.c.bf16 %v6387_v10, %v6386_v9 }
 0x88a   :  { %7545 = vmatprep.subr.bf16.mxu1 %v7544_v15 }
 0x88c   :  { %7022 = vmatmul.mubr.msk.f32.vlgmr.msra.gmra.mrb[18].mxu1 %vm162_vm3, %v8153_v12 }
 0x88d   :  { %7547 = vmatpush3.bf16.msra.mxu1 %v7544_v15  ;;  %7043 = vmatprep.mubr.msk.f32.mxu1 %vm162_vm3, %v8141_v7 }
 0x88e   :  { %7549 = vmatprep.subr.bf16.mxu1 %v7548_v21 }
 0x891   :  { %7551 = vmatpush3.bf16.msra.mxu1 %v7548_v21 }
 0x892   :  { %7051 = vmatprep.subr.mxu1 %v7947_v18 }
 0x894   :  { %7044 = vmatmul.mubr.msk.f32.vlgmr.msra.gmra.mrb[20].mxu1 %vm162_vm3, %v8153_v12 }
 0x895   :  { %7053 = vmatprep.mubr.msk.f32.mxu1 %vm7948_vm4, %v7947_v18 }
 0x953   :  { %v1299_v25 = vpop.f32.mrb[10].mxu0 }
 0x954   :  { %v6997_v30 = vpop.f32.mrb[11].mxu0  ;;  %7005 = vmatprep.mubr.msk.f32.mxu0 %vm470_vm5, %v1299_v25  ;;  %v7556_v25 = vpack.c.bf16 %v6389_v19, %v6388_v17 }
 0x955   :  { %v6403_v30 = vld [vmem:[%s9119_s3 + $0x168] sm:$0xff] }
 0x957   :  { %v1372_v32 = vpop.f32.mrb[16].mxu1 }
 0x958   :  { %v7002_v33 = vpop.f32.mrb[17].mxu1  ;;  %7006 = vmatmul.mubr.msk.f32.vlgmr.msra.gmra.mrb[12].mxu0 %vm470_vm5, %v1372_v32  ;;  %v6404_v32 = vld [vmem:[%s9119_s3 + $0x170] sm:$0xff] }
 0x959   :  { %7009 = vmatpush3.msra.mxu0 %v791_v24  ;;  %7010 = vmatprep.mubr.msk.f32.mxu0 %vm470_vm5, %v8255_v22  ;;  %v6405_v33 = vld [vmem:[%s9119_s3 + $0x178] sm:$0xff] }
 0x95a   :  { %7537 = vmatprep.subr.bf16.mxu0 %v7536_v31  ;;  %v7572_v35 = vpack.c.bf16 %v6405_v33, %v6404_v32  ;;  %v2882_v33 = vsub.s32 2, %v8124_v60 }
 0x95f   :  { %v7023_v38 = vpop.f32.mrb[18].mxu1 }
 0x960   :  { %v1619_v39 = vpop.f32.mrb[19].mxu1  ;;  %7011 = vmatmul.mubr.msk.f32.vlgmr.msra.gmra.mrb[12].mxu0 %vm470_vm5, %v8253_v20  ;;  %v6366_v20 = vld [vmem:[%s9120_s4 + $0x6] ss:$0 sm:$0xff]  ;;  %v1625_v46 = vadd.f32 %v7023_v38, %v6358_v42 }
 0x961   :  { %7539 = vmatpush3.bf16.msra.mxu0 %v7536_v31  ;;  %7032 = vmatprep.mubr.msk.f32.mxu0 %vm162_vm3, %v8141_v7  ;;  %v1620_v47 = vadd.f32 %v6358_v42, %v1619_v39  ;;  %v7568_v31 = vpack.c.bf16 %v6403_v30, %v6402_v29  ;;  %v6396_v39 = vld [vmem:[%s9119_s3 + $0xf0] sm:$0xff] }
 0x962   :  { %7541 = vmatprep.subr.bf16.mxu0 %v7540_v37 }
 0x965   :  { %7543 = vmatpush3.bf16.msra.mxu0 %v7540_v37  ;;  %v6395_v37 = vld [vmem:[%s9119_s3 + $0xe8] sm:$0xff] }
 0x966   :  { %7046 = vmatprep.subr.mxu0 %v7947_v18  ;;  %v7560_v38 = vpack.c.bf16 %v6395_v37, %v6394_v36 }
 0x967   :  { %v7045_v22 = vpop.f32.mrb[20].mxu1 }
 0x968   :  { %7033 = vmatmul.mubr.msk.f32.vlgmr.msra.gmra.mrb[14].mxu0 %vm162_vm3, %v8153_v12  ;;  %v1795_v40 = vpop.f32.mrb[21].mxu1  ;;  %v1801_v48 = vadd.f32 %v7045_v22, %v6374_v16  ;;  %v6397_v22 = vld [vmem:[%s9119_s3 + $0xf8] sm:$0xff] }
 0x969   :  { %7048 = vmatprep.mubr.msk.f32.mxu0 %vm7948_vm4, %v7947_v18  ;;  %v1796_v49 = vadd.f32 %v6374_v16, %v1795_v40  ;;  %v7564_v42 = vpack.c.bf16 %v6397_v22, %v6396_v39 }
 0xa3b   :  { %v7034_v41 = vpop.f32.mrb[14].mxu0 }
 0xa3c   :  { %v1713_v43 = vadd.f32 %v7034_v41, %v6366_v20  ;;  %v1707_v44 = vpop.f32.mrb[15].mxu0 }
 0xa3d   :  { %v1708_v45 = vadd.f32 %v6366_v20, %v1707_v44 }
 0xa3e   :  { %7052 = vmatpush3.xpose.msk.msra.mxu1 %vm470_vm5, %v1713_v43 }
 0xa3f   :  { %7047 = vmatpush3.xpose.msk.msra.mxu0 %vm470_vm5, %v1708_v45  ;;  %7061 = vmatprep.subr.mxu1 %v7947_v18  ;;  %v6407_v45 = vld [vmem:[%s9120_s4 + $0xb] ss:$0 sm:$0xff] }
 0xa40   :  { %7056 = vmatprep.subr.mxu0 %v7947_v18 }
 0xa41   :  { %7054 = vmatmul.mubr.msk.f32.vlgmr.msra.gmra.mrb[22].mxu1 %vm470_vm5, %v1625_v46 }
 0xa42   :  { %7049 = vmatmul.mubr.msk.f32.vlgmr.msra.gmra.mrb[16].mxu0 %vm470_vm5, %v1620_v47  ;;  %7062 = vmatpush3.msra.mxu1 %v1801_v48 }
 0xa43   :  { %7057 = vmatpush3.msra.mxu0 %v1796_v49  ;;  %7063 = vmatprep.mubr.msk.f32.mxu1 %vm7948_vm4, %v7947_v18  ;;  %v6399_v49 = vld [vmem:[%s9120_s4 + $0x7] ss:$0 sm:$0xff] }
 0xa44   :  { %7058 = vmatprep.mubr.msk.f32.mxu0 %vm7948_vm4, %v7947_v18  ;;  %7553 = vmatprep.subr.bf16.mxu1 %v7552_v11 }
 0xa45   :  { %7066 = vmatprep.subr.mxu0 %v6383_v13 }
 0xb14   :  { %v1952_v50 = vpop.f32.mrb[22].mxu1 }
 0xb15   :  { %v1953_v51 = vadd.f32 %v1952_v50, %v8189_v34  ;;  %v1876_v52 = vpop.f32.mrb[16].mxu0  ;;  %v7055_v53 = vpop.f32.mrb[23].mxu1 }
 0xb16   :  { %v1877_v54 = vadd.f32 %v1876_v52, %v8189_v34  ;;  %v7050_v55 = vpop.f32.mrb[17].mxu0 }
 0xb17   :  { %v1959_v56 = vsel %vm470_vm5, %v1953_v51, -inf }
 0xb18   :  { %1960 = vmax.xlane.f32.xlu0 %v1959_v56  ;;  %v1956_v57 = vsel %vm470_vm5, %v1877_v54, -inf }
 0xb19   :  { %1957 = vmax.xlane.f32.xlu1 %v1956_v57 }
 0xba5   :  { %v1961_v58 = vpop.xlane.xlu0 %1960 }
 0xba6   :  { %v1963_v59 = vsub.f32 %v1953_v51, %v1961_v58  ;;  %v1958_v61 = vpop.xlane.xlu1 %1957 }
 0xba7   :  { %v1962_v1 = vsub.f32 %v1877_v54, %v1958_v61 }
 0xba8   :  { %v1966_v2 = vmul.f32 1.442695, %v1963_v59 }
 0xba9   :  { %v1964_v3 = vmul.f32 1.442695, %v1962_v1 }
 0xbaa   :  { %7802 = vpow2.f32 %v1966_v2 }
 0xbab   :  { %7804 = vpow2.f32 %v1964_v3 }
 0xbb4   :  { %v7803_v4 = vpop.eup %7802 }
 0xbb5   :  { %v7805_v5 = vpop.eup %7804  ;;  %v1971_v6 = vsel %vm470_vm5, %v7803_v4, 0.0 }
 0xbb6   :  { %1972 = vadd.xlane.f32.xlu0 %v1971_v6  ;;  %v1968_v8 = vsel %vm470_vm5, %v7805_v5, 0.0 }
 0xbb7   :  { %1969 = vadd.xlane.f32.xlu1 %v1968_v8 }
 0xc43   :  { %v1973_v14 = vpop.xlane.xlu0 %1972 }
 0xc44   :  { %7806 = vrcp.f32 %v1973_v14  ;;  %v1970_v15 = vpop.xlane.xlu1 %1969 }
 0xc45   :  { %7808 = vrcp.f32 %v1970_v15 }
 0xc4e   :  { %v7807_v21 = vpop.eup %7806 }
 0xc4f   :  { %v7809_v23 = vpop.eup %7808  ;;  %v1977_v24 = vmul.f32 %v7807_v21, %v7803_v4 }
 0xc50   :  { %v1976_v28 = vmul.f32 %v7809_v23, %v7805_v5 }
 0xc51   :  { %7064 = vmatmul.mubr.msk.f32.vlgmr.msra.gmra.mrb[24].mxu1 %vm470_vm5, %v1977_v24 }
 0xc52   :  { %7555 = vmatpush3.bf16.msra.mxu1 %v7552_v11  ;;  %7059 = vmatmul.mubr.msk.f32.vlgmr.msra.gmra.mrb[18].mxu0 %vm470_vm5, %v1976_v28  ;;  %v6416_v28 = vld [vmem:[%s9121_s5 + $0x18] sm:$0xff] }
 0xc53   :  { %7079 = vmatprep.mubr.msk.f32.mxu1 %vm162_vm3, %v8141_v7  ;;  %7557 = vmatprep.subr.bf16.mxu1 %v7556_v25 }
 0xc54   :  { %7067 = vmatpush3.msra.mxu0 %v6383_v13 }
 0xc55   :  { %7561 = vmatprep.subr.bf16.mxu0 %v7560_v38 }
 0xc56   :  { %7559 = vmatpush3.bf16.msra.mxu1 %v7556_v25 }
 0xc57   :  { %7569 = vmatprep.subr.bf16.mxu1 %v7568_v31 }
 0xc59   :  { %7080 = vmatmul.mubr.msk.f32.vlgmr.msra.gmra.mrb[26].mxu1 %vm162_vm3, %v8153_v12 }
 0xc5a   :  { %7571 = vmatpush3.bf16.msra.mxu1 %v7568_v31  ;;  %7101 = vmatprep.mubr.msk.f32.mxu1 %vm162_vm3, %v8141_v7 }
 0xc5b   :  { %7573 = vmatprep.subr.bf16.mxu1 %v7572_v35 }
 0xc5e   :  { %7575 = vmatpush3.bf16.msra.mxu1 %v7572_v35  ;;  %v2883_v35 = vrot.slane %v8132_v63, %v2882_v33 }
 0xc5f   :  { %7114 = vmatprep.subr.mxu1 %v7947_v18 }
 0xc61   :  { %7102 = vmatmul.mubr.msk.f32.vlgmr.msra.gmra.mrb[28].mxu1 %vm162_vm3, %v8153_v12 }
 0xc62   :  { %7116 = vmatprep.mubr.msk.f32.mxu1 %vm7948_vm4, %v7947_v18 }
 0xd24   :  { %v2120_v40 = vpop.f32.mrb[24].mxu1 }
 0xd25   :  { %v2047_v20 = vpop.f32.mrb[18].mxu0  ;;  %v7065_v41 = vpop.f32.mrb[25].mxu1 }
 0xd26   :  { %v7060_v43 = vpop.f32.mrb[19].mxu0  ;;  %7068 = vmatprep.mubr.msk.f32.mxu0 %vm470_vm5, %v2047_v20 }
 0xd27   :  { %7069 = vmatmul.mubr.msk.f32.vlgmr.msra.gmra.mrb[12].mxu0 %vm470_vm5, %v2120_v40 }
 0xd28   :  { %7563 = vmatpush3.bf16.msra.mxu0 %v7560_v38  ;;  %7090 = vmatprep.mubr.msk.f32.mxu0 %vm162_vm3, %v8141_v7 }
 0xd29   :  { %7565 = vmatprep.subr.bf16.mxu0 %v7564_v42 }
 0xd2c   :  { %v7081_v44 = vpop.f32.mrb[26].mxu1  ;;  %7567 = vmatpush3.bf16.msra.mxu0 %v7564_v42 }
 0xd2d   :  { %v2288_v16 = vpop.f32.mrb[27].mxu1  ;;  %7104 = vmatprep.subr.mxu0 %v7947_v18 }
 0xd2f   :  { %7091 = vmatmul.mubr.msk.f32.vlgmr.msra.gmra.mrb[20].mxu0 %vm162_vm3, %v8153_v12  ;;  %v6391_v12 = vld [vmem:[%s9120_s4 + $0x3] ss:$0 sm:$0xff] }
 0xd30   :  { %7106 = vmatprep.mubr.msk.f32.mxu0 %vm7948_vm4, %v7947_v18  ;;  %v2289_v53 = vadd.f32 %v6391_v12, %v2288_v16  ;;  %v2294_v55 = vadd.f32 %v7081_v44, %v6391_v12  ;;  %v2927_v12 = vld [vmem:[%s9122_s6 + $0x18] sm:$0xff] }
 0xd34   :  { %v7103_v46 = vpop.f32.mrb[28].mxu1 }
 0xd35   :  { %v2470_v47 = vadd.f32 %v7103_v46, %v6407_v45  ;;  %v2464_v48 = vpop.f32.mrb[29].mxu1 }
 0xd36   :  { %v2465_v7 = vadd.f32 %v6407_v45, %v2464_v48 }
 0xd38   :  { %7115 = vmatpush3.msra.mxu1 %v2465_v7  ;;  %v2924_v7 = vld [vmem:[%s9122_s6] sm:$0xff] }
 0xe02   :  { %v7092_v50 = vpop.f32.mrb[20].mxu0 }
 0xe03   :  { %v2376_v51 = vpop.f32.mrb[21].mxu0  ;;  %v2382_v54 = vadd.f32 %v7092_v50, %v6399_v49 }
 0xe04   :  { %v2377_v52 = vadd.f32 %v6399_v49, %v2376_v51  ;;  %v2925_v49 = vld [vmem:[%s9122_s6 + $0x8] sm:$0xff]  ;;  %v2926_v51 = vld [vmem:[%s9122_s6 + $0x10] sm:$0xff] }
 0xe05   :  { %v7576_v50 = vpack.c.bf16 %v2925_v49, %v2924_v7 }
 0xe06   :  { %7105 = vmatpush3.xpose.msk.msra.mxu0 %vm470_vm5, %v2377_v52  ;;  %v7580_v52 = vpack.c.bf16 %v2927_v12, %v2926_v51 }
 0xe07   :  { %7109 = vmatprep.subr.mxu0 %v7947_v18  ;;  %7577 = vmatprep.subr.bf16.mxu1 %v7576_v50 }
 0xe09   :  { %7107 = vmatmul.mubr.msk.f32.vlgmr.msra.gmra.mrb[22].mxu0 %vm470_vm5, %v2289_v53  ;;  %v3034_v53 = vld [vmem:[%s9124_s8] sm:$0xff] }
 0xe0a   :  { %7110 = vmatpush3.xpose.msk.msra.mxu0 %vm470_vm5, %v2382_v54  ;;  %7111 = vmatprep.mubr.msk.f32.mxu0 %vm7948_vm4, %v7947_v18  ;;  %v3035_v54 = vld [vmem:[%s9124_s8 + $0x8] sm:$0xff] }
 0xe0b   :  { %7119 = vmatprep.subr.mxu0 %v7947_v18 }
 0xe0d   :  { %7112 = vmatmul.mubr.msk.f32.vlgmr.msra.gmra.mrb[24].mxu0 %vm470_vm5, %v2294_v55  ;;  %v7584_v55 = vpack.c.bf16 %v3035_v54, %v3034_v53 }
 0xe0e   :  { %7120 = vmatpush3.msra.mxu0 %v2470_v47  ;;  %7121 = vmatprep.mubr.msk.f32.mxu0 %vm7948_vm4, %v7947_v18 }
 0xe0f   :  { %7124 = vmatprep.subr.mxu0 %v6416_v28 }
 0xedc   :  { %v2545_v56 = vpop.f32.mrb[22].mxu0 }
 0xedd   :  { %v2546_v57 = vadd.f32 %v2545_v56, %v8189_v34  ;;  %v7108_v58 = vpop.f32.mrb[23].mxu0 }
 0xedf   :  { %v2625_v59 = vsel %vm470_vm5, %v2546_v57, -inf }
 0xee0   :  { %2626 = vmax.xlane.f32.xlu1 %v2625_v59  ;;  %v2621_v61 = vpop.f32.mrb[24].mxu0 }
 0xee1   :  { %v2622_v1 = vadd.f32 %v2621_v61, %v8189_v34  ;;  %v7113_v2 = vpop.f32.mrb[25].mxu0 }
 0xee2   :  { %v2914_v2 = vsub.s32 3, %v8124_v60 }
 0xee3   :  { %v2628_v3 = vsel %vm470_vm5, %v2622_v1, -inf }
 0xee4   :  { %2629 = vmax.xlane.f32.xlu0 %v2628_v3  ;;  %v2920_v3 = vsub.s32 4, %v8124_v60 }
 0xf6d   :  { %v2627_v4 = vpop.xlane.xlu1 %2626 }
 0xf6e   :  { %v2631_v5 = vsub.f32 %v2546_v57, %v2627_v4  ;;  %v2915_v4 = vrot.slane %v8132_v63, %v2914_v2 }
 0xf70   :  { %v2633_v6 = vmul.f32 1.442695, %v2631_v5 }
 0xf71   :  { %v2630_v8 = vpop.xlane.xlu0 %2629 }
 0xf72   :  { %7810 = vpow2.f32 %v2633_v6  ;;  %v2632_v9 = vsub.f32 %v2622_v1, %v2630_v8 }
 0xf74   :  { %v2635_v10 = vmul.f32 1.442695, %v2632_v9 }
 0xf76   :  { %7812 = vpow2.f32 %v2635_v10  ;;  %v2921_v10 = vrot.slane %v8132_v63, %v2920_v3  ;;  %v3038_v63 = vld [vmem:[%s9124_s8 + $0x20] sm:$0xff] }
 0xf7c   :  { %v7811_v11 = vpop.eup %7810 }
 0xf7d   :  { %v2637_v13 = vsel %vm470_vm5, %v7811_v11, 0.0 }
 0xf7e   :  { %2638 = vadd.xlane.f32.xlu1 %v2637_v13 }
 0xf80   :  { %v7813_v14 = vpop.eup %7812 }
 0xf81   :  { %v2640_v15 = vsel %vm470_vm5, %v7813_v14, 0.0 }
 0xf82   :  { %2641 = vadd.xlane.f32.xlu0 %v2640_v15 }
0x100b   :  { %v2639_v17 = vpop.xlane.xlu1 %2638 }
0x100c   :  { %7814 = vrcp.f32 %v2639_v17  ;;  %v3036_v17 = vld [vmem:[%s9124_s8 + $0x10] sm:$0xff] }
0x100f   :  { %v2642_v19 = vpop.xlane.xlu0 %2641 }
0x1010   :  { %7816 = vrcp.f32 %v2642_v19  ;;  %v3037_v19 = vld [vmem:[%s9124_s8 + $0x18] sm:$0xff] }
0x1016   :  { %v7815_v21 = vpop.eup %7814 }
0x1017   :  { %v2645_v23 = vmul.f32 %v7815_v21, %v7811_v11  ;;  %v7588_v21 = vpack.c.bf16 %v3037_v19, %v3036_v17 }
0x1019   :  { %7117 = vmatmul.mubr.msk.f32.vlgmr.msra.gmra.mrb[30].mxu1 %vm470_vm5, %v2645_v23  ;;  %v3039_v23 = vld [vmem:[%s9124_s8 + $0x28] sm:$0xff] }
0x101a   :  { %v7817_v24 = vpop.eup %7816  ;;  %7579 = vmatpush3.bf16.msra.mxu1 %v7576_v50 }
0x101b   :  { %v2646_v25 = vmul.f32 %v7817_v24, %v7813_v14  ;;  %7581 = vmatprep.subr.bf16.mxu1 %v7580_v52  ;;  %v7592_v24 = vpack.c.bf16 %v3039_v23, %v3038_v63 }
0x101d   :  { %7122 = vmatmul.mubr.msk.f32.vlgmr.msra.gmra.mrb[26].mxu0 %vm470_vm5, %v2646_v25  ;;  %v3040_v25 = vld [vmem:[%s9124_s8 + $0x30] sm:$0xff] }
0x101e   :  { %7125 = vmatpush3.msra.mxu0 %v6416_v28  ;;  %7583 = vmatpush3.bf16.msra.mxu1 %v7580_v52  ;;  %v3041_v28 = vld [vmem:[%s9124_s8 + $0x38] sm:$0xff] }
0x101f   :  { %7585 = vmatprep.subr.bf16.mxu0 %v7584_v55 }
0x10ec   :  { %v2716_v29 = vpop.f32.mrb[30].mxu1 }
0x10ed   :  { %v7118_v30 = vpop.f32.mrb[31].mxu1  ;;  %7126 = vmatprep.mubr.msk.f32.mxu0 %vm470_vm5, %v2716_v29  ;;  %v7596_v29 = vpack.c.bf16 %v3041_v28, %v3040_v25 }
0x10ee   :  { %v3042_v30 = vld [vmem:[%s9124_s8 + $0x40] sm:$0xff] }
0x10f0   :  { %v2789_v31 = vpop.f32.mrb[26].mxu0 }
0x10f1   :  { %v7123_v32 = vpop.f32.mrb[27].mxu0  ;;  %7127 = vmatmul.mubr.msk.f32.vlgmr.msra.gmra.mrb[12].mxu0 %vm470_vm5, %v2789_v31  ;;  %v3043_v31 = vld [vmem:[%s9124_s8 + $0x48] sm:$0xff] }
0x10f2   :  { %7587 = vmatpush3.bf16.msra.mxu0 %v7584_v55  ;;  %v3044_v32 = vld [vmem:[%s9124_s8 + $0x50] sm:$0xff] }
0x10f3   :  { %7589 = vmatprep.subr.bf16.mxu0 %v7588_v21 }
0x10f6   :  { %7591 = vmatpush3.bf16.msra.mxu0 %v7588_v21 }
0x10f7   :  { %7593 = vmatprep.subr.bf16.mxu0 %v7592_v24 }
0x10fa   :  { %7595 = vmatpush3.bf16.msra.mxu0 %v7592_v24 }
0x10fb   :  { %7597 = vmatprep.subr.bf16.mxu0 %v7596_v29 }
0x10fe   :  { %7599 = vmatpush3.bf16.msra.mxu0 %v7596_v29 }
0x11c4   :  { %v7128_v36 = vpop.f32.mrb[12].mxu0 }
0x11c5   :  { %v2879_v37 = vadd.f32 %v7128_v36, %v8082_v27  ;;  %v2867_v38 = vpop.f32.mrb[13].mxu0  ;;  %v3045_v36 = vld [vmem:[%s9124_s8 + $0x58] sm:$0xff] }
0x11c6   :  { %v2878_v39 = vadd.f32 %v2867_v38, %v8080_v26  ;;  %v3046_v38 = vld [vmem:[%s9124_s8 + $0x60] sm:$0xff] }
0x11c7   :  { %v8474_v22 = vadd.f32 %v2883_v35, %v2879_v37  ;;  %v7604_v37 = vpack.c.bf16 %v3045_v36, %v3044_v32  ;;  %v6426_v36 = vld [vmem:[%s9119_s3 + $0x198] sm:$0xff] }
0x11c8   :  { %v8476_v40 = vadd.f32 %v2883_v35, %v2878_v39  ;;  %v7600_v35 = vpack.c.bf16 %v3043_v31, %v3042_v30  ;;  %v3047_v39 = vld [vmem:[%s9124_s8 + $0x68] sm:$0xff]  ;;  %v6423_v30 = vld [vmem:[%s9119_s3 + $0x180] sm:$0xff] }
0x11c9   :  { %v2889_v20 = vsel %vm162_vm3, %v8474_v22, 0.0  ;;  %v6424_v31 = vld [vmem:[%s9119_s3 + $0x188] sm:$0xff] }
0x11ca   :  { %2890 = vadd.xlane.f32.xlu0 %v2889_v20  ;;  %v2886_v41 = vsel %vm162_vm3, %v8476_v40, 0.0  ;;  %7601 = vmatprep.subr.bf16.mxu0 %v7600_v35  ;;  %v7608_v20 = vpack.c.bf16 %v3047_v39, %v3046_v38  ;;  %v7616_v32 = vpack.c.bf16 %v6424_v31, %v6423_v30  ;;  %v6431_v38 = vld [vmem:[%s9119_s3 + $0x200] sm:$0xff]  ;;  %v6432_v39 = vld [vmem:[%s9119_s3 + $0x208] sm:$0xff] }
0x11cb   :  { %2887 = vadd.xlane.f32.xlu1 %v2886_v41  ;;  %7603 = vmatpush3.bf16.msra.mxu0 %v7600_v35  ;;  %v3048_v41 = vld [vmem:[%s9124_s8 + $0x70] sm:$0xff] }
0x11cc   :  { %7605 = vmatprep.subr.bf16.mxu0 %v7604_v37  ;;  %7617 = vmatprep.subr.bf16.mxu1 %v7616_v32  ;;  %v6425_v35 = vld [vmem:[%s9119_s3 + $0x190] sm:$0xff] }
0x11cf   :  { %7607 = vmatpush3.bf16.msra.mxu0 %v7604_v37  ;;  %v7620_v37 = vpack.c.bf16 %v6426_v36, %v6425_v35 }
0x11d0   :  { %7609 = vmatprep.subr.bf16.mxu0 %v7608_v20 }
0x11d3   :  { %7611 = vmatpush3.bf16.msra.mxu0 %v7608_v20  ;;  %v7624_v20 = vpack.c.bf16 %v6432_v39, %v6431_v38 }
0x1257   :  { %v2891_v42 = vpop.xlane.xlu0 %2890 }
0x1258   :  { %v2893_v43 = vmul.f32 0.03125, %v2891_v42  ;;  %v2888_v44 = vpop.xlane.xlu1 %2887  ;;  %v3049_v42 = vld [vmem:[%s9124_s8 + $0x78] sm:$0xff] }
0x1259   :  { %v2892_v16 = vmul.f32 0.03125, %v2888_v44  ;;  %v6419_v44 = vld [vmem:[%s9123_s7] ss:$0 sm:$0xff] }
0x125a   :  { %v2895_v27 = vsub.f32 %v8474_v22, %v2893_v43  ;;  %v7612_v43 = vpack.c.bf16 %v3049_v42, %v3048_v41 }
0x125b   :  { %v2894_v26 = vsub.f32 %v8476_v40, %v2892_v16 }
0x125c   :  { %v2897_v45 = vmul.f32 %v2895_v27, %v2895_v27  ;;  %7613 = vmatprep.subr.bf16.mxu0 %v7612_v43 }
0x125d   :  { %v2896_v46 = vmul.f32 %v2894_v26, %v2894_v26  ;;  %7615 = vmatpush3.bf16.msra.mxu0 %v7612_v43 }
0x125e   :  { %v2901_v47 = vsel %vm162_vm3, %v2897_v45, 0.0  ;;  %7218 = vmatprep.subr.mxu0 %v7947_v18 }
0x125f   :  { %2902 = vadd.xlane.f32.xlu0 %v2901_v47  ;;  %v2898_v48 = vsel %vm162_vm3, %v2896_v46, 0.0 }
0x1260   :  { %2899 = vadd.xlane.f32.xlu1 %v2898_v48 }
0x12ec   :  { %v2903_v56 = vpop.xlane.xlu0 %2902 }
0x12ed   :  { %v2905_v57 = vmul.f32 0.03125, %v2903_v56  ;;  %v2900_v58 = vpop.xlane.xlu1 %2899 }
0x12ee   :  { %v2904_v59 = vmul.f32 0.03125, %v2900_v58 }
0x12ef   :  { %v2907_v61 = vadd.f32 1e-05, %v2905_v57 }
0x12f0   :  { %v2906_v1 = vadd.f32 1e-05, %v2904_v59 }
0x12f1   :  { %7818 = vrsqrt.f32 %v2907_v61 }
0x12f2   :  { %7820 = vrsqrt.f32 %v2906_v1 }
0x12fb   :  { %v7819_v5 = vpop.eup %7818 }
0x12fc   :  { %v7821_v6 = vpop.eup %7820  ;;  %v2911_v8 = vmul.f32 %v7819_v5, %v2895_v27  ;;  %v7874_v5 = vld [vmem:[%s9125_s9] sm:$0x3f] }
0x12fd   :  { %v2910_v9 = vmul.f32 %v7821_v6, %v2894_v26 }
0x12fe   :  { %v2917_v11 = vmul.f32 %v2915_v4, %v2911_v8 }
0x12ff   :  { %v2916_v13 = vmul.f32 %v2915_v4, %v2910_v9  ;;  %v3052_v4 = vsub.s32 5, %v8124_v60 }
0x1300   :  { %v2923_v15 = vadd.f32 %v2921_v10, %v2917_v11 }
0x1301   :  { %v2922_v14 = vadd.f32 %v2921_v10, %v2916_v13  ;;  %v3053_v6 = vrot.slane %v7874_v5, %v3052_v4 }
0x1303   :  { %7137 = vmatprep.mubr.msk.f32.mxu1 %vm162_vm3, %v2922_v14 }
0x1304   :  { %7138 = vmatmul.mubr.msk.f32.vlgmr.msra.gmra.mrb[32].mxu1 %vm162_vm3, %v2923_v15 }
0x1305   :  { %7619 = vmatpush3.bf16.msra.mxu1 %v7616_v32 }
0x1306   :  { %7621 = vmatprep.subr.bf16.mxu1 %v7620_v37 }
0x1309   :  { %7623 = vmatpush3.bf16.msra.mxu1 %v7620_v37 }
0x130a   :  { %7625 = vmatprep.subr.bf16.mxu1 %v7624_v20 }
0x13d7   :  { %v7139_v16 = vpop.f32.mrb[32].mxu1 }
0x13d8   :  { %v3013_v27 = vadd.f32 %v7139_v16, %v6419_v44  ;;  %v3007_v26 = vpop.f32.mrb[33].mxu1 }
0x13d9   :  { %v3008_v45 = vadd.f32 %v6419_v44, %v3007_v26  ;;  %v8607_v26 = vld [vmem:[%s9125_s9 + $0x8] sm:$0x3f] }
0x13da   :  { %v3019_v46 = vmul.f32 0.044715, %v3013_v27  ;;  %v3017_v59 = vmul.f32 0.5, %v3013_v27 }
0x13db   :  { %v3018_v47 = vmul.f32 0.044715, %v3008_v45  ;;  %v3016_v57 = vmul.f32 0.5, %v3008_v45 }
0x13dc   :  { %v3021_v48 = vmul.f32 %v3019_v46, %v3013_v27 }
0x13dd   :  { %v3020_v7 = vmul.f32 %v3018_v47, %v3008_v45 }
0x13de   :  { %v3023_v49 = vmul.f32 %v3021_v48, %v3013_v27 }
0x13df   :  { %v3022_v50 = vmul.f32 %v3020_v7, %v3008_v45  ;;  %v3170_v7 = vrot.slane %v8607_v26, %v8135_v0 }
0x13e0   :  { %v3025_v51 = vadd.f32 %v3023_v49, %v3013_v27 }
0x13e1   :  { %v3024_v12 = vadd.f32 %v3022_v50, %v3008_v45  ;;  %v3164_v45 = vrot.slane %v8607_v26, %v8127_v62 }
0x13e2   :  { %v3027_v52 = vmul.f32 0.7978846, %v3025_v51 }
0x13e3   :  { %v3026_v53 = vmul.f32 0.7978846, %v3024_v12  ;;  %v6433_v12 = vld [vmem:[%s9119_s3 + $0x210] sm:$0xff] }
0x13e4   :  { %7822 = vtanh.f32 %v3027_v52  ;;  %v6434_v52 = vld [vmem:[%s9119_s3 + $0x218] sm:$0xff] }
0x13e5   :  { %7824 = vtanh.f32 %v3026_v53 }
0x13ee   :  { %v7823_v54 = vpop.eup %7822 }
0x13ef   :  { %v7825_v55 = vpop.eup %7824  ;;  %v3031_v56 = vadd.f32 1.0, %v7823_v54 }
0x13f0   :  { %v3030_v58 = vadd.f32 1.0, %v7825_v55  ;;  %v7628_v55 = vpack.c.bf16 %v6434_v52, %v6433_v12  ;;  %v6456_v12 = vld [vmem:[%s9119_s3 + $0x1b0] sm:$0xff]  ;;  %v6457_v52 = vld [vmem:[%s9119_s3 + $0x1b8] sm:$0xff] }
0x13f1   :  { %v3033_v1 = vmul.f32 %v3031_v56, %v3017_v59  ;;  %v6439_v56 = vld [vmem:[%s9119_s3 + $0x280] sm:$0xff]  ;;  %v6441_v59 = vld [vmem:[%s9119_s3 + $0x290] sm:$0xff] }
0x13f2   :  { %v3032_v61 = vmul.f32 %v3030_v58, %v3016_v57  ;;  %v6440_v57 = vld [vmem:[%s9119_s3 + $0x288] sm:$0xff] }
0x13f3   :  { %v7632_v58 = vpack.c.bf16 %v6440_v57, %v6439_v56  ;;  %v7644_v57 = vpack.c.bf16 %v6457_v52, %v6456_v12 }
0x13f4   :  { %7172 = vmatprep.mubr.f32.mxu0 %v3032_v61  ;;  %v6442_v61 = vld [vmem:[%s9119_s3 + $0x298] sm:$0xff] }
0x13f5   :  { %7173 = vmatmul.mubr.f32.vlgmr.msra.gmra.mrb[28].mxu0 %v3033_v1  ;;  %v7636_v1 = vpack.c.bf16 %v6442_v61, %v6441_v59  ;;  %v6465_v59 = vld [vmem:[%s9119_s3 + $0x238] sm:$0xff]  ;;  %v6470_v61 = vld [vmem:[%s9119_s3 + $0x2a0] sm:$0xff] }
0x13f6   :  { %7220 = vmatprep.mubr.msk.f32.mxu0 %vm7948_vm4, %v7947_v18 }
0x14c8   :  { %v7174_v8 = vpop.f32.mrb[28].mxu0 }
0x14c9   :  { %v3126_v9 = vadd.f32 %v7174_v8, %v3053_v6  ;;  %v3120_v10 = vpop.f32.mrb[29].mxu0  ;;  %v6436_v8 = vld [vmem:[%s9120_s4 + $0x10] ss:$0 sm:$0xff] }
0x14ca   :  { %v3121_v11 = vadd.f32 %v3120_v10, %v3053_v6 }
0x14cb   :  { %v8569_v13 = vadd.f32 %v3126_v9, %v8474_v22 }
0x14cc   :  { %v8572_v14 = vadd.f32 %v3121_v11, %v8476_v40  ;;  %v6428_v11 = vld [vmem:[%s9120_s4 + $0xc] ss:$0 sm:$0xff] }
0x14cd   :  { %3132 = vst.msk [vmem:[#allocation6 + $0x8] sm:$0xff] %vm162_vm3, %v8569_v13  ;;  %v3138_v15 = vsel %vm162_vm3, %v8569_v13, 0.0 }
0x14ce   :  { %3131 = vst.msk [vmem:[#allocation6] sm:$0xff] %vm162_vm3, %v8572_v14  ;;  %3139 = vadd.xlane.f32.xlu0 %v3138_v15  ;;  %v3135_v17 = vsel %vm162_vm3, %v8572_v14, 0.0 }
0x14cf   :  { %3136 = vadd.xlane.f32.xlu1 %v3135_v17 }
0x155b   :  { %v3140_v19 = vpop.xlane.xlu0 %3139 }
0x155c   :  { %v3142_v22 = vmul.f32 0.03125, %v3140_v19  ;;  %v3137_v21 = vpop.xlane.xlu1 %3136 }
0x155d   :  { %v3141_v63 = vmul.f32 0.03125, %v3137_v21 }
0x155e   :  { %v3144_v40 = vsub.f32 %v8569_v13, %v3142_v22  ;;  %v6444_v22 = vld [vmem:[%s9120_s4 + $0x14] ss:$0 sm:$0xff] }
0x155f   :  { %v3143_v23 = vsub.f32 %v8572_v14, %v3141_v63 }
0x1560   :  { %v3146_v24 = vmul.f32 %v3144_v40, %v3144_v40 }
0x1561   :  { %v3145_v25 = vmul.f32 %v3143_v23, %v3143_v23 }
0x1562   :  { %v3150_v28 = vsel %vm162_vm3, %v3146_v24, 0.0 }
0x1563   :  { %3151 = vadd.xlane.f32.xlu0 %v3150_v28  ;;  %v3147_v29 = vsel %vm162_vm3, %v3145_v25, 0.0 }
0x1564   :  { %3148 = vadd.xlane.f32.xlu1 %v3147_v29 }
0x15f0   :  { %v3152_v41 = vpop.xlane.xlu0 %3151 }
0x15f1   :  { %v3154_v42 = vmul.f32 0.03125, %v3152_v41  ;;  %v3149_v43 = vpop.xlane.xlu1 %3148 }
0x15f2   :  { %v3153_v44 = vmul.f32 0.03125, %v3149_v43 }
0x15f3   :  { %v3156_v16 = vadd.f32 1e-05, %v3154_v42 }
0x15f4   :  { %v3155_v27 = vadd.f32 1e-05, %v3153_v44 }
0x15f5   :  { %7826 = vrsqrt.f32 %v3156_v16 }
0x15f6   :  { %7828 = vrsqrt.f32 %v3155_v27 }
0x15ff   :  { %v7827_v46 = vpop.eup %7826 }
0x1600   :  { %v7829_v47 = vpop.eup %7828  ;;  %v3160_v48 = vmul.f32 %v7827_v46, %v3144_v40  ;;  %v6455_v46 = vld [vmem:[%s9119_s3 + $0x1a8] sm:$0xff] }
0x1601   :  { %v3159_v49 = vmul.f32 %v7829_v47, %v3143_v23 }
0x1602   :  { %v3166_v50 = vmul.f32 %v3164_v45, %v3160_v48  ;;  %v6462_v48 = vld [vmem:[%s9119_s3 + $0x220] sm:$0xff] }
0x1603   :  { %v3165_v51 = vmul.f32 %v3164_v45, %v3159_v49  ;;  %v6454_v45 = vld [vmem:[%s9119_s3 + $0x1a0] sm:$0xff] }
0x1604   :  { %v8621_v54 = vadd.f32 %v3170_v7, %v3166_v50  ;;  %v7640_v47 = vpack.c.bf16 %v6455_v46, %v6454_v45 }
0x1605   :  { %v8619_v53 = vadd.f32 %v3170_v7, %v3165_v51  ;;  %v6463_v7 = vld [vmem:[%s9119_s3 + $0x228] sm:$0xff] }
0x1606   :  { %v7648_v49 = vpack.c.bf16 %v6463_v7, %v6462_v48 }
0x1607   :  { %7183 = vmatprep.mubr.msk.f32.mxu1 %vm162_vm3, %v8619_v53 }
0x1608   :  { %7184 = vmatmul.mubr.msk.f32.vlgmr.msra.gmra.mrb[34].mxu1 %vm162_vm3, %v8621_v54 }
0x1609   :  { %7627 = vmatpush3.bf16.msra.mxu1 %v7624_v20  ;;  %7194 = vmatprep.mubr.msk.f32.mxu1 %vm162_vm3, %v8619_v53 }
0x160a   :  { %7629 = vmatprep.subr.bf16.mxu1 %v7628_v55 }
0x160d   :  { %7631 = vmatpush3.bf16.msra.mxu1 %v7628_v55 }
0x160e   :  { %7633 = vmatprep.subr.bf16.mxu1 %v7632_v58 }
0x1610   :  { %7195 = vmatmul.mubr.msk.f32.vlgmr.msra.gmra.mrb[36].mxu1 %vm162_vm3, %v8621_v54 }
0x1611   :  { %7635 = vmatpush3.bf16.msra.mxu1 %v7632_v58  ;;  %7205 = vmatprep.mubr.msk.f32.mxu1 %vm162_vm3, %v8619_v53  ;;  %v6464_v58 = vld [vmem:[%s9119_s3 + $0x230] sm:$0xff] }
0x1612   :  { %7637 = vmatprep.subr.bf16.mxu1 %v7636_v1 }
0x1615   :  { %7639 = vmatpush3.bf16.msra.mxu1 %v7636_v1  ;;  %v6471_v1 = vld [vmem:[%s9119_s3 + $0x2a8] sm:$0xff] }
0x1616   :  { %7208 = vmatprep.subr.mxu1 %v7947_v18 }
0x1618   :  { %7206 = vmatmul.mubr.msk.f32.vlgmr.msra.gmra.mrb[38].mxu1 %vm162_vm3, %v8621_v54 }
0x1619   :  { %7210 = vmatprep.mubr.msk.f32.mxu1 %vm7948_vm4, %v7947_v18 }
0x16db   :  { %v7185_v5 = vpop.f32.mrb[34].mxu1 }
0x16dc   :  { %v3258_v6 = vpop.f32.mrb[35].mxu1  ;;  %v3264_v63 = vadd.f32 %v7185_v5, %v6428_v11 }
0x16dd   :  { %v3259_v17 = vadd.f32 %v6428_v11, %v3258_v6  ;;  %v6473_v11 = vld [vmem:[%s9119_s3 + $0x2b8] sm:$0xff] }
0x16e3   :  { %v7196_v9 = vpop.f32.mrb[36].mxu1 }
0x16e4   :  { %v3346_v10 = vpop.f32.mrb[37].mxu1  ;;  %v3352_v19 = vadd.f32 %v7196_v9, %v6436_v8  ;;  %v7656_v9 = vpack.c.bf16 %v6471_v1, %v6470_v61 }
0x16e5   :  { %v3347_v15 = vadd.f32 %v6436_v8, %v3346_v10  ;;  %v7652_v8 = vpack.c.bf16 %v6465_v59, %v6464_v58  ;;  %v6472_v10 = vld [vmem:[%s9119_s3 + $0x2b0] sm:$0xff] }
0x16e7   :  { %7209 = vmatpush3.xpose.msk.msra.mxu1 %vm470_vm5, %v3347_v15  ;;  %v7660_v15 = vpack.c.bf16 %v6473_v11, %v6472_v10 }
0x16e8   :  { %7213 = vmatprep.subr.mxu1 %v7947_v18 }
0x16ea   :  { %7211 = vmatmul.mubr.msk.f32.vlgmr.msra.gmra.mrb[40].mxu1 %vm470_vm5, %v3259_v17 }
0x16eb   :  { %v7207_v21 = vpop.f32.mrb[38].mxu1  ;;  %7214 = vmatpush3.xpose.msk.msra.mxu1 %vm470_vm5, %v3352_v19  ;;  %7215 = vmatprep.mubr.msk.f32.mxu1 %vm7948_vm4, %v7947_v18 }
0x16ec   :  { %v3440_v40 = vadd.f32 %v7207_v21, %v6444_v22  ;;  %v3434_v23 = vpop.f32.mrb[39].mxu1  ;;  %7223 = vmatprep.subr.mxu1 %v7947_v18 }
0x16ed   :  { %v3435_v24 = vadd.f32 %v6444_v22, %v3434_v23  ;;  %v6467_v23 = vld [vmem:[%s9120_s4 + $0x11] ss:$0 sm:$0xff] }
0x16ee   :  { %7216 = vmatmul.mubr.msk.f32.vlgmr.msra.gmra.mrb[42].mxu1 %vm470_vm5, %v3264_v63 }
0x16ef   :  { %7219 = vmatpush3.msra.mxu0 %v3435_v24  ;;  %7224 = vmatpush3.msra.mxu1 %v3440_v40 }
0x16f0   :  { %7225 = vmatprep.mubr.msk.f32.mxu1 %vm7948_vm4, %v7947_v18  ;;  %7641 = vmatprep.subr.bf16.mxu0 %v7640_v47 }
0x16f1   :  { %7649 = vmatprep.subr.bf16.mxu1 %v7648_v49 }
0x17bd   :  { %v3515_v25 = vpop.f32.mrb[40].mxu1 }
0x17be   :  { %v3516_v28 = vadd.f32 %v3515_v25, %v8189_v34  ;;  %v7212_v29 = vpop.f32.mrb[41].mxu1 }
0x17c0   :  { %v3595_v30 = vsel %vm470_vm5, %v3516_v28, -inf }
0x17c1   :  { %3596 = vmax.xlane.f32.xlu0 %v3595_v30  ;;  %v3591_v31 = vpop.f32.mrb[42].mxu1  ;;  %v6475_v30 = vld [vmem:[%s9120_s4 + $0x15] ss:$0 sm:$0xff] }
0x17c2   :  { %v3592_v32 = vadd.f32 %v3591_v31, %v8189_v34  ;;  %v7217_v35 = vpop.f32.mrb[43].mxu1 }
0x17c4   :  { %v3598_v36 = vsel %vm470_vm5, %v3592_v32, -inf }
0x17c5   :  { %3599 = vmax.xlane.f32.xlu1 %v3598_v36 }
0x184e   :  { %v3597_v37 = vpop.xlane.xlu0 %3596 }
0x184f   :  { %v3601_v38 = vsub.f32 %v3516_v28, %v3597_v37  ;;  %v6459_v28 = vld [vmem:[%s9120_s4 + $0xd] ss:$0 sm:$0xff] }
0x1851   :  { %v3603_v39 = vmul.f32 1.442695, %v3601_v38 }
0x1852   :  { %v3600_v20 = vpop.xlane.xlu1 %3599 }
0x1853   :  { %7830 = vpow2.f32 %v3603_v39  ;;  %v3602_v41 = vsub.f32 %v3592_v32, %v3600_v20 }
0x1855   :  { %v3605_v42 = vmul.f32 1.442695, %v3602_v41 }
0x1857   :  { %7832 = vpow2.f32 %v3605_v42 }
0x185d   :  { %v7831_v43 = vpop.eup %7830 }
0x185e   :  { %v3607_v44 = vsel %vm470_vm5, %v7831_v43, 0.0 }
0x185f   :  { %3608 = vadd.xlane.f32.xlu0 %v3607_v44 }
0x1861   :  { %v7833_v16 = vpop.eup %7832 }
0x1862   :  { %v3610_v27 = vsel %vm470_vm5, %v7833_v16, 0.0 }
0x1863   :  { %3611 = vadd.xlane.f32.xlu1 %v3610_v27 }
0x18ec   :  { %v3609_v50 = vpop.xlane.xlu0 %3608 }
0x18ed   :  { %7834 = vrcp.f32 %v3609_v50 }
0x18f0   :  { %v3612_v51 = vpop.xlane.xlu1 %3611 }
0x18f1   :  { %7836 = vrcp.f32 %v3612_v51 }
0x18f7   :  { %v7835_v55 = vpop.eup %7834 }
0x18f8   :  { %v3615_v56 = vmul.f32 %v7835_v55, %v7831_v43 }
0x18fa   :  { %7221 = vmatmul.mubr.msk.f32.vlgmr.msra.gmra.mrb[30].mxu0 %vm470_vm5, %v3615_v56  ;;  %v6489_v56 = vld [vmem:[%s9119_s3 + $0x1c0] sm:$0xff] }
0x18fb   :  { %v7837_v5 = vpop.eup %7836  ;;  %7643 = vmatpush3.bf16.msra.mxu0 %v7640_v47  ;;  %7236 = vmatprep.mubr.msk.f32.mxu0 %vm162_vm3, %v8619_v53 }
0x18fc   :  { %v3616_v6 = vmul.f32 %v7837_v5, %v7833_v16  ;;  %7645 = vmatprep.subr.bf16.mxu0 %v7644_v57 }
0x18fe   :  { %7226 = vmatmul.mubr.msk.f32.vlgmr.msra.gmra.mrb[44].mxu1 %vm470_vm5, %v3616_v6  ;;  %v6491_v6 = vld [vmem:[%s9119_s3 + $0x1d0] sm:$0xff] }
0x18ff   :  { %7647 = vmatpush3.bf16.msra.mxu0 %v7644_v57  ;;  %7651 = vmatpush3.bf16.msra.mxu1 %v7648_v49  ;;  %v6490_v57 = vld [vmem:[%s9119_s3 + $0x1c8] sm:$0xff] }
0x1900   :  { %7247 = vmatprep.mubr.msk.f32.mxu1 %vm162_vm3, %v8619_v53  ;;  %7653 = vmatprep.subr.bf16.mxu1 %v7652_v8  ;;  %v7664_v58 = vpack.c.bf16 %v6490_v57, %v6489_v56 }
0x1901   :  { %7657 = vmatprep.subr.bf16.mxu0 %v7656_v9 }
0x1902   :  { %7237 = vmatmul.mubr.msk.f32.vlgmr.msra.gmra.mrb[32].mxu0 %vm162_vm3, %v8621_v54 }
0x1903   :  { %7655 = vmatpush3.bf16.msra.mxu1 %v7652_v8  ;;  %7659 = vmatpush3.bf16.msra.mxu0 %v7656_v9  ;;  %v6492_v8 = vld [vmem:[%s9119_s3 + $0x1d8] sm:$0xff] }
0x1904   :  { %7258 = vmatprep.mubr.msk.f32.mxu0 %vm162_vm3, %v8619_v53  ;;  %7661 = vmatprep.subr.bf16.mxu0 %v7660_v15  ;;  %v7668_v11 = vpack.c.bf16 %v6492_v8, %v6491_v6 }
0x1905   :  { %7261 = vmatprep.subr.mxu1 %v7947_v18 }
0x1906   :  { %7248 = vmatmul.mubr.msk.f32.vlgmr.msra.gmra.mrb[46].mxu1 %vm162_vm3, %v8621_v54 }
0x1907   :  { %7663 = vmatpush3.bf16.msra.mxu0 %v7660_v15  ;;  %7263 = vmatprep.mubr.msk.f32.mxu1 %vm7948_vm4, %v7947_v18  ;;  %v6505_v15 = vld [vmem:[%s9119_s3 + $0x2c0] sm:$0xff] }
0x1908   :  { %7271 = vmatprep.subr.mxu0 %v7947_v18 }
0x190a   :  { %7259 = vmatmul.mubr.msk.f32.vlgmr.msra.gmra.mrb[34].mxu0 %vm162_vm3, %v8621_v54 }
0x190b   :  { %7273 = vmatprep.mubr.msk.f32.mxu0 %vm7948_vm4, %v7947_v18 }
0x19cd   :  { %v8731_v17 = vpop.f32.mrb[30].mxu0 }
0x19ce   :  { %v7222_v19 = vpop.f32.mrb[31].mxu0 }
0x19cf   :  { %v6506_v19 = vld [vmem:[%s9119_s3 + $0x2c8] sm:$0xff] }
0x19d1   :  { %v8733_v22 = vpop.f32.mrb[44].mxu1 }
0x19d2   :  { %v7227_v21 = vpop.f32.mrb[45].mxu1 }
0x19d3   :  { %v7680_v21 = vpack.c.bf16 %v6506_v19, %v6505_v15  ;;  %v6522_v19 = vld [vmem:[%s9119_s3 + $0x1e0] sm:$0xff] }
0x19d5   :  { %v7238_v63 = vpop.f32.mrb[32].mxu0 }
0x19d6   :  { %v3844_v40 = vpop.f32.mrb[33].mxu0  ;;  %v3850_v38 = vadd.f32 %v7238_v63, %v6459_v28  ;;  %v6507_v63 = vld [vmem:[%s9119_s3 + $0x2d0] sm:$0xff] }
0x19d7   :  { %v3845_v32 = vadd.f32 %v6459_v28, %v3844_v40  ;;  %v6508_v40 = vld [vmem:[%s9119_s3 + $0x2d8] sm:$0xff] }
0x19d9   :  { %v7249_v24 = vpop.f32.mrb[46].mxu1 }
0x19da   :  { %v3932_v25 = vpop.f32.mrb[47].mxu1  ;;  %v3938_v36 = vadd.f32 %v7249_v24, %v6467_v23  ;;  %v6484_v24 = vld [vmem:[%s9121_s5 + $0x28] sm:$0xff] }
0x19db   :  { %v3933_v29 = vadd.f32 %v6467_v23, %v3932_v25  ;;  %v7684_v23 = vpack.c.bf16 %v6508_v40, %v6507_v63  ;;  %v6453_v25 = vld [vmem:[%s9121_s5 + $0x20] sm:$0xff]  ;;  %v6519_v40 = vld [vmem:[%s9121_s5 + $0x30] sm:$0xff] }
0x19dd   :  { %v7260_v31 = vpop.f32.mrb[34].mxu0  ;;  %7262 = vmatpush3.xpose.msk.msra.mxu1 %vm470_vm5, %v3933_v29  ;;  %v6497_v29 = vld [vmem:[%s9119_s3 + $0x240] sm:$0xff] }
0x19de   :  { %v4020_v35 = vpop.f32.mrb[35].mxu0  ;;  %7266 = vmatprep.subr.mxu1 %v7947_v18  ;;  %v4026_v39 = vadd.f32 %v7260_v31, %v6475_v30 }
0x19df   :  { %v4021_v37 = vadd.f32 %v6475_v30, %v4020_v35  ;;  %v6498_v30 = vld [vmem:[%s9119_s3 + $0x248] sm:$0xff] }
0x19e0   :  { %7264 = vmatmul.mubr.msk.f32.vlgmr.msra.gmra.mrb[48].mxu1 %vm470_vm5, %v3845_v32  ;;  %v7672_v32 = vpack.c.bf16 %v6498_v30, %v6497_v29 }
0x19e1   :  { %7267 = vmatpush3.xpose.msk.msra.mxu1 %vm470_vm5, %v3938_v36  ;;  %7272 = vmatpush3.msra.mxu0 %v4021_v37  ;;  %v6499_v37 = vld [vmem:[%s9119_s3 + $0x250] sm:$0xff] }
0x19e2   :  { %7268 = vmatprep.mubr.msk.f32.mxu1 %vm7948_vm4, %v7947_v18  ;;  %7276 = vmatprep.subr.mxu1 %v7947_v18 }
0x19e3   :  { %7281 = vmatprep.subr.mxu0 %v6484_v24 }
0x19e4   :  { %7269 = vmatmul.mubr.msk.f32.vlgmr.msra.gmra.mrb[50].mxu1 %vm470_vm5, %v3850_v38  ;;  %v6500_v38 = vld [vmem:[%s9119_s3 + $0x258] sm:$0xff] }
0x19e5   :  { %7277 = vmatpush3.msra.mxu1 %v4026_v39  ;;  %7278 = vmatprep.mubr.msk.f32.mxu1 %vm7948_vm4, %v7947_v18  ;;  %v7676_v39 = vpack.c.bf16 %v6500_v38, %v6499_v37  ;;  %v6539_v37 = vld [vmem:[%s9119_s3 + $0x2e8] sm:$0xff] }
0x19e6   :  { %7665 = vmatprep.subr.bf16.mxu1 %v7664_v58 }
0x1ab3   :  { %v4101_v20 = vpop.f32.mrb[48].mxu1 }
0x1ab4   :  { %v4102_v41 = vadd.f32 %v4101_v20, %v8189_v34  ;;  %v7265_v42 = vpop.f32.mrb[49].mxu1 }
0x1ab6   :  { %v4181_v43 = vsel %vm470_vm5, %v4102_v41, -inf }
0x1ab7   :  { %4182 = vmax.xlane.f32.xlu1 %v4181_v43  ;;  %v4177_v44 = vpop.f32.mrb[50].mxu1 }
0x1ab8   :  { %v4178_v16 = vadd.f32 %v4177_v44, %v8189_v34  ;;  %v7270_v27 = vpop.f32.mrb[51].mxu1  ;;  %v6494_v44 = vld [vmem:[%s9120_s4 + $0xe] ss:$0 sm:$0xff] }
0x1aba   :  { %v4184_v45 = vsel %vm470_vm5, %v4178_v16, -inf }
0x1abb   :  { %4185 = vmax.xlane.f32.xlu0 %v4184_v45  ;;  %v6510_v45 = vld [vmem:[%s9120_s4 + $0x16] ss:$0 sm:$0xff] }
0x1b44   :  { %v4183_v46 = vpop.xlane.xlu1 %4182 }
0x1b45   :  { %v4187_v47 = vsub.f32 %v4102_v41, %v4183_v46 }
0x1b47   :  { %v4189_v48 = vmul.f32 1.442695, %v4187_v47 }
0x1b48   :  { %v4186_v7 = vpop.xlane.xlu0 %4185 }
0x1b49   :  { %7838 = vpow2.f32 %v4189_v48  ;;  %v4188_v49 = vsub.f32 %v4178_v16, %v4186_v7 }
0x1b4b   :  { %v4191_v50 = vmul.f32 1.442695, %v4188_v49 }
0x1b4d   :  { %7840 = vpow2.f32 %v4191_v50 }
0x1b53   :  { %v7839_v51 = vpop.eup %7838 }
0x1b54   :  { %v4193_v12 = vsel %vm470_vm5, %v7839_v51, 0.0 }
0x1b55   :  { %4194 = vadd.xlane.f32.xlu1 %v4193_v12 }
0x1b57   :  { %v7841_v52 = vpop.eup %7840 }
0x1b58   :  { %v4196_v55 = vsel %vm470_vm5, %v7841_v52, 0.0 }
0x1b59   :  { %4197 = vadd.xlane.f32.xlu0 %v4196_v55 }
0x1be2   :  { %v4195_v59 = vpop.xlane.xlu1 %4194 }
0x1be3   :  { %7842 = vrcp.f32 %v4195_v59 }
0x1be6   :  { %v4198_v61 = vpop.xlane.xlu0 %4197 }
0x1be7   :  { %7844 = vrcp.f32 %v4198_v61 }
0x1bed   :  { %v7843_v1 = vpop.eup %7842 }
0x1bee   :  { %v4201_v5 = vmul.f32 %v7843_v1, %v7839_v51 }
0x1bf0   :  { %7274 = vmatmul.mubr.msk.f32.vlgmr.msra.gmra.mrb[36].mxu0 %vm470_vm5, %v4201_v5 }
0x1bf1   :  { %v7845_v9 = vpop.eup %7844  ;;  %7282 = vmatpush3.msra.mxu0 %v6484_v24 }
0x1bf2   :  { %v4202_v10 = vmul.f32 %v7845_v9, %v7841_v52  ;;  %7286 = vmatprep.subr.mxu0 %v6453_v25 }
0x1bf4   :  { %7279 = vmatmul.mubr.msk.f32.vlgmr.msra.gmra.mrb[52].mxu1 %vm470_vm5, %v4202_v10 }
0x1bf5   :  { %7667 = vmatpush3.bf16.msra.mxu1 %v7664_v58  ;;  %7299 = vmatprep.mubr.msk.f32.mxu1 %vm162_vm3, %v8619_v53 }
0x1bf6   :  { %7669 = vmatprep.subr.bf16.mxu1 %v7668_v11 }
0x1bf9   :  { %7671 = vmatpush3.bf16.msra.mxu1 %v7668_v11 }
0x1bfa   :  { %7681 = vmatprep.subr.bf16.mxu1 %v7680_v21 }
0x1bfc   :  { %7300 = vmatmul.mubr.msk.f32.vlgmr.msra.gmra.mrb[54].mxu1 %vm162_vm3, %v8621_v54 }
0x1bfd   :  { %7683 = vmatpush3.bf16.msra.mxu1 %v7680_v21  ;;  %7321 = vmatprep.mubr.msk.f32.mxu1 %vm162_vm3, %v8619_v53  ;;  %v6523_v21 = vld [vmem:[%s9119_s3 + $0x1e8] sm:$0xff] }
0x1bfe   :  { %7685 = vmatprep.subr.bf16.mxu1 %v7684_v23  ;;  %v7688_v63 = vpack.c.bf16 %v6523_v21, %v6522_v19 }
0x1c01   :  { %7687 = vmatpush3.bf16.msra.mxu1 %v7684_v23 }
0x1c02   :  { %7329 = vmatprep.subr.mxu1 %v7947_v18 }
0x1c04   :  { %7322 = vmatmul.mubr.msk.f32.vlgmr.msra.gmra.mrb[56].mxu1 %vm162_vm3, %v8621_v54 }
0x1c05   :  { %7331 = vmatprep.mubr.msk.f32.mxu1 %vm7948_vm4, %v7947_v18 }
0x1cc3   :  { %v4272_v28 = vpop.f32.mrb[36].mxu0 }
0x1cc4   :  { %v7275_v31 = vpop.f32.mrb[37].mxu0  ;;  %7283 = vmatprep.mubr.msk.f32.mxu0 %vm470_vm5, %v4272_v28  ;;  %v6525_v28 = vld [vmem:[%s9119_s3 + $0x1f8] sm:$0xff] }
0x1cc7   :  { %v4345_v35 = vpop.f32.mrb[52].mxu1 }
0x1cc8   :  { %v7280_v36 = vpop.f32.mrb[53].mxu1  ;;  %7284 = vmatmul.mubr.msk.f32.vlgmr.msra.gmra.mrb[38].mxu0 %vm470_vm5, %v4345_v35 }
0x1cc9   :  { %7287 = vmatpush3.msra.mxu0 %v6453_v25  ;;  %7288 = vmatprep.mubr.msk.f32.mxu0 %vm470_vm5, %v8731_v17  ;;  %v6524_v25 = vld [vmem:[%s9119_s3 + $0x1f0] sm:$0xff]  ;;  %v6538_v36 = vld [vmem:[%s9119_s3 + $0x2e0] sm:$0xff] }
0x1cca   :  { %7673 = vmatprep.subr.bf16.mxu0 %v7672_v32  ;;  %v7704_v38 = vpack.c.bf16 %v6539_v37, %v6538_v36  ;;  %v6552_v37 = vld [vmem:[%s9121_s5 + $0x38] sm:$0xff] }
0x1ccf   :  { %v7301_v20 = vpop.f32.mrb[54].mxu1 }
0x1cd0   :  { %v4592_v41 = vpop.f32.mrb[55].mxu1  ;;  %7289 = vmatmul.mubr.msk.f32.vlgmr.msra.gmra.mrb[38].mxu0 %vm470_vm5, %v8733_v22  ;;  %v6502_v22 = vld [vmem:[%s9120_s4 + $0x12] ss:$0 sm:$0xff]  ;;  %v4598_v47 = vadd.f32 %v7301_v20, %v6494_v44  ;;  %v6541_v20 = vld [vmem:[%s9119_s3 + $0x2f8] sm:$0xff] }
0x1cd1   :  { %7675 = vmatpush3.bf16.msra.mxu0 %v7672_v32  ;;  %7310 = vmatprep.mubr.msk.f32.mxu0 %vm162_vm3, %v8619_v53  ;;  %v4593_v48 = vadd.f32 %v6494_v44, %v4592_v41  ;;  %v7692_v32 = vpack.c.bf16 %v6525_v28, %v6524_v25  ;;  %v6533_v44 = vld [vmem:[%s9119_s3 + $0x278] sm:$0xff] }
0x1cd2   :  { %7677 = vmatprep.subr.bf16.mxu0 %v7676_v39 }
0x1cd5   :  { %7679 = vmatpush3.bf16.msra.mxu0 %v7676_v39  ;;  %v6540_v39 = vld [vmem:[%s9119_s3 + $0x2f0] sm:$0xff] }
0x1cd6   :  { %7324 = vmatprep.subr.mxu0 %v7947_v18  ;;  %v7708_v41 = vpack.c.bf16 %v6541_v20, %v6540_v39 }
0x1cd7   :  { %v7323_v17 = vpop.f32.mrb[56].mxu1 }
0x1cd8   :  { %7311 = vmatmul.mubr.msk.f32.vlgmr.msra.gmra.mrb[40].mxu0 %vm162_vm3, %v8621_v54  ;;  %v4768_v42 = vpop.f32.mrb[57].mxu1  ;;  %v4774_v7 = vadd.f32 %v7323_v17, %v6510_v45  ;;  %v6530_v17 = vld [vmem:[%s9119_s3 + $0x260] sm:$0xff] }
0x1cd9   :  { %7326 = vmatprep.mubr.msk.f32.mxu0 %vm7948_vm4, %v7947_v18  ;;  %v4769_v49 = vadd.f32 %v6510_v45, %v4768_v42  ;;  %v6531_v42 = vld [vmem:[%s9119_s3 + $0x268] sm:$0xff] }
0x1dab   :  { %v7312_v43 = vpop.f32.mrb[40].mxu0 }
0x1dac   :  { %v4686_v16 = vadd.f32 %v7312_v43, %v6502_v22  ;;  %v4680_v27 = vpop.f32.mrb[41].mxu0  ;;  %v6532_v43 = vld [vmem:[%s9119_s3 + $0x270] sm:$0xff] }
0x1dad   :  { %v4681_v46 = vadd.f32 %v6502_v22, %v4680_v27  ;;  %v7696_v22 = vpack.c.bf16 %v6531_v42, %v6530_v17  ;;  %v5856_v17 = vrot.slane %v8607_v26, %v2882_v33 }
0x1dae   :  { %7330 = vmatpush3.xpose.msk.msra.mxu1 %vm470_vm5, %v4686_v16 }
0x1daf   :  { %7325 = vmatpush3.xpose.msk.msra.mxu0 %vm470_vm5, %v4681_v46  ;;  %7339 = vmatprep.subr.mxu1 %v7947_v18  ;;  %v7700_v46 = vpack.c.bf16 %v6533_v44, %v6532_v43 }
0x1db0   :  { %7334 = vmatprep.subr.mxu0 %v7947_v18 }
0x1db1   :  { %7332 = vmatmul.mubr.msk.f32.vlgmr.msra.gmra.mrb[58].mxu1 %vm470_vm5, %v4598_v47 }
0x1db2   :  { %7327 = vmatmul.mubr.msk.f32.vlgmr.msra.gmra.mrb[42].mxu0 %vm470_vm5, %v4593_v48  ;;  %7340 = vmatpush3.msra.mxu1 %v4774_v7 }
0x1db3   :  { %7335 = vmatpush3.msra.mxu0 %v4769_v49  ;;  %7341 = vmatprep.mubr.msk.f32.mxu1 %vm7948_vm4, %v7947_v18  ;;  %v6543_v49 = vld [vmem:[%s9120_s4 + $0x17] ss:$0 sm:$0xff] }
0x1db4   :  { %7336 = vmatprep.mubr.msk.f32.mxu0 %vm7948_vm4, %v7947_v18  ;;  %7689 = vmatprep.subr.bf16.mxu1 %v7688_v63 }
0x1db5   :  { %7344 = vmatprep.subr.mxu0 %v6519_v40 }
0x1e84   :  { %v4925_v50 = vpop.f32.mrb[58].mxu1 }
0x1e85   :  { %v4926_v51 = vadd.f32 %v4925_v50, %v8189_v34  ;;  %v4849_v12 = vpop.f32.mrb[42].mxu0  ;;  %v7333_v52 = vpop.f32.mrb[59].mxu1 }
0x1e86   :  { %v4850_v55 = vadd.f32 %v4849_v12, %v8189_v34  ;;  %v7328_v56 = vpop.f32.mrb[43].mxu0  ;;  %v6535_v52 = vld [vmem:[%s9120_s4 + $0x13] ss:$0 sm:$0xff] }
0x1e87   :  { %v4932_v57 = vsel %vm470_vm5, %v4926_v51, -inf }
0x1e88   :  { %4933 = vmax.xlane.f32.xlu0 %v4932_v57  ;;  %v4929_v58 = vsel %vm470_vm5, %v4850_v55, -inf }
0x1e89   :  { %4930 = vmax.xlane.f32.xlu1 %v4929_v58 }
0x1f15   :  { %v4934_v59 = vpop.xlane.xlu0 %4933 }
0x1f16   :  { %v4936_v61 = vsub.f32 %v4926_v51, %v4934_v59  ;;  %v4931_v1 = vpop.xlane.xlu1 %4930 }
0x1f17   :  { %v4935_v5 = vsub.f32 %v4850_v55, %v4931_v1 }
0x1f18   :  { %v4939_v6 = vmul.f32 1.442695, %v4936_v61 }
0x1f19   :  { %v4937_v8 = vmul.f32 1.442695, %v4935_v5 }
0x1f1a   :  { %7846 = vpow2.f32 %v4939_v6 }
0x1f1b   :  { %7848 = vpow2.f32 %v4937_v8 }
0x1f24   :  { %v7847_v9 = vpop.eup %7846 }
0x1f25   :  { %v7849_v10 = vpop.eup %7848  ;;  %v4944_v11 = vsel %vm470_vm5, %v7847_v9, 0.0 }
0x1f26   :  { %4945 = vadd.xlane.f32.xlu0 %v4944_v11  ;;  %v4941_v15 = vsel %vm470_vm5, %v7849_v10, 0.0 }
0x1f27   :  { %4942 = vadd.xlane.f32.xlu1 %v4941_v15 }
0x1fb3   :  { %v4946_v23 = vpop.xlane.xlu0 %4945 }
0x1fb4   :  { %7850 = vrcp.f32 %v4946_v23  ;;  %v4943_v24 = vpop.xlane.xlu1 %4942 }
0x1fb5   :  { %7852 = vrcp.f32 %v4943_v24 }
0x1fbe   :  { %v7851_v29 = vpop.eup %7850 }
0x1fbf   :  { %v7853_v30 = vpop.eup %7852  ;;  %v4950_v31 = vmul.f32 %v7851_v29, %v7847_v9 }
0x1fc0   :  { %v4949_v35 = vmul.f32 %v7853_v30, %v7849_v10 }
0x1fc1   :  { %7342 = vmatmul.mubr.msk.f32.vlgmr.msra.gmra.mrb[60].mxu1 %vm470_vm5, %v4950_v31 }
0x1fc2   :  { %7691 = vmatpush3.bf16.msra.mxu1 %v7688_v63  ;;  %7337 = vmatmul.mubr.msk.f32.vlgmr.msra.gmra.mrb[44].mxu0 %vm470_vm5, %v4949_v35 }
0x1fc3   :  { %7357 = vmatprep.mubr.msk.f32.mxu1 %vm162_vm3, %v8619_v53  ;;  %7693 = vmatprep.subr.bf16.mxu1 %v7692_v32 }
0x1fc4   :  { %7345 = vmatpush3.msra.mxu0 %v6519_v40 }
0x1fc5   :  { %7697 = vmatprep.subr.bf16.mxu0 %v7696_v22 }
0x1fc6   :  { %7695 = vmatpush3.bf16.msra.mxu1 %v7692_v32 }
0x1fc7   :  { %7705 = vmatprep.subr.bf16.mxu1 %v7704_v38 }
0x1fc9   :  { %7358 = vmatmul.mubr.msk.f32.vlgmr.msra.gmra.mrb[62].mxu1 %vm162_vm3, %v8621_v54 }
0x1fca   :  { %7707 = vmatpush3.bf16.msra.mxu1 %v7704_v38  ;;  %7379 = vmatprep.mubr.msk.f32.mxu1 %vm162_vm3, %v8619_v53 }
0x1fcb   :  { %7709 = vmatprep.subr.bf16.mxu1 %v7708_v41 }
0x1fce   :  { %7711 = vmatpush3.bf16.msra.mxu1 %v7708_v41 }
0x1fcf   :  { %7392 = vmatprep.subr.mxu1 %v7947_v18 }
0x1fd1   :  { %7380 = vmatmul.mubr.msk.f32.vlgmr.msra.gmra.mrb[64].mxu1 %vm162_vm3, %v8621_v54 }
0x1fd2   :  { %7394 = vmatprep.mubr.msk.f32.mxu1 %vm7948_vm4, %v7947_v18 }
0x2094   :  { %v5093_v16 = vpop.f32.mrb[60].mxu1 }
0x2095   :  { %v5020_v27 = vpop.f32.mrb[44].mxu0  ;;  %v7343_v45 = vpop.f32.mrb[61].mxu1 }
0x2096   :  { %v7338_v47 = vpop.f32.mrb[45].mxu0  ;;  %7346 = vmatprep.mubr.msk.f32.mxu0 %vm470_vm5, %v5020_v27 }
0x2097   :  { %7347 = vmatmul.mubr.msk.f32.vlgmr.msra.gmra.mrb[38].mxu0 %vm470_vm5, %v5093_v16 }
0x2098   :  { %7699 = vmatpush3.bf16.msra.mxu0 %v7696_v22  ;;  %7368 = vmatprep.mubr.msk.f32.mxu0 %vm162_vm3, %v8619_v53 }
0x2099   :  { %7701 = vmatprep.subr.bf16.mxu0 %v7700_v46 }
0x209c   :  { %v7359_v48 = vpop.f32.mrb[62].mxu1  ;;  %7703 = vmatpush3.bf16.msra.mxu0 %v7700_v46 }
0x209d   :  { %v5261_v7 = vpop.f32.mrb[63].mxu1  ;;  %7382 = vmatprep.subr.mxu0 %v7947_v18 }
0x209f   :  { %7369 = vmatmul.mubr.msk.f32.vlgmr.msra.gmra.mrb[46].mxu0 %vm162_vm3, %v8621_v54  ;;  %v6527_v54 = vld [vmem:[%s9120_s4 + $0xf] ss:$0 sm:$0xff] }
0x20a0   :  { %7384 = vmatprep.mubr.msk.f32.mxu0 %vm7948_vm4, %v7947_v18  ;;  %v5262_v58 = vadd.f32 %v6527_v54, %v5261_v7  ;;  %v5267_v61 = vadd.f32 %v7359_v48, %v6527_v54  ;;  %v6558_v54 = vld [vmem:[%s9122_s6 + $0x38] sm:$0xff] }
0x20a4   :  { %v7381_v50 = vpop.f32.mrb[64].mxu1 }
0x20a5   :  { %v5443_v51 = vadd.f32 %v7381_v50, %v6543_v49  ;;  %v5437_v12 = vpop.f32.mrb[65].mxu1 }
0x20a6   :  { %v5438_v53 = vadd.f32 %v6543_v49, %v5437_v12 }
0x20a8   :  { %7393 = vmatpush3.msra.mxu1 %v5438_v53  ;;  %v6555_v53 = vld [vmem:[%s9122_s6 + $0x20] sm:$0xff] }
0x2172   :  { %v7370_v55 = vpop.f32.mrb[46].mxu0 }
0x2173   :  { %v5349_v56 = vpop.f32.mrb[47].mxu0  ;;  %v5355_v59 = vadd.f32 %v7370_v55, %v6535_v52 }
0x2174   :  { %v5350_v57 = vadd.f32 %v6535_v52, %v5349_v56  ;;  %v6556_v52 = vld [vmem:[%s9122_s6 + $0x28] sm:$0xff]  ;;  %v6557_v56 = vld [vmem:[%s9122_s6 + $0x30] sm:$0xff] }
0x2175   :  { %v7712_v55 = vpack.c.bf16 %v6556_v52, %v6555_v53 }
0x2176   :  { %7383 = vmatpush3.xpose.msk.msra.mxu0 %vm470_vm5, %v5350_v57  ;;  %v7716_v57 = vpack.c.bf16 %v6558_v54, %v6557_v56 }
0x2177   :  { %7387 = vmatprep.subr.mxu0 %v7947_v18  ;;  %7713 = vmatprep.subr.bf16.mxu1 %v7712_v55 }
0x2179   :  { %7385 = vmatmul.mubr.msk.f32.vlgmr.msra.gmra.mrb[48].mxu0 %vm470_vm5, %v5262_v58  ;;  %v6563_v58 = vld [vmem:[%s9124_s8 + $0x80] sm:$0xff] }
0x217a   :  { %7388 = vmatpush3.xpose.msk.msra.mxu0 %vm470_vm5, %v5355_v59  ;;  %7389 = vmatprep.mubr.msk.f32.mxu0 %vm7948_vm4, %v7947_v18  ;;  %v6564_v59 = vld [vmem:[%s9124_s8 + $0x88] sm:$0xff] }
0x217b   :  { %7397 = vmatprep.subr.mxu0 %v7947_v18 }
0x217d   :  { %7390 = vmatmul.mubr.msk.f32.vlgmr.msra.gmra.mrb[50].mxu0 %vm470_vm5, %v5267_v61  ;;  %v7720_v61 = vpack.c.bf16 %v6564_v59, %v6563_v58 }
0x217e   :  { %7398 = vmatpush3.msra.mxu0 %v5443_v51  ;;  %7399 = vmatprep.mubr.msk.f32.mxu0 %vm7948_vm4, %v7947_v18 }
0x217f   :  { %7402 = vmatprep.subr.mxu0 %v6552_v37 }
0x224c   :  { %v5518_v1 = vpop.f32.mrb[48].mxu0 }
0x224d   :  { %v5519_v5 = vadd.f32 %v5518_v1, %v8189_v34  ;;  %v7386_v6 = vpop.f32.mrb[49].mxu0 }
0x224f   :  { %v5598_v8 = vsel %vm470_vm5, %v5519_v5, -inf }
0x2250   :  { %5599 = vmax.xlane.f32.xlu1 %v5598_v8  ;;  %v5594_v9 = vpop.f32.mrb[50].mxu0 }
0x2251   :  { %v5595_v10 = vadd.f32 %v5594_v9, %v8189_v34  ;;  %v7391_v11 = vpop.f32.mrb[51].mxu0 }
0x2252   :  { %v5888_v11 = vrot.slane %v8607_v26, %v2914_v2  ;;  %v6565_v2 = vld [vmem:[%s9124_s8 + $0x90] sm:$0xff] }
0x2253   :  { %v5601_v15 = vsel %vm470_vm5, %v5595_v10, -inf }
0x2254   :  { %5602 = vmax.xlane.f32.xlu0 %v5601_v15 }
0x22dd   :  { %v5600_v19 = vpop.xlane.xlu1 %5599 }
0x22de   :  { %v5604_v21 = vsub.f32 %v5519_v5, %v5600_v19 }
0x22e0   :  { %v5606_v63 = vmul.f32 1.442695, %v5604_v21 }
0x22e1   :  { %v5603_v40 = vpop.xlane.xlu0 %5602 }
0x22e2   :  { %7854 = vpow2.f32 %v5606_v63  ;;  %v5605_v18 = vsub.f32 %v5595_v10, %v5603_v40  ;;  %v5894_v40 = vrot.slane %v8607_v26, %v2920_v3  ;;  %v6567_v3 = vld [vmem:[%s9124_s8 + $0xa0] sm:$0xff]  ;;  %v6568_v26 = vld [vmem:[%s9124_s8 + $0xa8] sm:$0xff] }
0x22e4   :  { %v5608_v23 = vmul.f32 1.442695, %v5605_v18 }
0x22e6   :  { %7856 = vpow2.f32 %v5608_v23 }
0x22ec   :  { %v7855_v24 = vpop.eup %7854 }
0x22ed   :  { %v5610_v25 = vsel %vm470_vm5, %v7855_v24, 0.0 }
0x22ee   :  { %5611 = vadd.xlane.f32.xlu1 %v5610_v25 }
0x22f0   :  { %v7857_v28 = vpop.eup %7856 }
0x22f1   :  { %v5613_v29 = vsel %vm470_vm5, %v7857_v28, 0.0 }
0x22f2   :  { %5614 = vadd.xlane.f32.xlu0 %v5613_v29 }
0x237b   :  { %v5612_v34 = vpop.xlane.xlu1 %5611 }
0x237c   :  { %7858 = vrcp.f32 %v5612_v34  ;;  %v7728_v34 = vpack.c.bf16 %v6568_v26, %v6567_v3  ;;  %v6149_v3 = vld [vmem:[%s9127_s11 + $0x8] sm:$0xff] }
0x237f   :  { %v5615_v30 = vpop.xlane.xlu0 %5614 }
0x2380   :  { %7860 = vrcp.f32 %v5615_v30  ;;  %v6569_v30 = vld [vmem:[%s9124_s8 + $0xb0] sm:$0xff] }
0x2386   :  { %v7859_v31 = vpop.eup %7858 }
0x2387   :  { %v5618_v32 = vmul.f32 %v7859_v31, %v7855_v24  ;;  %v6570_v31 = vld [vmem:[%s9124_s8 + $0xb8] sm:$0xff] }
0x2389   :  { %7395 = vmatmul.mubr.msk.f32.vlgmr.msra.gmra.mrb[66].mxu1 %vm470_vm5, %v5618_v32  ;;  %v7732_v32 = vpack.c.bf16 %v6570_v31, %v6569_v30  ;;  %v6151_v30 = vld [vmem:[%s9127_s11 + $0x18] sm:$0xff] }
0x238a   :  { %v7861_v35 = vpop.eup %7860  ;;  %7715 = vmatpush3.bf16.msra.mxu1 %v7712_v55 }
0x238b   :  { %v5619_v36 = vmul.f32 %v7861_v35, %v7857_v28  ;;  %7717 = vmatprep.subr.bf16.mxu1 %v7716_v57  ;;  %v6566_v28 = vld [vmem:[%s9124_s8 + $0x98] sm:$0xff]  ;;  %v6571_v35 = vld [vmem:[%s9124_s8 + $0xc0] sm:$0xff] }
0x238c   :  { %v7724_v29 = vpack.c.bf16 %v6566_v28, %v6565_v2 }
0x238d   :  { %7400 = vmatmul.mubr.msk.f32.vlgmr.msra.gmra.mrb[52].mxu0 %vm470_vm5, %v5619_v36  ;;  %v6572_v36 = vld [vmem:[%s9124_s8 + $0xc8] sm:$0xff] }
0x238e   :  { %7403 = vmatpush3.msra.mxu0 %v6552_v37  ;;  %7719 = vmatpush3.bf16.msra.mxu1 %v7716_v57  ;;  %v6573_v37 = vld [vmem:[%s9124_s8 + $0xd0] sm:$0xff] }
0x238f   :  { %7721 = vmatprep.subr.bf16.mxu0 %v7720_v61 }
0x245c   :  { %v5689_v38 = vpop.f32.mrb[66].mxu1 }
0x245d   :  { %v7396_v39 = vpop.f32.mrb[67].mxu1  ;;  %7404 = vmatprep.mubr.msk.f32.mxu0 %vm470_vm5, %v5689_v38  ;;  %v7736_v38 = vpack.c.bf16 %v6572_v36, %v6571_v35 }
0x245e   :  { %v6574_v39 = vld [vmem:[%s9124_s8 + $0xd8] sm:$0xff] }
0x2460   :  { %v5762_v20 = vpop.f32.mrb[52].mxu0 }
0x2461   :  { %v7401_v41 = vpop.f32.mrb[53].mxu0  ;;  %7405 = vmatmul.mubr.msk.f32.vlgmr.msra.gmra.mrb[38].mxu0 %vm470_vm5, %v5762_v20  ;;  %v7740_v20 = vpack.c.bf16 %v6574_v39, %v6573_v37 }
0x2462   :  { %7723 = vmatpush3.bf16.msra.mxu0 %v7720_v61  ;;  %v6575_v41 = vld [vmem:[%s9124_s8 + $0xe0] sm:$0xff] }
0x2463   :  { %7725 = vmatprep.subr.bf16.mxu0 %v7724_v29 }
0x2466   :  { %7727 = vmatpush3.bf16.msra.mxu0 %v7724_v29  ;;  %v6148_v29 = vld [vmem:[%s9127_s11] sm:$0xff] }
0x2467   :  { %7729 = vmatprep.subr.bf16.mxu0 %v7728_v34  ;;  %v7752_v26 = vpack.c.bf16 %v6149_v3, %v6148_v29 }
0x2469   :  { %7753 = vmatprep.subr.bf16.mxu1 %v7752_v26 }
0x246a   :  { %7731 = vmatpush3.bf16.msra.mxu0 %v7728_v34  ;;  %v6150_v34 = vld [vmem:[%s9127_s11 + $0x10] sm:$0xff]  ;;  %s7950_s11 = smov [#allocation4]  }
0x246b   :  { %7733 = vmatprep.subr.bf16.mxu0 %v7732_v32  ;;  %v7756_v31 = vpack.c.bf16 %v6151_v30, %v6150_v34  ;;  %s6259_s26 = sshll.u32 %s7950_s11, 4  ;;  %s6260_s26 = int_to_ptr.vmem [resolvable:$true] %s6259_s26 }
0x246c   :  { %p7881_p1 = scmp.lt.s32.totalorder %s6260_s26, %s6260_s26 }
0x246e   :  { %7735 = vmatpush3.bf16.msra.mxu0 %v7732_v32 }
0x246f   :  { %7737 = vmatprep.subr.bf16.mxu0 %v7736_v38 }
0x2472   :  { %7739 = vmatpush3.bf16.msra.mxu0 %v7736_v38 }
0x2473   :  { %7741 = vmatprep.subr.bf16.mxu0 %v7740_v20 }
0x2476   :  { %7743 = vmatpush3.bf16.msra.mxu0 %v7740_v20  ;;  %v6109_v20 = vld [vmem:[%s9126_s10] sm:$0x3]  ;;  %s7876_s10 = scalar_lea.vmem %s6260_s26, 256 }
0x2477   :  { %p7877_p0 = scmp.ne.s32.totalorder %s6260_s26, %s7876_s10  ;;  %p7882_p2 = scmp.lt.s32.totalorder %s7876_s10, %s7876_s10 }
0x2479   :  { %p7883_p3 = por %p7882_p2, %p7881_p1 }
0x247b   :  { %p7884_p4 = pnand %p7883_p3, %p7877_p0 }
0x2534   :  { %v7406_v42 = vpop.f32.mrb[38].mxu0 }
0x2535   :  { %v5852_v22 = vadd.f32 %v7406_v42, %v8569_v13  ;;  %v5840_v43 = vpop.f32.mrb[39].mxu0 }
0x2536   :  { %v5851_v44 = vadd.f32 %v5840_v43, %v8572_v14  ;;  %v6578_v43 = vld [vmem:[%s9124_s8 + $0xf8] sm:$0xff] }
0x2537   :  { %v8951_v16 = vadd.f32 %v5856_v17, %v5852_v22  ;;  %v6577_v22 = vld [vmem:[%s9124_s8 + $0xf0] sm:$0xff] }
0x2538   :  { %v8953_v27 = vadd.f32 %v5856_v17, %v5851_v44  ;;  %v6576_v17 = vld [vmem:[%s9124_s8 + $0xe8] sm:$0xff]  ;;  %v7748_v44 = vpack.c.bf16 %v6578_v43, %v6577_v22 }
0x2539   :  { %v5862_v45 = vsel %vm162_vm3, %v8951_v16, 0.0  ;;  %v7744_v42 = vpack.c.bf16 %v6576_v17, %v6575_v41  ;;  %v6139_v41 = vrot.slane %v6109_v20, %v8127_v62 }
0x253a   :  { %5863 = vadd.xlane.f32.xlu0 %v5862_v45  ;;  %v5859_v46 = vsel %vm162_vm3, %v8953_v27, 0.0  ;;  %v6560_v45 = vld [vmem:[%s9123_s7 + $0x1] ss:$0 sm:$0xff] }
0x253b   :  { %5860 = vadd.xlane.f32.xlu1 %v5859_v46  ;;  %7745 = vmatprep.subr.bf16.mxu0 %v7744_v42 }
0x253c   :  { %7747 = vmatpush3.bf16.msra.mxu0 %v7744_v42 }
0x253d   :  { %7749 = vmatprep.subr.bf16.mxu0 %v7748_v44 }
0x2540   :  { %7751 = vmatpush3.bf16.msra.mxu0 %v7748_v44  ;;  %v6145_v44 = vrot.slane %v6109_v20, %v8135_v0 }
0x25c7   :  { %v5864_v47 = vpop.xlane.xlu0 %5863 }
0x25c8   :  { %v5866_v33 = vmul.f32 0.03125, %v5864_v47  ;;  %v5861_v48 = vpop.xlane.xlu1 %5860 }
0x25c9   :  { %v5865_v7 = vmul.f32 0.03125, %v5861_v48 }
0x25ca   :  { %v5868_v13 = vsub.f32 %v8951_v16, %v5866_v33 }
0x25cb   :  { %v5867_v14 = vsub.f32 %v8953_v27, %v5865_v7 }
0x25cc   :  { %v5870_v49 = vmul.f32 %v5868_v13, %v5868_v13 }
0x25cd   :  { %v5869_v50 = vmul.f32 %v5867_v14, %v5867_v14 }
0x25ce   :  { %v5874_v51 = vsel %vm162_vm3, %v5870_v49, 0.0 }
0x25cf   :  { %5875 = vadd.xlane.f32.xlu0 %v5874_v51  ;;  %v5871_v12 = vsel %vm162_vm3, %v5869_v50, 0.0 }
0x25d0   :  { %5872 = vadd.xlane.f32.xlu1 %v5871_v12 }
0x265c   :  { %v5876_v1 = vpop.xlane.xlu0 %5875 }
0x265d   :  { %v5878_v5 = vmul.f32 0.03125, %v5876_v1  ;;  %v5873_v6 = vpop.xlane.xlu1 %5872 }
0x265e   :  { %v5877_v8 = vmul.f32 0.03125, %v5873_v6  ;;  %v7875_v6 = vld [vmem:[%s9125_s9 + $0x8] sm:$0x3f] }
0x265f   :  { %v5880_v9 = vadd.f32 1e-05, %v5878_v5 }
0x2660   :  { %v5879_v10 = vadd.f32 1e-05, %v5877_v8  ;;  %v6029_v8 = vrot.slane %v7875_v6, %v3052_v4 }
0x2661   :  { %7862 = vrsqrt.f32 %v5880_v9 }
0x2662   :  { %7864 = vrsqrt.f32 %v5879_v10 }
0x266b   :  { %v7863_v15 = vpop.eup %7862 }
0x266c   :  { %v7865_v19 = vpop.eup %7864  ;;  %v5884_v21 = vmul.f32 %v7863_v15, %v5868_v13 }
0x266d   :  { %v5883_v63 = vmul.f32 %v7865_v19, %v5867_v14 }
0x266e   :  { %v5890_v18 = vmul.f32 %v5888_v11, %v5884_v21 }
0x266f   :  { %v5889_v23 = vmul.f32 %v5888_v11, %v5883_v63 }
0x2670   :  { %v5896_v25 = vadd.f32 %v5894_v40, %v5890_v18 }
0x2671   :  { %v5895_v24 = vadd.f32 %v5894_v40, %v5889_v23 }
0x2673   :  { %7415 = vmatprep.mubr.msk.f32.mxu1 %vm162_vm3, %v5895_v24 }
0x2674   :  { %7416 = vmatmul.mubr.msk.f32.vlgmr.msra.gmra.mrb[68].mxu1 %vm162_vm3, %v5896_v25 }
0x2675   :  { %7755 = vmatpush3.bf16.msra.mxu1 %v7752_v26 }
0x2676   :  { %7757 = vmatprep.subr.bf16.mxu1 %v7756_v31 }
0x2679   :  { %7759 = vmatpush3.bf16.msra.mxu1 %v7756_v31 }
0x2747   :  { %v7417_v46 = vpop.f32.mrb[68].mxu1 }
0x2748   :  { %v5988_v47 = vadd.f32 %v7417_v46, %v6560_v45  ;;  %v5982_v33 = vpop.f32.mrb[69].mxu1 }
0x2749   :  { %v5983_v48 = vadd.f32 %v6560_v45, %v5982_v33 }
0x274a   :  { %v5994_v7 = vmul.f32 0.044715, %v5988_v47  ;;  %v5992_v61 = vmul.f32 0.5, %v5988_v47 }
0x274b   :  { %v5993_v13 = vmul.f32 0.044715, %v5983_v48  ;;  %v5991_v58 = vmul.f32 0.5, %v5983_v48 }
0x274c   :  { %v5996_v14 = vmul.f32 %v5994_v7, %v5988_v47 }
0x274d   :  { %v5995_v49 = vmul.f32 %v5993_v13, %v5983_v48 }
0x274e   :  { %v5998_v50 = vmul.f32 %v5996_v14, %v5988_v47 }
0x274f   :  { %v5997_v51 = vmul.f32 %v5995_v49, %v5983_v48 }
0x2750   :  { %v6000_v12 = vadd.f32 %v5998_v50, %v5988_v47 }
0x2751   :  { %v5999_v53 = vadd.f32 %v5997_v51, %v5983_v48 }
0x2752   :  { %v6002_v52 = vmul.f32 0.7978846, %v6000_v12 }
0x2753   :  { %v6001_v55 = vmul.f32 0.7978846, %v5999_v53 }
0x2754   :  { %7866 = vtanh.f32 %v6002_v52 }
0x2755   :  { %7868 = vtanh.f32 %v6001_v55 }
0x275e   :  { %v7867_v56 = vpop.eup %7866 }
0x275f   :  { %v7869_v54 = vpop.eup %7868  ;;  %v6006_v57 = vadd.f32 1.0, %v7867_v56 }
0x2760   :  { %v6005_v59 = vadd.f32 1.0, %v7869_v54 }
0x2761   :  { %v6008_v5 = vmul.f32 %v6006_v57, %v5992_v61 }
0x2762   :  { %v6007_v1 = vmul.f32 %v6005_v59, %v5991_v58 }
0x2764   :  { %7450 = vmatprep.mubr.f32.mxu0 %v6007_v1 }
0x2765   :  { %7451 = vmatmul.mubr.f32.vlgmr.msra.gmra.mrb[54].mxu0 %v6008_v5 }
0x2838   :  { %v7452_v9 = vpop.f32.mrb[54].mxu0 }
0x2839   :  { %v6102_v10 = vadd.f32 %v7452_v9, %v6029_v8  ;;  %v6096_v11 = vpop.f32.mrb[55].mxu0 }
0x283a   :  { %v6097_v15 = vadd.f32 %v6096_v11, %v6029_v8 }
0x283b   :  { %v6106_v19 = vadd.f32 %v6102_v10, %v8951_v16 }
0x283c   :  { %v6105_v21 = vadd.f32 %v6097_v15, %v8953_v27 }
0x283d   :  { %6108 = vst.msk [vmem:[#allocation4 + $0x8] sm:$0xff] %vm162_vm3, %v6106_v19  ;;  %v6113_v63 = vsel %vm162_vm3, %v6106_v19, 0.0 }
0x283e   :  { %6107 = vst.msk [vmem:[#allocation4] sm:$0xff] %vm162_vm3, %v6105_v21  ;;  %6114 = vadd.xlane.f32.xlu0 %v6113_v63  ;;  %v6110_v40 = vsel %vm162_vm3, %v6105_v21, 0.0 }
0x283f   :  { %6111 = vadd.xlane.f32.xlu1 %v6110_v40 }
0x28cb   :  { %v6115_v60 = vpop.xlane.xlu0 %6114 }
0x28cc   :  { %v6117_v4 = vmul.f32 0.03125, %v6115_v60  ;;  %v6112_v18 = vpop.xlane.xlu1 %6111 }
0x28cd   :  { %v6116_v23 = vmul.f32 0.03125, %v6112_v18 }
0x28ce   :  { %v6119_v24 = vsub.f32 %v6106_v19, %v6117_v4 }
0x28cf   :  { %v6118_v25 = vsub.f32 %v6105_v21, %v6116_v23 }
0x28d0   :  { %v6121_v2 = vmul.f32 %v6119_v24, %v6119_v24 }
0x28d1   :  { %v6120_v16 = vmul.f32 %v6118_v25, %v6118_v25 }
0x28d2   :  { %v6125_v27 = vsel %vm162_vm3, %v6121_v2, 0.0 }
0x28d3   :  { %6126 = vadd.xlane.f32.xlu0 %v6125_v27  ;;  %v6122_v28 = vsel %vm162_vm3, %v6120_v16, 0.0 }
0x28d4   :  { %6123 = vadd.xlane.f32.xlu1 %v6122_v28 }
0x2960   :  { %v6127_v32 = vpop.xlane.xlu0 %6126 }
0x2961   :  { %v6129_v35 = vmul.f32 0.03125, %v6127_v32  ;;  %v6124_v36 = vpop.xlane.xlu1 %6123 }
0x2962   :  { %v6128_v37 = vmul.f32 0.03125, %v6124_v36 }
0x2963   :  { %v6131_v38 = vadd.f32 1e-05, %v6129_v35 }
0x2964   :  { %v6130_v39 = vadd.f32 1e-05, %v6128_v37 }
0x2965   :  { %7870 = vrsqrt.f32 %v6131_v38 }
0x2966   :  { %7872 = vrsqrt.f32 %v6130_v39 }
0x296f   :  { %v7871_v17 = vpop.eup %7870 }
0x2970   :  { %v7873_v42 = vpop.eup %7872  ;;  %v6135_v22 = vmul.f32 %v7871_v17, %v6119_v24 }
0x2971   :  { %v6134_v43 = vmul.f32 %v7873_v42, %v6118_v25 }
0x2972   :  { %v6141_v45 = vmul.f32 %v6139_v41, %v6135_v22 }
0x2973   :  { %v6140_v46 = vmul.f32 %v6139_v41, %v6134_v43 }
0x2974   :  { %v6147_v33 = vadd.f32 %v6145_v44, %v6141_v45 }
0x2975   :  { %v6146_v47 = vadd.f32 %v6145_v44, %v6140_v46 }
0x2977   :  { %7461 = vmatprep.mubr.msk.f32.mxu1 %vm162_vm3, %v6146_v47 }
0x2978   :  { %7462 = vmatmul.mubr.msk.f32.vlgmr.msra.gmra.mrb[70].mxu1 %vm162_vm3, %v6147_v33 }
0x2979   :  { %7887 = shalt.err (!%p7884_p4)
}
0x297a   :  { %s7888_s29 = scalar_lea.hbm %s9130_s14, 256 }
0x297b   :  { %p7889_p5 = scmp.ne.s32.totalorder %s9130_s14, %s7888_s29  ;;  %p7892_p6 = scmp.lt.u32.totalorder %s7888_s29, %s9130_s14 }
0x297d   :  { %p7894_p7 = pnand %p7892_p6, %p7889_p5 }
0x297f   :  { %7897 = shalt.err (!%p7894_p7)
}
0x2980   :  { %s7951_s17 = smov 128   ;;  %s7952_s18 = smov 8  }
0x2981   :  { %6265 = dma.vmem_to_hbm [thread:$0]  %s6260_s26, 256, %s9130_s14, [#allocation5], %s7951_s17, %s7951_s17, %s7952_s18  }
0x2982   :  { %s7953_s0 = smov [#allocation6]  }
0x2983   :  { %s6271_s7 = sshll.u32 %s7953_s0, 4  ;;  %s6272_s7 = int_to_ptr.vmem [resolvable:$true] %s6271_s7 }
0x2984   :  { %s7898_s8 = scalar_lea.vmem %s6272_s7, 256  ;;  %p7903_p9 = scmp.lt.s32.totalorder %s6272_s7, %s6272_s7 }
0x2985   :  { %p7899_p8 = scmp.ne.s32.totalorder %s6272_s7, %s7898_s8  ;;  %p7904_p10 = scmp.lt.s32.totalorder %s7898_s8, %s7898_s8 }
0x2987   :  { %p7905_p11 = por %p7904_p10, %p7903_p9 }
0x2989   :  { %p7906_p12 = pnand %p7905_p11, %p7899_p8 }
0x298b   :  { %7909 = shalt.err (!%p7906_p12)
}
0x298c   :  { %s7910_s21 = scalar_lea.hbm %s9131_s15, 256 }
0x298d   :  { %p7911_p13 = scmp.ne.s32.totalorder %s9131_s15, %s7910_s21  ;;  %p7914_p0 = scmp.lt.u32.totalorder %s7910_s21, %s9131_s15 }
0x298f   :  { %p7916_p1 = pnand %p7914_p0, %p7911_p13 }
0x2991   :  { %7919 = shalt.err (!%p7916_p1)
}
0x2992   :  { %6277 = dma.vmem_to_hbm [thread:$0]  %s6272_s7, 256, %s9131_s15, [#allocation5], %s7951_s17, %s7951_s17, %s7952_s18  }
0x2993   :  { %v6579_v62 = vld [vmem:[%s9128_s12] ss:$0 sm:$0xff]  ;;  %s7954_s11 = smov [#allocation2]  }
0x2994   :  { %s6247_s26 = sshll.u32 %s7954_s11, 4  ;;  %s6248_s26 = int_to_ptr.vmem [resolvable:$true] %s6247_s26 }
0x2995   :  { %s7920_s10 = scalar_lea.vmem %s6248_s26, 256  ;;  %p7925_p3 = scmp.lt.s32.totalorder %s6248_s26, %s6248_s26 }
0x2996   :  { %p7921_p2 = scmp.ne.s32.totalorder %s6248_s26, %s7920_s10  ;;  %p7926_p4 = scmp.lt.s32.totalorder %s7920_s10, %s7920_s10 }
0x2998   :  { %p7927_p5 = por %p7926_p4, %p7925_p3 }
0x299a   :  { %p7928_p6 = pnand %p7927_p5, %p7921_p2 }
0x2a4b   :  { %v7463_v0 = vpop.f32.mrb[70].mxu1 }
0x2a4c   :  { %v6237_v48 = vadd.f32 %v7463_v0, %v6579_v62  ;;  %v6231_v7 = vpop.f32.mrb[71].mxu1 }
0x2a4d   :  { %v6232_v13 = vadd.f32 %v6579_v62, %v6231_v7 }
0x2a4e   :  { %6241 = vst.msk [vmem:[#allocation2 + $0x8] sm:$0xff] %vm75_vm0, %v6237_v48 }
0x2a4f   :  { %6240 = vst.msk [vmem:[#allocation2] sm:$0xff] %vm75_vm0, %v6232_v13 }
0x2a50   :  { %7931 = shalt.err (!%p7928_p6)
}
0x2a51   :  { %s7932_s27 = scalar_lea.hbm %s9129_s13, 256 }
0x2a52   :  { %p7933_p7 = scmp.ne.s32.totalorder %s9129_s13, %s7932_s27  ;;  %p7936_p8 = scmp.lt.u32.totalorder %s7932_s27, %s9129_s13 }
0x2a54   :  { %p7938_p9 = pnand %p7936_p8, %p7933_p7 }
0x2a56   :  { %7941 = shalt.err (!%p7938_p9)
}
0x2a57   :  { %6253 = dma.vmem_to_hbm [thread:$0]  %s6248_s26, 256, %s9129_s13, [#allocation3], %s7951_s17, %s7951_s17, %s7952_s18  }
0x2a58   :  { %7942 = dma.done.wait [#allocation3], 256  }
0x2a59   :  { %7943 = vsyncadd [#allocation3], 4294967040 }
0x2a5a   :  { %7944 = dma.done.wait [#allocation5], 512  }
0x2a5b   :  { %7945 = vsyncadd [#allocation5], 4294966784 }
0x2a5c   :  { %6287 = vsyncpa [#allocation3], 1 }
0x2a5d   :  { %6288 = vsyncpa [#allocation5], 1 }

</bundles_post_ra>
